<compile_context>
chip_gen: v6e
topology: v6e:2x2x1
jax: 0.10.0
libtpu: 0.0.40
codegen_flags: <defaults>
</compile_context>

<pallas_src>
import jax
import jax.numpy as jnp
import numpy as np
from jax.experimental import pallas as pl
from jax.experimental.pallas import tpu as pltpu

# ----------------------------- static configuration -----------------------------
B = 2          # batch
T = 8          # sequence length (conv "W" dim)
N = 16         # number of graph nodes (conv "H" dim)
C_IN = 4       # in_channels
C_CONV = 32    # conv_channels
END_CH = 64    # end_channels
C_OUT = 12     # out_channels

ALPHA = 1.0
TIME_1, STEP_1 = 1.0, 0.25     # outer ODE (ST block)
TIME_2, STEP_2 = 1.0, 0.5      # inner ODE (CGP graph diffusion)
K1 = round(TIME_1 / STEP_1)    # outer Euler steps
K2 = round(TIME_2 / STEP_2)    # inner Euler steps
EPS = 1e-5

TN = T * N                     # columns per batch element (128)
BTN = B * TN                   # total lane width (256)


# ----------------------------------- kernel -------------------------------------
def mtgode_kernel(x_ref, ka_ref, kat_ref,
                  w0_ref, b0_ref,
                  wm1_ref, bm1_ref, wm2_ref, bm2_ref,
                  we0_ref, be0_ref, we1_ref, be1_ref, we2_ref, be2_ref,
                  out_ref):
    # Load everything from VMEM exactly once (hoisted out of all loops).
    x = x_ref[...]                       # (C_IN, B*T*N)
    ka = ka_ref[...]                     # (B*T*N, B*T*N)  = kron(I, A^T)
    kat = kat_ref[...]                   # (B*T*N, B*T*N)  = kron(I, A)
    w0, b0 = w0_ref[...], b0_ref[...]
    wm1, bm1 = wm1_ref[...], bm1_ref[...]
    wm2, bm2 = wm2_ref[...], bm2_ref[...]
    we0, be0 = we0_ref[...], be0_ref[...]
    we1, be1 = we1_ref[...], be1_ref[...]
    we2, be2 = we2_ref[...], be2_ref[...]

    def mm(a, b):
        # standard (M,K)@(K,N) matmul, f32 accumulation on the MXU
        return jax.lax.dot_general(a, b, (((1,), (0,)), ((), ())),
                                   preferred_element_type=jnp.float32)

    def conv1x1(h, w, b):
        # channels-first: (c_out, c_in) @ (c_in, B*T*N) + (c_out, 1)
        return mm(w, h) + b

    def cgp_diffuse(z, kmat):
        # Euler integration of dz/dt = 0.5*alpha*(A z - z), node dim lives inside the
        # lane axis, so A-application is a lane-dense matmul with the kron'd adjacency.
        for _ in range(K2):              # K2 = 2, fully unrolled
            z = z + (STEP_2 * 0.5 * ALPHA) * (mm(z, kmat) - z)
        return z

    # start_conv (1x1)
    h = conv1x1(x, w0, b0)               # (C_CONV, B*T*N)

    # outer ODE block: fixed-step Euler, fully unrolled (K1 = 4)
    # TODO(synk): dropout inside the ST block treated as identity (inference).
    for _ in range(K1):
        g = conv1x1(cgp_diffuse(h, ka), wm1, bm1) \
            + conv1x1(cgp_diffuse(h, kat), wm2, bm2)
        h = h + STEP_1 * g

    # LayerNorm over all non-batch dims (no affine), computed per batch element.
    # Each batch element occupies a contiguous 128-wide lane slab; build per-column
    # mean / inv-std rows with masks (no slicing, no concat, no relayout).
    col_ids = jax.lax.broadcasted_iota(jnp.int32, (1, BTN), 1)
    mean_row = jnp.zeros((1, BTN), jnp.float32)
    istd_row = jnp.zeros((1, BTN), jnp.float32)
    n_elem = float(C_CONV * TN)
    for b in range(B):
        mask = (col_ids >= b * TN) & (col_ids < (b + 1) * TN)
        m = jnp.sum(jnp.where(mask, h, 0.0)) / n_elem
        v = jnp.sum(jnp.where(mask, (h - m) ** 2, 0.0)) / n_elem
        mean_row = jnp.where(mask, m, mean_row)
        istd_row = jnp.where(mask, jax.lax.rsqrt(v + EPS), istd_row)
    h = (h - mean_row) * istd_row

    # end convs (all lane-dense channels-first matmuls)
    h = jnp.maximum(conv1x1(h, we0, be0), 0.0)
    h = jnp.maximum(conv1x1(h, we1, be1), 0.0)
    out_ref[...] = conv1x1(h, we2, be2)  # (C_OUT, B*T*N): unmasked full-lane stores


# ---------------------------------- wrapper --------------------------------------
def mtgode_forward(x, A, params):
    """x: (B, T, N, C_IN) float32; A: (N, N); returns (B, T, N, C_OUT)."""
    (w0, b0, wm1, bm1, wm2, bm2, we0, be0, we1, be1, we2, be2) = params

    # channels-first, batch folded into the lane dim: (C_IN, B*T*N)
    x_cf = jnp.transpose(x, (3, 0, 1, 2)).reshape(C_IN, BTN)

    # Graph propagation as a lane-axis matmul: column index = b*T*N + t*N + n, so
    # "apply adj over the node dim" == right-multiply by kron(I_{B*T}, adj^T).
    eye_bt = jnp.eye(B * T, dtype=jnp.float32)
    ka = jnp.kron(eye_bt, A.T)     # branch with adj = A
    kat = jnp.kron(eye_bt, A)      # branch with adj = A.T

    col = lambda b: b.reshape(-1, 1)   # biases -> (c_out, 1) for lane broadcast

    out = pl.pallas_call(
        mtgode_kernel,
        out_shape=jax.ShapeDtypeStruct((C_OUT, BTN), jnp.float32),
    )(x_cf, ka, kat,
      w0, col(b0), wm1, col(bm1), wm2, col(bm2),
      we0, col(be0), we1, col(be1), we2, col(be2))

    # (C_OUT, B*T*N) -> (B, T, N, C_OUT)
    return jnp.transpose(out.reshape(C_OUT, B, T, N), (1, 2, 3, 0))


# -------------------------- pure-JAX reference (PyTorch semantics) ----------------
def reference(x, A, params):
    (w0, b0, wm1, bm1, wm2, bm2, we0, be0, we1, be1, we2, be2) = params
    xt = jnp.transpose(x, (0, 3, 2, 1))  # x.transpose(-1, -3): (B, C_IN, N, T)

    def conv(h, w, b):
        return jnp.einsum('bcnt,dc->bdnt', h, w) + b.reshape(1, -1, 1, 1)

    def cgp(h, adj):
        z = h
        for _ in range(K2):
            az = jnp.einsum('vw,bcwt->bcvt', adj, z)
            z = z + STEP_2 * 0.5 * ALPHA * (az - z)
        return z

    def st(h):
        return conv(cgp(h, A), wm1, bm1) + conv(cgp(h, A.T), wm2, bm2)

    h = conv(xt, w0, b0)
    for _ in range(K1):
        h = h + STEP_1 * st(h)

    mean = h.mean(axis=(1, 2, 3), keepdims=True)
    var = ((h - mean) ** 2).mean(axis=(1, 2, 3), keepdims=True)
    h = (h - mean) / jnp.sqrt(var + EPS)

    h = jax.nn.relu(conv(h, we0, be0))
    h = jax.nn.relu(conv(h, we1, be1))
    h = conv(h, we2, be2)
    return jnp.transpose(h, (0, 3, 2, 1))  # (B, T, N, C_OUT)


# ------------------------------------ main ----------------------------------------
if __name__ == "__main__":
    key = jax.random.PRNGKey(0)
    ks = jax.random.split(key, 16)

    x = jax.random.normal(ks[0], (B, T, N, C_IN), jnp.float32)
    A_raw = jax.random.uniform(ks[1], (N, N), jnp.float32)
    A = A_raw / A_raw.sum(axis=1, keepdims=True)  # predefined_A (row-normalized)

    def w(k, shape, scale=0.1):
        return scale * jax.random.normal(k, shape, jnp.float32)

    params = (
        w(ks[2], (C_CONV, C_IN)),          w(ks[3], (1, C_CONV)),        # start_conv
        w(ks[4], (C_CONV, C_CONV)),        w(ks[5], (1, C_CONV)),        # gconv_1 mlp
        w(ks[6], (C_CONV, C_CONV)),        w(ks[7], (1, C_CONV)),        # gconv_2 mlp
        w(ks[8], (END_CH // 2, C_CONV)),   w(ks[9], (1, END_CH // 2)),   # end_conv_0
        w(ks[10], (END_CH, END_CH // 2)),  w(ks[11], (1, END_CH)),       # end_conv_1
        w(ks[12], (C_OUT, END_CH)),        w(ks[13], (1, C_OUT)),        # end_conv_2
    )

    out = jax.block_until_ready(mtgode_forward(x, A, params))
    ref = jax.block_until_ready(reference(x, A, params))

    assert out.shape == (B, T, N, C_OUT), out.shape
    np.testing.assert_allclose(np.asarray(out), np.asarray(ref), rtol=2e-3, atol=2e-3)
    print("KERNEL_OK")
</pallas_src>

<mosaic_0001>
module attributes {stable_mosaic.version = 11 : i64} {
  func.func @mtgode_kernel(%arg0: memref<4x256xf32, #tpu.memory_space<vmem>>, %arg1: memref<256x256xf32, #tpu.memory_space<vmem>>, %arg2: memref<256x256xf32, #tpu.memory_space<vmem>>, %arg3: memref<32x4xf32, #tpu.memory_space<vmem>>, %arg4: memref<32x1xf32, #tpu.memory_space<vmem>>, %arg5: memref<32x32xf32, #tpu.memory_space<vmem>>, %arg6: memref<32x1xf32, #tpu.memory_space<vmem>>, %arg7: memref<32x32xf32, #tpu.memory_space<vmem>>, %arg8: memref<32x1xf32, #tpu.memory_space<vmem>>, %arg9: memref<32x32xf32, #tpu.memory_space<vmem>>, %arg10: memref<32x1xf32, #tpu.memory_space<vmem>>, %arg11: memref<64x32xf32, #tpu.memory_space<vmem>>, %arg12: memref<64x1xf32, #tpu.memory_space<vmem>>, %arg13: memref<12x64xf32, #tpu.memory_space<vmem>>, %arg14: memref<12x1xf32, #tpu.memory_space<vmem>>, %arg15: memref<12x256xf32, #tpu.memory_space<vmem>>) attributes {dimension_semantics = [], scalar_prefetch = 0 : i64, scratch_operands = 0 : i64, tpu.core_type = #tpu.core_type<tc>} {
    %c0 = arith.constant 0 : index
    %c0_0 = arith.constant 0 : index
    %0 = vector.load %arg0[%c0, %c0_0] : memref<4x256xf32, #tpu.memory_space<vmem>>, vector<4x256xf32>
    %c0_1 = arith.constant 0 : index
    %c0_2 = arith.constant 0 : index
    %1 = vector.load %arg1[%c0_1, %c0_2] : memref<256x256xf32, #tpu.memory_space<vmem>>, vector<256x256xf32>
    %c0_3 = arith.constant 0 : index
    %c0_4 = arith.constant 0 : index
    %2 = vector.load %arg2[%c0_3, %c0_4] : memref<256x256xf32, #tpu.memory_space<vmem>>, vector<256x256xf32>
    %c0_5 = arith.constant 0 : index
    %c0_6 = arith.constant 0 : index
    %3 = vector.load %arg3[%c0_5, %c0_6] : memref<32x4xf32, #tpu.memory_space<vmem>>, vector<32x4xf32>
    %c0_7 = arith.constant 0 : index
    %c0_8 = arith.constant 0 : index
    %4 = vector.load %arg4[%c0_7, %c0_8] : memref<32x1xf32, #tpu.memory_space<vmem>>, vector<32x1xf32>
    %c0_9 = arith.constant 0 : index
    %c0_10 = arith.constant 0 : index
    %5 = vector.load %arg5[%c0_9, %c0_10] : memref<32x32xf32, #tpu.memory_space<vmem>>, vector<32x32xf32>
    %c0_11 = arith.constant 0 : index
    %c0_12 = arith.constant 0 : index
    %6 = vector.load %arg6[%c0_11, %c0_12] : memref<32x1xf32, #tpu.memory_space<vmem>>, vector<32x1xf32>
    %c0_13 = arith.constant 0 : index
    %c0_14 = arith.constant 0 : index
    %7 = vector.load %arg7[%c0_13, %c0_14] : memref<32x32xf32, #tpu.memory_space<vmem>>, vector<32x32xf32>
    %c0_15 = arith.constant 0 : index
    %c0_16 = arith.constant 0 : index
    %8 = vector.load %arg8[%c0_15, %c0_16] : memref<32x1xf32, #tpu.memory_space<vmem>>, vector<32x1xf32>
    %c0_17 = arith.constant 0 : index
    %c0_18 = arith.constant 0 : index
    %9 = vector.load %arg9[%c0_17, %c0_18] : memref<32x32xf32, #tpu.memory_space<vmem>>, vector<32x32xf32>
    %c0_19 = arith.constant 0 : index
    %c0_20 = arith.constant 0 : index
    %10 = vector.load %arg10[%c0_19, %c0_20] : memref<32x1xf32, #tpu.memory_space<vmem>>, vector<32x1xf32>
    %c0_21 = arith.constant 0 : index
    %c0_22 = arith.constant 0 : index
    %11 = vector.load %arg11[%c0_21, %c0_22] : memref<64x32xf32, #tpu.memory_space<vmem>>, vector<64x32xf32>
    %c0_23 = arith.constant 0 : index
    %c0_24 = arith.constant 0 : index
    %12 = vector.load %arg12[%c0_23, %c0_24] : memref<64x1xf32, #tpu.memory_space<vmem>>, vector<64x1xf32>
    %c0_25 = arith.constant 0 : index
    %c0_26 = arith.constant 0 : index
    %13 = vector.load %arg13[%c0_25, %c0_26] : memref<12x64xf32, #tpu.memory_space<vmem>>, vector<12x64xf32>
    %c0_27 = arith.constant 0 : index
    %c0_28 = arith.constant 0 : index
    %14 = vector.load %arg14[%c0_27, %c0_28] : memref<12x1xf32, #tpu.memory_space<vmem>>, vector<12x1xf32>
    %cst = arith.constant dense<0.000000e+00> : vector<32x256xf32>
    %15 = tpu.matmul %3, %0, %cst {dimension_numbers = #tpu.dot_dimension_numbers<[1], [0], [0], [1], [0, 0, 1, 1], [], []>} : vector<32x4xf32>, vector<4x256xf32>, vector<32x256xf32> -> vector<32x256xf32>
    %16 = vector.broadcast %4 : vector<32x1xf32> to vector<32x256xf32>
    %17 = arith.addf %15, %16 : vector<32x256xf32>
    %cst_29 = arith.constant dense<0.000000e+00> : vector<32x256xf32>
    %18 = tpu.matmul %17, %1, %cst_29 {dimension_numbers = #tpu.dot_dimension_numbers<[1], [0], [0], [1], [0, 0, 1, 1], [], []>} : vector<32x256xf32>, vector<256x256xf32>, vector<32x256xf32> -> vector<32x256xf32>
    %19 = arith.subf %18, %17 : vector<32x256xf32>
    %cst_30 = arith.constant 2.500000e-01 : f32
    %20 = vector.broadcast %cst_30 : f32 to vector<32x256xf32>
    %21 = arith.mulf %20, %19 : vector<32x256xf32>
    %22 = arith.addf %17, %21 : vector<32x256xf32>
    %cst_31 = arith.constant dense<0.000000e+00> : vector<32x256xf32>
    %23 = tpu.matmul %22, %1, %cst_31 {dimension_numbers = #tpu.dot_dimension_numbers<[1], [0], [0], [1], [0, 0, 1, 1], [], []>} : vector<32x256xf32>, vector<256x256xf32>, vector<32x256xf32> -> vector<32x256xf32>
    %24 = arith.subf %23, %22 : vector<32x256xf32>
    %cst_32 = arith.constant 2.500000e-01 : f32
    %25 = vector.broadcast %cst_32 : f32 to vector<32x256xf32>
    %26 = arith.mulf %25, %24 : vector<32x256xf32>
    %27 = arith.addf %22, %26 : vector<32x256xf32>
    %cst_33 = arith.constant dense<0.000000e+00> : vector<32x256xf32>
    %28 = tpu.matmul %5, %27, %cst_33 {dimension_numbers = #tpu.dot_dimension_numbers<[1], [0], [0], [1], [0, 0, 1, 1], [], []>} : vector<32x32xf32>, vector<32x256xf32>, vector<32x256xf32> -> vector<32x256xf32>
    %29 = vector.broadcast %6 : vector<32x1xf32> to vector<32x256xf32>
    %30 = arith.addf %28, %29 : vector<32x256xf32>
    %cst_34 = arith.constant dense<0.000000e+00> : vector<32x256xf32>
    %31 = tpu.matmul %17, %2, %cst_34 {dimension_numbers = #tpu.dot_dimension_numbers<[1], [0], [0], [1], [0, 0, 1, 1], [], []>} : vector<32x256xf32>, vector<256x256xf32>, vector<32x256xf32> -> vector<32x256xf32>
    %32 = arith.subf %31, %17 : vector<32x256xf32>
    %cst_35 = arith.constant 2.500000e-01 : f32
    %33 = vector.broadcast %cst_35 : f32 to vector<32x256xf32>
    %34 = arith.mulf %33, %32 : vector<32x256xf32>
    %35 = arith.addf %17, %34 : vector<32x256xf32>
    %cst_36 = arith.constant dense<0.000000e+00> : vector<32x256xf32>
    %36 = tpu.matmul %35, %2, %cst_36 {dimension_numbers = #tpu.dot_dimension_numbers<[1], [0], [0], [1], [0, 0, 1, 1], [], []>} : vector<32x256xf32>, vector<256x256xf32>, vector<32x256xf32> -> vector<32x256xf32>
    %37 = arith.subf %36, %35 : vector<32x256xf32>
    %cst_37 = arith.constant 2.500000e-01 : f32
    %38 = vector.broadcast %cst_37 : f32 to vector<32x256xf32>
    %39 = arith.mulf %38, %37 : vector<32x256xf32>
    %40 = arith.addf %35, %39 : vector<32x256xf32>
    %cst_38 = arith.constant dense<0.000000e+00> : vector<32x256xf32>
    %41 = tpu.matmul %7, %40, %cst_38 {dimension_numbers = #tpu.dot_dimension_numbers<[1], [0], [0], [1], [0, 0, 1, 1], [], []>} : vector<32x32xf32>, vector<32x256xf32>, vector<32x256xf32> -> vector<32x256xf32>
    %42 = vector.broadcast %8 : vector<32x1xf32> to vector<32x256xf32>
    %43 = arith.addf %41, %42 : vector<32x256xf32>
    %44 = arith.addf %30, %43 : vector<32x256xf32>
    %cst_39 = arith.constant 2.500000e-01 : f32
    %45 = vector.broadcast %cst_39 : f32 to vector<32x256xf32>
    %46 = arith.mulf %45, %44 : vector<32x256xf32>
    %47 = arith.addf %17, %46 : vector<32x256xf32>
    %cst_40 = arith.constant dense<0.000000e+00> : vector<32x256xf32>
    %48 = tpu.matmul %47, %1, %cst_40 {dimension_numbers = #tpu.dot_dimension_numbers<[1], [0], [0], [1], [0, 0, 1, 1], [], []>} : vector<32x256xf32>, vector<256x256xf32>, vector<32x256xf32> -> vector<32x256xf32>
    %49 = arith.subf %48, %47 : vector<32x256xf32>
    %cst_41 = arith.constant 2.500000e-01 : f32
    %50 = vector.broadcast %cst_41 : f32 to vector<32x256xf32>
    %51 = arith.mulf %50, %49 : vector<32x256xf32>
    %52 = arith.addf %47, %51 : vector<32x256xf32>
    %cst_42 = arith.constant dense<0.000000e+00> : vector<32x256xf32>
    %53 = tpu.matmul %52, %1, %cst_42 {dimension_numbers = #tpu.dot_dimension_numbers<[1], [0], [0], [1], [0, 0, 1, 1], [], []>} : vector<32x256xf32>, vector<256x256xf32>, vector<32x256xf32> -> vector<32x256xf32>
    %54 = arith.subf %53, %52 : vector<32x256xf32>
    %cst_43 = arith.constant 2.500000e-01 : f32
    %55 = vector.broadcast %cst_43 : f32 to vector<32x256xf32>
    %56 = arith.mulf %55, %54 : vector<32x256xf32>
    %57 = arith.addf %52, %56 : vector<32x256xf32>
    %cst_44 = arith.constant dense<0.000000e+00> : vector<32x256xf32>
    %58 = tpu.matmul %5, %57, %cst_44 {dimension_numbers = #tpu.dot_dimension_numbers<[1], [0], [0], [1], [0, 0, 1, 1], [], []>} : vector<32x32xf32>, vector<32x256xf32>, vector<32x256xf32> -> vector<32x256xf32>
    %59 = vector.broadcast %6 : vector<32x1xf32> to vector<32x256xf32>
    %60 = arith.addf %58, %59 : vector<32x256xf32>
    %cst_45 = arith.constant dense<0.000000e+00> : vector<32x256xf32>
    %61 = tpu.matmul %47, %2, %cst_45 {dimension_numbers = #tpu.dot_dimension_numbers<[1], [0], [0], [1], [0, 0, 1, 1], [], []>} : vector<32x256xf32>, vector<256x256xf32>, vector<32x256xf32> -> vector<32x256xf32>
    %62 = arith.subf %61, %47 : vector<32x256xf32>
    %cst_46 = arith.constant 2.500000e-01 : f32
    %63 = vector.broadcast %cst_46 : f32 to vector<32x256xf32>
    %64 = arith.mulf %63, %62 : vector<32x256xf32>
    %65 = arith.addf %47, %64 : vector<32x256xf32>
    %cst_47 = arith.constant dense<0.000000e+00> : vector<32x256xf32>
    %66 = tpu.matmul %65, %2, %cst_47 {dimension_numbers = #tpu.dot_dimension_numbers<[1], [0], [0], [1], [0, 0, 1, 1], [], []>} : vector<32x256xf32>, vector<256x256xf32>, vector<32x256xf32> -> vector<32x256xf32>
    %67 = arith.subf %66, %65 : vector<32x256xf32>
    %cst_48 = arith.constant 2.500000e-01 : f32
    %68 = vector.broadcast %cst_48 : f32 to vector<32x256xf32>
    %69 = arith.mulf %68, %67 : vector<32x256xf32>
    %70 = arith.addf %65, %69 : vector<32x256xf32>
    %cst_49 = arith.constant dense<0.000000e+00> : vector<32x256xf32>
    %71 = tpu.matmul %7, %70, %cst_49 {dimension_numbers = #tpu.dot_dimension_numbers<[1], [0], [0], [1], [0, 0, 1, 1], [], []>} : vector<32x32xf32>, vector<32x256xf32>, vector<32x256xf32> -> vector<32x256xf32>
    %72 = vector.broadcast %8 : vector<32x1xf32> to vector<32x256xf32>
    %73 = arith.addf %71, %72 : vector<32x256xf32>
    %74 = arith.addf %60, %73 : vector<32x256xf32>
    %cst_50 = arith.constant 2.500000e-01 : f32
    %75 = vector.broadcast %cst_50 : f32 to vector<32x256xf32>
    %76 = arith.mulf %75, %74 : vector<32x256xf32>
    %77 = arith.addf %47, %76 : vector<32x256xf32>
    %cst_51 = arith.constant dense<0.000000e+00> : vector<32x256xf32>
    %78 = tpu.matmul %77, %1, %cst_51 {dimension_numbers = #tpu.dot_dimension_numbers<[1], [0], [0], [1], [0, 0, 1, 1], [], []>} : vector<32x256xf32>, vector<256x256xf32>, vector<32x256xf32> -> vector<32x256xf32>
    %79 = arith.subf %78, %77 : vector<32x256xf32>
    %cst_52 = arith.constant 2.500000e-01 : f32
    %80 = vector.broadcast %cst_52 : f32 to vector<32x256xf32>
    %81 = arith.mulf %80, %79 : vector<32x256xf32>
    %82 = arith.addf %77, %81 : vector<32x256xf32>
    %cst_53 = arith.constant dense<0.000000e+00> : vector<32x256xf32>
    %83 = tpu.matmul %82, %1, %cst_53 {dimension_numbers = #tpu.dot_dimension_numbers<[1], [0], [0], [1], [0, 0, 1, 1], [], []>} : vector<32x256xf32>, vector<256x256xf32>, vector<32x256xf32> -> vector<32x256xf32>
    %84 = arith.subf %83, %82 : vector<32x256xf32>
    %cst_54 = arith.constant 2.500000e-01 : f32
    %85 = vector.broadcast %cst_54 : f32 to vector<32x256xf32>
    %86 = arith.mulf %85, %84 : vector<32x256xf32>
    %87 = arith.addf %82, %86 : vector<32x256xf32>
    %cst_55 = arith.constant dense<0.000000e+00> : vector<32x256xf32>
    %88 = tpu.matmul %5, %87, %cst_55 {dimension_numbers = #tpu.dot_dimension_numbers<[1], [0], [0], [1], [0, 0, 1, 1], [], []>} : vector<32x32xf32>, vector<32x256xf32>, vector<32x256xf32> -> vector<32x256xf32>
    %89 = vector.broadcast %6 : vector<32x1xf32> to vector<32x256xf32>
    %90 = arith.addf %88, %89 : vector<32x256xf32>
    %cst_56 = arith.constant dense<0.000000e+00> : vector<32x256xf32>
    %91 = tpu.matmul %77, %2, %cst_56 {dimension_numbers = #tpu.dot_dimension_numbers<[1], [0], [0], [1], [0, 0, 1, 1], [], []>} : vector<32x256xf32>, vector<256x256xf32>, vector<32x256xf32> -> vector<32x256xf32>
    %92 = arith.subf %91, %77 : vector<32x256xf32>
    %cst_57 = arith.constant 2.500000e-01 : f32
    %93 = vector.broadcast %cst_57 : f32 to vector<32x256xf32>
    %94 = arith.mulf %93, %92 : vector<32x256xf32>
    %95 = arith.addf %77, %94 : vector<32x256xf32>
    %cst_58 = arith.constant dense<0.000000e+00> : vector<32x256xf32>
    %96 = tpu.matmul %95, %2, %cst_58 {dimension_numbers = #tpu.dot_dimension_numbers<[1], [0], [0], [1], [0, 0, 1, 1], [], []>} : vector<32x256xf32>, vector<256x256xf32>, vector<32x256xf32> -> vector<32x256xf32>
    %97 = arith.subf %96, %95 : vector<32x256xf32>
    %cst_59 = arith.constant 2.500000e-01 : f32
    %98 = vector.broadcast %cst_59 : f32 to vector<32x256xf32>
    %99 = arith.mulf %98, %97 : vector<32x256xf32>
    %100 = arith.addf %95, %99 : vector<32x256xf32>
    %cst_60 = arith.constant dense<0.000000e+00> : vector<32x256xf32>
    %101 = tpu.matmul %7, %100, %cst_60 {dimension_numbers = #tpu.dot_dimension_numbers<[1], [0], [0], [1], [0, 0, 1, 1], [], []>} : vector<32x32xf32>, vector<32x256xf32>, vector<32x256xf32> -> vector<32x256xf32>
    %102 = vector.broadcast %8 : vector<32x1xf32> to vector<32x256xf32>
    %103 = arith.addf %101, %102 : vector<32x256xf32>
    %104 = arith.addf %90, %103 : vector<32x256xf32>
    %cst_61 = arith.constant 2.500000e-01 : f32
    %105 = vector.broadcast %cst_61 : f32 to vector<32x256xf32>
    %106 = arith.mulf %105, %104 : vector<32x256xf32>
    %107 = arith.addf %77, %106 : vector<32x256xf32>
    %cst_62 = arith.constant dense<0.000000e+00> : vector<32x256xf32>
    %108 = tpu.matmul %107, %1, %cst_62 {dimension_numbers = #tpu.dot_dimension_numbers<[1], [0], [0], [1], [0, 0, 1, 1], [], []>} : vector<32x256xf32>, vector<256x256xf32>, vector<32x256xf32> -> vector<32x256xf32>
    %109 = arith.subf %108, %107 : vector<32x256xf32>
    %cst_63 = arith.constant 2.500000e-01 : f32
    %110 = vector.broadcast %cst_63 : f32 to vector<32x256xf32>
    %111 = arith.mulf %110, %109 : vector<32x256xf32>
    %112 = arith.addf %107, %111 : vector<32x256xf32>
    %cst_64 = arith.constant dense<0.000000e+00> : vector<32x256xf32>
    %113 = tpu.matmul %112, %1, %cst_64 {dimension_numbers = #tpu.dot_dimension_numbers<[1], [0], [0], [1], [0, 0, 1, 1], [], []>} : vector<32x256xf32>, vector<256x256xf32>, vector<32x256xf32> -> vector<32x256xf32>
    %114 = arith.subf %113, %112 : vector<32x256xf32>
    %cst_65 = arith.constant 2.500000e-01 : f32
    %115 = vector.broadcast %cst_65 : f32 to vector<32x256xf32>
    %116 = arith.mulf %115, %114 : vector<32x256xf32>
    %117 = arith.addf %112, %116 : vector<32x256xf32>
    %cst_66 = arith.constant dense<0.000000e+00> : vector<32x256xf32>
    %118 = tpu.matmul %5, %117, %cst_66 {dimension_numbers = #tpu.dot_dimension_numbers<[1], [0], [0], [1], [0, 0, 1, 1], [], []>} : vector<32x32xf32>, vector<32x256xf32>, vector<32x256xf32> -> vector<32x256xf32>
    %119 = vector.broadcast %6 : vector<32x1xf32> to vector<32x256xf32>
    %120 = arith.addf %118, %119 : vector<32x256xf32>
    %cst_67 = arith.constant dense<0.000000e+00> : vector<32x256xf32>
    %121 = tpu.matmul %107, %2, %cst_67 {dimension_numbers = #tpu.dot_dimension_numbers<[1], [0], [0], [1], [0, 0, 1, 1], [], []>} : vector<32x256xf32>, vector<256x256xf32>, vector<32x256xf32> -> vector<32x256xf32>
    %122 = arith.subf %121, %107 : vector<32x256xf32>
    %cst_68 = arith.constant 2.500000e-01 : f32
    %123 = vector.broadcast %cst_68 : f32 to vector<32x256xf32>
    %124 = arith.mulf %123, %122 : vector<32x256xf32>
    %125 = arith.addf %107, %124 : vector<32x256xf32>
    %cst_69 = arith.constant dense<0.000000e+00> : vector<32x256xf32>
    %126 = tpu.matmul %125, %2, %cst_69 {dimension_numbers = #tpu.dot_dimension_numbers<[1], [0], [0], [1], [0, 0, 1, 1], [], []>} : vector<32x256xf32>, vector<256x256xf32>, vector<32x256xf32> -> vector<32x256xf32>
    %127 = arith.subf %126, %125 : vector<32x256xf32>
    %cst_70 = arith.constant 2.500000e-01 : f32
    %128 = vector.broadcast %cst_70 : f32 to vector<32x256xf32>
    %129 = arith.mulf %128, %127 : vector<32x256xf32>
    %130 = arith.addf %125, %129 : vector<32x256xf32>
    %cst_71 = arith.constant dense<0.000000e+00> : vector<32x256xf32>
    %131 = tpu.matmul %7, %130, %cst_71 {dimension_numbers = #tpu.dot_dimension_numbers<[1], [0], [0], [1], [0, 0, 1, 1], [], []>} : vector<32x32xf32>, vector<32x256xf32>, vector<32x256xf32> -> vector<32x256xf32>
    %132 = vector.broadcast %8 : vector<32x1xf32> to vector<32x256xf32>
    %133 = arith.addf %131, %132 : vector<32x256xf32>
    %134 = arith.addf %120, %133 : vector<32x256xf32>
    %cst_72 = arith.constant 2.500000e-01 : f32
    %135 = vector.broadcast %cst_72 : f32 to vector<32x256xf32>
    %136 = arith.mulf %135, %134 : vector<32x256xf32>
    %137 = arith.addf %107, %136 : vector<32x256xf32>
    %138 = tpu.iota {dimensions = array<i32: 1>} : vector<1x256xi32>
    %cst_73 = arith.constant 0.000000e+00 : f32
    %139 = vector.broadcast %cst_73 : f32 to vector<1x256xf32>
    %cst_74 = arith.constant 0.000000e+00 : f32
    %140 = vector.broadcast %cst_74 : f32 to vector<1x256xf32>
    %c0_i32 = arith.constant 0 : i32
    %141 = vector.broadcast %c0_i32 : i32 to vector<1x256xi32>
    %142 = arith.cmpi sge, %138, %141 : vector<1x256xi32>
    %c128_i32 = arith.constant 128 : i32
    %143 = vector.broadcast %c128_i32 : i32 to vector<1x256xi32>
    %144 = arith.cmpi slt, %138, %143 : vector<1x256xi32>
    %145 = arith.andi %142, %144 : vector<1x256xi1>
    %cst_75 = arith.constant 0.000000e+00 : f32
    %146 = vector.shape_cast %145 : vector<1x256xi1> to vector<1x256xi1>
    %147 = vector.broadcast %146 : vector<1x256xi1> to vector<32x256xi1>
    %148 = vector.broadcast %cst_75 : f32 to vector<32x256xf32>
    %149 = arith.select %147, %137, %148 : vector<32x256xi1>, vector<32x256xf32>
    %150 = vector.shape_cast %149 : vector<32x256xf32> to vector<1x32x256xf32>
    %cst_76 = arith.constant dense<0.000000e+00> : vector<1xf32>
    %151 = vector.multi_reduction <add>, %150, %cst_76 [1, 2] : vector<1x32x256xf32> to vector<1xf32>
    %152 = vector.shape_cast %151 : vector<1xf32> to vector<1x1x1xf32>
    %153 = vector.extract %152[0, 0, 0] : f32 from vector<1x1x1xf32>
    %cst_77 = arith.constant 4.096000e+03 : f32
    %154 = arith.divf %153, %cst_77 : f32
    %155 = vector.broadcast %154 : f32 to vector<32x256xf32>
    %156 = arith.subf %137, %155 : vector<32x256xf32>
    %157 = arith.mulf %156, %156 : vector<32x256xf32>
    %cst_78 = arith.constant 0.000000e+00 : f32
    %158 = vector.shape_cast %145 : vector<1x256xi1> to vector<1x256xi1>
    %159 = vector.broadcast %158 : vector<1x256xi1> to vector<32x256xi1>
    %160 = vector.broadcast %cst_78 : f32 to vector<32x256xf32>
    %161 = arith.select %159, %157, %160 : vector<32x256xi1>, vector<32x256xf32>
    %162 = vector.shape_cast %161 : vector<32x256xf32> to vector<1x32x256xf32>
    %cst_79 = arith.constant dense<0.000000e+00> : vector<1xf32>
    %163 = vector.multi_reduction <add>, %162, %cst_79 [1, 2] : vector<1x32x256xf32> to vector<1xf32>
    %164 = vector.shape_cast %163 : vector<1xf32> to vector<1x1x1xf32>
    %165 = vector.extract %164[0, 0, 0] : f32 from vector<1x1x1xf32>
    %cst_80 = arith.constant 4.096000e+03 : f32
    %166 = arith.divf %165, %cst_80 : f32
    %167 = vector.broadcast %154 : f32 to vector<1x256xf32>
    %168 = arith.select %145, %167, %139 : vector<1x256xi1>, vector<1x256xf32>
    %cst_81 = arith.constant 9.99999974E-6 : f32
    %169 = arith.addf %166, %cst_81 : f32
    %170 = math.rsqrt %169 : f32
    %171 = vector.broadcast %170 : f32 to vector<1x256xf32>
    %172 = arith.select %145, %171, %140 : vector<1x256xi1>, vector<1x256xf32>
    %c128_i32_82 = arith.constant 128 : i32
    %173 = vector.broadcast %c128_i32_82 : i32 to vector<1x256xi32>
    %174 = arith.cmpi sge, %138, %173 : vector<1x256xi32>
    %c256_i32 = arith.constant 256 : i32
    %175 = vector.broadcast %c256_i32 : i32 to vector<1x256xi32>
    %176 = arith.cmpi slt, %138, %175 : vector<1x256xi32>
    %177 = arith.andi %174, %176 : vector<1x256xi1>
    %cst_83 = arith.constant 0.000000e+00 : f32
    %178 = vector.shape_cast %177 : vector<1x256xi1> to vector<1x256xi1>
    %179 = vector.broadcast %178 : vector<1x256xi1> to vector<32x256xi1>
    %180 = vector.broadcast %cst_83 : f32 to vector<32x256xf32>
    %181 = arith.select %179, %137, %180 : vector<32x256xi1>, vector<32x256xf32>
    %182 = vector.shape_cast %181 : vector<32x256xf32> to vector<1x32x256xf32>
    %cst_84 = arith.constant dense<0.000000e+00> : vector<1xf32>
    %183 = vector.multi_reduction <add>, %182, %cst_84 [1, 2] : vector<1x32x256xf32> to vector<1xf32>
    %184 = vector.shape_cast %183 : vector<1xf32> to vector<1x1x1xf32>
    %185 = vector.extract %184[0, 0, 0] : f32 from vector<1x1x1xf32>
    %cst_85 = arith.constant 4.096000e+03 : f32
    %186 = arith.divf %185, %cst_85 : f32
    %187 = vector.broadcast %186 : f32 to vector<32x256xf32>
    %188 = arith.subf %137, %187 : vector<32x256xf32>
    %189 = arith.mulf %188, %188 : vector<32x256xf32>
    %cst_86 = arith.constant 0.000000e+00 : f32
    %190 = vector.shape_cast %177 : vector<1x256xi1> to vector<1x256xi1>
    %191 = vector.broadcast %190 : vector<1x256xi1> to vector<32x256xi1>
    %192 = vector.broadcast %cst_86 : f32 to vector<32x256xf32>
    %193 = arith.select %191, %189, %192 : vector<32x256xi1>, vector<32x256xf32>
    %194 = vector.shape_cast %193 : vector<32x256xf32> to vector<1x32x256xf32>
    %cst_87 = arith.constant dense<0.000000e+00> : vector<1xf32>
    %195 = vector.multi_reduction <add>, %194, %cst_87 [1, 2] : vector<1x32x256xf32> to vector<1xf32>
    %196 = vector.shape_cast %195 : vector<1xf32> to vector<1x1x1xf32>
    %197 = vector.extract %196[0, 0, 0] : f32 from vector<1x1x1xf32>
    %cst_88 = arith.constant 4.096000e+03 : f32
    %198 = arith.divf %197, %cst_88 : f32
    %199 = vector.broadcast %186 : f32 to vector<1x256xf32>
    %200 = arith.select %177, %199, %168 : vector<1x256xi1>, vector<1x256xf32>
    %cst_89 = arith.constant 9.99999974E-6 : f32
    %201 = arith.addf %198, %cst_89 : f32
    %202 = math.rsqrt %201 : f32
    %203 = vector.broadcast %202 : f32 to vector<1x256xf32>
    %204 = arith.select %177, %203, %172 : vector<1x256xi1>, vector<1x256xf32>
    %205 = vector.broadcast %200 : vector<1x256xf32> to vector<32x256xf32>
    %206 = arith.subf %137, %205 : vector<32x256xf32>
    %207 = vector.broadcast %204 : vector<1x256xf32> to vector<32x256xf32>
    %208 = arith.mulf %206, %207 : vector<32x256xf32>
    %cst_90 = arith.constant dense<0.000000e+00> : vector<32x256xf32>
    %209 = tpu.matmul %9, %208, %cst_90 {dimension_numbers = #tpu.dot_dimension_numbers<[1], [0], [0], [1], [0, 0, 1, 1], [], []>} : vector<32x32xf32>, vector<32x256xf32>, vector<32x256xf32> -> vector<32x256xf32>
    %210 = vector.broadcast %10 : vector<32x1xf32> to vector<32x256xf32>
    %211 = arith.addf %209, %210 : vector<32x256xf32>
    %cst_91 = arith.constant 0.000000e+00 : f32
    %212 = vector.broadcast %cst_91 : f32 to vector<32x256xf32>
    %213 = arith.maximumf %211, %212 : vector<32x256xf32>
    %cst_92 = arith.constant dense<0.000000e+00> : vector<64x256xf32>
    %214 = tpu.matmul %11, %213, %cst_92 {dimension_numbers = #tpu.dot_dimension_numbers<[1], [0], [0], [1], [0, 0, 1, 1], [], []>} : vector<64x32xf32>, vector<32x256xf32>, vector<64x256xf32> -> vector<64x256xf32>
    %215 = vector.broadcast %12 : vector<64x1xf32> to vector<64x256xf32>
    %216 = arith.addf %214, %215 : vector<64x256xf32>
    %cst_93 = arith.constant 0.000000e+00 : f32
    %217 = vector.broadcast %cst_93 : f32 to vector<64x256xf32>
    %218 = arith.maximumf %216, %217 : vector<64x256xf32>
    %cst_94 = arith.constant dense<0.000000e+00> : vector<12x256xf32>
    %219 = tpu.matmul %13, %218, %cst_94 {dimension_numbers = #tpu.dot_dimension_numbers<[1], [0], [0], [1], [0, 0, 1, 1], [], []>} : vector<12x64xf32>, vector<64x256xf32>, vector<12x256xf32> -> vector<12x256xf32>
    %220 = vector.broadcast %14 : vector<12x1xf32> to vector<12x256xf32>
    %221 = arith.addf %219, %220 : vector<12x256xf32>
    %c0_95 = arith.constant 0 : index
    %c0_96 = arith.constant 0 : index
    %222 = vector.load %arg15[%c0_95, %c0_96] : memref<12x256xf32, #tpu.memory_space<vmem>>, vector<12x256xf32>
    tpu.vector_store %arg15[%c0_95, %c0_96], %221 {strides = array<i32>} : memref<12x256xf32, #tpu.memory_space<vmem>>, vector<12x256xf32>,
    return
  }
}

</mosaic_0001>

<bundles_post_ra>
// kernel: tpu_custom_call.1
= control target key start
LH: loop header
LB: loop body
LE: loop exit
PB: predicated region body
PF: predicated region fallthrough
CT: control target
= control target key end

     0   :  { %20 = vsyncpa [#allocation3], 0  ;;  %s7042_s0 = inlined_call_operand.vmem [shape: f32[4,256], index: 0, kind: input, shape index: {}]   ;;  %s7043_s1 = inlined_call_operand.hbm [shape: f32[256,256], index: 1, kind: input, shape index: {}]   ;;  %s7044_s2 = inlined_call_operand.hbm [shape: f32[256,256], index: 2, kind: input, shape index: {}]   ;;  %s7045_s3 = inlined_call_operand.vmem [shape: f32[32,4], index: 3, kind: input, shape index: {}]   ;;  %s7046_s4 = inlined_call_operand.vmem [shape: f32[32,1], index: 4, kind: input, shape index: {}]   ;;  %s7047_s5 = inlined_call_operand.vmem [shape: f32[32,32], index: 5, kind: input, shape index: {}]   ;;  %s7048_s6 = inlined_call_operand.vmem [shape: f32[32,1], index: 6, kind: input, shape index: {}]   ;;  %s7049_s7 = inlined_call_operand.vmem [shape: f32[32,32], index: 7, kind: input, shape index: {}]   ;;  %s7050_s8 = inlined_call_operand.vmem [shape: f32[32,1], index: 8, kind: input, shape index: {}]   ;;  %s7051_s9 = inlined_call_operand.vmem [shape: f32[32,32], index: 9, kind: input, shape index: {}]   ;;  %s7052_s10 = inlined_call_operand.vmem [shape: f32[32,1], index: 10, kind: input, shape index: {}]   ;;  %s7053_s11 = inlined_call_operand.vmem [shape: f32[64,32], index: 11, kind: input, shape index: {}]   ;;  %s7054_s12 = inlined_call_operand.vmem [shape: f32[64,1], index: 12, kind: input, shape index: {}]   ;;  %s7055_s13 = inlined_call_operand.vmem [shape: f32[12,64], index: 13, kind: input, shape index: {}]   ;;  %s7056_s14 = inlined_call_operand.vmem [shape: f32[12,1], index: 14, kind: input, shape index: {}]   ;;  %s7057_s15 = inlined_call_operand.hbm [shape: f32[12,256], index: 15, kind: output, shape index: {}]  }
   0x1   :  { %21 = vsyncpa [#allocation6], 0 }
   0x2   :  { %22 = vsyncpa [#allocation4], 0  ;;  %s4151_s18 = smov [#allocation2]  }
   0x3   :  { %s30_s19 = sshll.u32 %s4151_s18, 4  ;;  %s31_s19 = int_to_ptr.vmem [resolvable:$true] %s30_s19 }
   0x4   :  { %s4093_s20 = scalar_lea.vmem %s31_s19, 8192  ;;  %p4098_p1 = scmp.lt.s32.totalorder %s31_s19, %s31_s19 }
   0x5   :  { %p4094_p0 = scmp.ne.s32.totalorder %s31_s19, %s4093_s20  ;;  %p4099_p2 = scmp.lt.s32.totalorder %s4093_s20, %s4093_s20 }
   0x7   :  { %p4100_p3 = por %p4099_p2, %p4098_p1 }
   0x9   :  { %p4101_p4 = pnand %p4100_p3, %p4094_p0 }
   0xb   :  { %4104 = shalt.err (!%p4101_p4)
}
   0xc   :  { %s4152_s21 = smov 256   ;;  %s4153_s22 = smov 16  }
   0xd   :  { %36 = dma.hbm_to_vmem [thread:$0]  %s7043_s1, 8192, %s31_s19, [#allocation3], %s4152_s21, %s4152_s21, %s4153_s22  }
   0xe   :  { %s4154_s25 = smov [#allocation5]  }
   0xf   :  { %s42_s26 = sshll.u32 %s4154_s25, 4  ;;  %s43_s26 = int_to_ptr.vmem [resolvable:$true] %s42_s26 }
  0x10   :  { %s4113_s27 = scalar_lea.vmem %s43_s26, 8192  ;;  %p4118_p6 = scmp.lt.s32.totalorder %s43_s26, %s43_s26 }
  0x11   :  { %p4114_p5 = scmp.ne.s32.totalorder %s43_s26, %s4113_s27  ;;  %p4119_p7 = scmp.lt.s32.totalorder %s4113_s27, %s4113_s27 }
  0x13   :  { %p4120_p8 = por %p4119_p7, %p4118_p6 }
  0x15   :  { %p4121_p9 = pnand %p4120_p8, %p4114_p5 }
  0x17   :  { %4124 = shalt.err (!%p4121_p9)
}
  0x18   :  { %48 = dma.hbm_to_vmem [thread:$0]  %s7044_s2, 8192, %s43_s26, [#allocation6], %s4152_s21, %s4152_s21, %s4153_s22  }
  0x19   :  { %4145 = dma.done.wait [#allocation3], 8192  }
  0x1a   :  { %4146 = vsyncadd [#allocation3], 4294959104 }
  0x1b   :  { %4147 = dma.done.wait [#allocation6], 8192  }
  0x1c   :  { %4148 = vsyncadd [#allocation6], 4294959104  ;;  %v7058_v0 = vmov 0.0   ;;  %v4156_v1 = vmov 0   ;;  %v79_v2 = vld [vmem:[%s7042_s0] sm:$0xff]  ;;  %vm295_vm0 = vcmask 1043456  }
  0x1d   :  { %364 = vmatprep.mubr.f32.mxu1 %v7058_v0  ;;  %3778 = vset.pattern.permute.xlu0 %v4156_v1  ;;  %v281_v3 = vcombine.high %v79_v2, %v79_v2  ;;  %v212_v4 = vld [vmem:[%s7046_s4] sm:$0xff]  ;;  %vm282_vm1 = vcmask 31744   ;;  %v214_v6 = vld [vmem:[%s7046_s4 + $0x10] sm:$0xff]  ;;  %v213_v7 = vld [vmem:[%s7046_s4 + $0x8] sm:$0xff]  ;;  %vm635_vm2 = vcmask 261120   ;;  %vm3601_vm3 = vcmask 523264  }
  0x1e   :  { %3779 = vset.pattern.permute.xlu1 %v4156_v1  ;;  %v208_v5 = vld [vmem:[%s7045_s3] sm:$0xff]  ;;  %262 = vperm.xlu0 %3778, %v212_v4   ;;  %v215_v8 = vld [vmem:[%s7046_s4 + $0x18] sm:$0xff]  ;;  %v209_v10 = vld [vmem:[%s7045_s3 + $0x8] sm:$0xff] }
  0x1f   :  { %3707 = vmatprep.subr.msk.mxu1 %vm295_vm0, %v281_v3  ;;  %272 = vperm.xlu1 %3779, %v214_v6   ;;  %v111_v9 = vld [vmem:[#allocation2 + $0xf8] sm:$0xff]  ;;  %v110_v11 = vld [vmem:[#allocation2 + $0xf0] sm:$0xff]  ;;  %v109_v12 = vld [vmem:[#allocation2 + $0xe8] sm:$0xff] }
  0x20   :  { %3708 = vmatpush1.msk.msra.mxu1 %vm295_vm0, %v79_v2  ;;  %v220_v13 = vld [vmem:[%s7048_s6] sm:$0xff]  ;;  %502 = vmatprep.subr.mxu0 %v111_v9  ;;  %v107_v16 = vld [vmem:[#allocation2 + $0xd8] sm:$0xff]  ;;  %v210_v17 = vld [vmem:[%s7045_s3 + $0x10] sm:$0xff] }
  0x21   :  { %3709 = vmatmul.mubr.msk.f32.vlgmr.msra.gmra.mxu1 %vm282_vm1, %v208_v5  ;;  %389 = vmatprep.subr.mxu1 %v111_v9  ;;  %v228_v14 = vld [vmem:[%s7050_s8] sm:$0xff]  ;;  %v221_v18 = vld [vmem:[%s7048_s6 + $0x8] sm:$0xff]  ;;  %v106_v20 = vld [vmem:[#allocation2 + $0xd0] sm:$0xff] }
  0x22   :  { %370 = vmatprep.mubr.f32.mxu1 %v7058_v0  ;;  %267 = vperm.xlu0 %3778, %v213_v7   ;;  %v108_v15 = vld [vmem:[#allocation2 + $0xe0] sm:$0xff]  ;;  %v229_v19 = vld [vmem:[%s7050_s8 + $0x8] sm:$0xff]  ;;  %v211_v22 = vld [vmem:[%s7045_s3 + $0x18] sm:$0xff] }
  0x23   :  { %277 = vperm.xlu1 %3779, %v215_v8   ;;  %390 = vmatpush1.msra.mxu1 %v110_v11  ;;  %v105_v21 = vld [vmem:[#allocation2 + $0xc8] sm:$0xff]  ;;  %v222_v23 = vld [vmem:[%s7048_s6 + $0x10] sm:$0xff]  ;;  %v104_v24 = vld [vmem:[#allocation2 + $0xc0] sm:$0xff] }
  0x24   :  { %391 = vmatprep.subr.mxu1 %v109_v12  ;;  %503 = vmatpush1.msra.mxu0 %v110_v11  ;;  %v230_v25 = vld [vmem:[%s7050_s8 + $0x10] sm:$0xff]  ;;  %v103_v26 = vld [vmem:[#allocation2 + $0xb8] sm:$0xff]  ;;  %v101_v28 = vld [vmem:[#allocation2 + $0xa8] sm:$0xff] }
  0x25   :  { %3710 = vmatmul.mubr.msk.f32.gmra.mxu1 %vm282_vm1, %v209_v10  ;;  %504 = vmatprep.subr.mxu0 %v109_v12  ;;  %v102_v27 = vld [vmem:[#allocation2 + $0xb0] sm:$0xff]  ;;  %v223_v29 = vld [vmem:[%s7048_s6 + $0x18] sm:$0xff]  ;;  %v100_v30 = vld [vmem:[#allocation2 + $0xa0] sm:$0xff] }
  0x26   :  { %376 = vmatprep.mubr.f32.mxu1 %v7058_v0  ;;  %617 = vperm.xlu0 %3778, %v220_v13   ;;  %v231_v31 = vld [vmem:[%s7050_s8 + $0x18] sm:$0xff]  ;;  %v98_v33 = vld [vmem:[#allocation2 + $0x90] sm:$0xff]  ;;  %v97_v34 = vld [vmem:[#allocation2 + $0x88] sm:$0xff]  ;;  %s4157_s8 = smov [#allocation7]  }
  0x27   :  { %965 = vperm.xlu1 %3779, %v228_v14   ;;  %392 = vmatpush1.msra.mxu1 %v108_v15  ;;  %v99_v32 = vld [vmem:[#allocation2 + $0x98] sm:$0xff]  ;;  %v96_v35 = vld [vmem:[#allocation2 + $0x80] sm:$0xff]  ;;  %v94_v37 = vld [vmem:[#allocation2 + $0x70] sm:$0xff]  ;;  %s3694_s1 = sshll.u32 %s4157_s8, 4  ;;  %s3695_s1 = int_to_ptr.vmem [resolvable:$true] %s3694_s1 }
  0x28   :  { %393 = vmatprep.subr.mxu1 %v107_v16  ;;  %505 = vmatpush1.msra.mxu0 %v108_v15  ;;  %v95_v36 = vld [vmem:[#allocation2 + $0x78] sm:$0xff]  ;;  %v93_v38 = vld [vmem:[#allocation2 + $0x68] sm:$0xff]  ;;  %v92_v39 = vld [vmem:[#allocation2 + $0x60] sm:$0xff]  ;;  %p4130_p11 = scmp.lt.s32.totalorder %s3695_s1, %s3695_s1 }
  0x29   :  { %3711 = vmatmul.mubr.msk.f32.gmra.mxu1 %vm282_vm1, %v210_v17  ;;  %506 = vmatprep.subr.mxu0 %v107_v16  ;;  %v91_v40 = vld [vmem:[#allocation2 + $0x58] sm:$0xff]  ;;  %v90_v41 = vld [vmem:[#allocation2 + $0x50] sm:$0xff]  ;;  %v89_v42 = vld [vmem:[#allocation2 + $0x48] sm:$0xff] }
  0x2a   :  { %382 = vmatprep.mubr.f32.mxu1 %v7058_v0  ;;  %622 = vperm.xlu0 %3778, %v221_v18   ;;  %v88_v43 = vld [vmem:[#allocation2 + $0x40] sm:$0xff]  ;;  %v87_v44 = vld [vmem:[#allocation2 + $0x38] sm:$0xff]  ;;  %v86_v45 = vld [vmem:[#allocation2 + $0x30] sm:$0xff] }
  0x2b   :  { %970 = vperm.xlu1 %3779, %v229_v19   ;;  %394 = vmatpush1.msra.mxu1 %v106_v20  ;;  %v85_v46 = vld [vmem:[#allocation2 + $0x28] sm:$0xff]  ;;  %v4309_v47 = vld [vmem:[#allocation2 + $0x20] sm:$0xff]  ;;  %v4311_v48 = vld [vmem:[#allocation2 + $0x18] sm:$0xff] }
  0x2c   :  { %395 = vmatprep.subr.mxu1 %v105_v21  ;;  %507 = vmatpush1.msra.mxu0 %v106_v20  ;;  %7573 = vst [vmem:[#allocation11_spill] sm:$0xff] %v4309_v47  ;;  %7574 = vst [vmem:[#allocation12_spill] sm:$0xff] %v4311_v48  ;;  %v4313_v49 = vld [vmem:[#allocation2 + $0x10] sm:$0xff]  ;;  %v4316_v50 = vld [vmem:[#allocation2 + $0x8] sm:$0xff] }
  0x2d   :  { %3712 = vmatmul.mubr.msk.f32.gmra.mxu1 %vm282_vm1, %v211_v22  ;;  %508 = vmatprep.subr.mxu0 %v105_v21  ;;  %7575 = vst [vmem:[#allocation13_spill] sm:$0xff] %v4313_v49  ;;  %7576 = vst [vmem:[#allocation14_spill] sm:$0xff] %v4316_v50  ;;  %v4319_v51 = vld [vmem:[#allocation2] sm:$0xff]  ;;  %v4322_v52 = vld [vmem:[#allocation2 + $0x1f8] sm:$0xff] }
  0x2e   :  { %627 = vperm.xlu0 %3778, %v222_v23   ;;  %396 = vmatpush1.msra.mxu1 %v104_v24  ;;  %7577 = vst [vmem:[#allocation15_spill] sm:$0xff] %v4319_v51  ;;  %7578 = vst [vmem:[#allocation16_spill] sm:$0xff] %v4322_v52  ;;  %v4325_v53 = vld [vmem:[#allocation2 + $0x1f0] sm:$0xff]  ;;  %v4328_v54 = vld [vmem:[#allocation2 + $0x1e8] sm:$0xff] }
  0x2f   :  { %975 = vperm.xlu1 %3779, %v230_v25   ;;  %397 = vmatprep.subr.mxu1 %v103_v26  ;;  %7579 = vst [vmem:[#allocation17_spill] sm:$0xff] %v4325_v53  ;;  %7580 = vst [vmem:[#allocation18_spill] sm:$0xff] %v4328_v54  ;;  %v4331_v55 = vld [vmem:[#allocation2 + $0x1e0] sm:$0xff]  ;;  %v4334_v56 = vld [vmem:[#allocation2 + $0x1d8] sm:$0xff] }
  0x30   :  { %398 = vmatpush1.msra.mxu1 %v102_v27  ;;  %509 = vmatpush1.msra.mxu0 %v104_v24  ;;  %7581 = vst [vmem:[#allocation19_spill] sm:$0xff] %v4331_v55  ;;  %7582 = vst [vmem:[#allocation20_spill] sm:$0xff] %v4334_v56  ;;  %v4338_v57 = vld [vmem:[#allocation2 + $0x1d0] sm:$0xff]  ;;  %v4342_v58 = vld [vmem:[#allocation2 + $0x1c8] sm:$0xff] }
  0x31   :  { %399 = vmatprep.subr.mxu1 %v101_v28  ;;  %510 = vmatprep.subr.mxu0 %v103_v26  ;;  %7583 = vst [vmem:[#allocation21_spill] sm:$0xff] %v4338_v57  ;;  %7584 = vst [vmem:[#allocation22_spill] sm:$0xff] %v4342_v58  ;;  %v4346_v59 = vld [vmem:[#allocation2 + $0x1c0] sm:$0xff]  ;;  %v4350_v60 = vld [vmem:[#allocation2 + $0x1b8] sm:$0xff] }
  0x32   :  { %632 = vperm.xlu0 %3778, %v223_v29   ;;  %400 = vmatpush1.msra.mxu1 %v100_v30  ;;  %7585 = vst [vmem:[#allocation23_spill] sm:$0xff] %v4346_v59  ;;  %7586 = vst [vmem:[#allocation24_spill] sm:$0xff] %v4350_v60  ;;  %v4354_v61 = vld [vmem:[#allocation2 + $0x1b0] sm:$0xff]  ;;  %v4358_v62 = vld [vmem:[#allocation2 + $0x1a8] sm:$0xff] }
  0x33   :  { %980 = vperm.xlu1 %3779, %v231_v31   ;;  %401 = vmatprep.subr.mxu1 %v99_v32  ;;  %7587 = vst [vmem:[#allocation25_spill] sm:$0xff] %v4354_v61  ;;  %7588 = vst [vmem:[#allocation26_spill] sm:$0xff] %v4358_v62  ;;  %v4362_v63 = vld [vmem:[#allocation2 + $0x1a0] sm:$0xff]  ;;  %v4366_v1 = vld [vmem:[#allocation2 + $0x198] sm:$0xff] }
  0x34   :  { %402 = vmatpush1.msra.mxu1 %v98_v33  ;;  %511 = vmatpush1.msra.mxu0 %v102_v27  ;;  %7589 = vst [vmem:[#allocation27_spill] sm:$0xff] %v4362_v63  ;;  %7590 = vst [vmem:[#allocation28_spill] sm:$0xff] %v4366_v1  ;;  %v4370_v2 = vld [vmem:[#allocation2 + $0x190] sm:$0xff]  ;;  %v4374_v3 = vld [vmem:[#allocation2 + $0x188] sm:$0xff] }
  0x35   :  { %403 = vmatprep.subr.mxu1 %v97_v34  ;;  %512 = vmatprep.subr.mxu0 %v101_v28  ;;  %7591 = vst [vmem:[#allocation29_spill] sm:$0xff] %v4370_v2  ;;  %7592 = vst [vmem:[#allocation30_spill] sm:$0xff] %v4374_v3  ;;  %v4378_v4 = vld [vmem:[#allocation2 + $0x180] sm:$0xff]  ;;  %v4382_v5 = vld [vmem:[#allocation2 + $0x178] sm:$0xff] }
  0x36   :  { %404 = vmatpush1.msra.mxu1 %v96_v35  ;;  %513 = vmatpush1.msra.mxu0 %v100_v30  ;;  %7593 = vst [vmem:[#allocation31_spill] sm:$0xff] %v4378_v4  ;;  %7594 = vst [vmem:[#allocation32_spill] sm:$0xff] %v4382_v5  ;;  %v4386_v6 = vld [vmem:[#allocation2 + $0x170] sm:$0xff]  ;;  %v4390_v7 = vld [vmem:[#allocation2 + $0x168] sm:$0xff] }
  0x37   :  { %405 = vmatprep.subr.mxu1 %v95_v36  ;;  %514 = vmatprep.subr.mxu0 %v99_v32  ;;  %7595 = vst [vmem:[#allocation33_spill] sm:$0xff] %v4386_v6  ;;  %7596 = vst [vmem:[#allocation34_spill] sm:$0xff] %v4390_v7  ;;  %v4394_v8 = vld [vmem:[#allocation2 + $0x160] sm:$0xff]  ;;  %v4398_v9 = vld [vmem:[#allocation2 + $0x158] sm:$0xff] }
  0x38   :  { %406 = vmatpush1.msra.mxu1 %v94_v37  ;;  %515 = vmatpush1.msra.mxu0 %v98_v33  ;;  %7597 = vst [vmem:[#allocation35_spill] sm:$0xff] %v4394_v8  ;;  %7598 = vst [vmem:[#allocation36_spill] sm:$0xff] %v4398_v9  ;;  %v4402_v10 = vld [vmem:[#allocation2 + $0x150] sm:$0xff]  ;;  %v4406_v11 = vld [vmem:[#allocation2 + $0x148] sm:$0xff] }
  0x39   :  { %407 = vmatprep.subr.mxu1 %v93_v38  ;;  %516 = vmatprep.subr.mxu0 %v97_v34  ;;  %7599 = vst [vmem:[#allocation37_spill] sm:$0xff] %v4402_v10  ;;  %7600 = vst [vmem:[#allocation38_spill] sm:$0xff] %v4406_v11  ;;  %v4410_v12 = vld [vmem:[#allocation2 + $0x140] sm:$0xff]  ;;  %v4414_v13 = vld [vmem:[#allocation2 + $0x138] sm:$0xff] }
  0x3a   :  { %408 = vmatpush1.msra.mxu1 %v92_v39  ;;  %517 = vmatpush1.msra.mxu0 %v96_v35  ;;  %7601 = vst [vmem:[#allocation39_spill] sm:$0xff] %v4410_v12  ;;  %7602 = vst [vmem:[#allocation40_spill] sm:$0xff] %v4414_v13  ;;  %v4418_v14 = vld [vmem:[#allocation2 + $0x130] sm:$0xff]  ;;  %v4426_v15 = vld [vmem:[#allocation2 + $0x128] sm:$0xff] }
  0x3b   :  { %409 = vmatprep.subr.mxu1 %v91_v40  ;;  %518 = vmatprep.subr.mxu0 %v95_v36  ;;  %7603 = vst [vmem:[#allocation41_spill] sm:$0xff] %v4418_v14  ;;  %7604 = vst [vmem:[#allocation42_spill] sm:$0xff] %v4426_v15  ;;  %v4430_v16 = vld [vmem:[#allocation2 + $0x120] sm:$0xff]  ;;  %v4434_v17 = vld [vmem:[#allocation2 + $0x118] sm:$0xff] }
  0x3c   :  { %410 = vmatpush1.msra.mxu1 %v90_v41  ;;  %519 = vmatpush1.msra.mxu0 %v94_v37  ;;  %7605 = vst [vmem:[#allocation43_spill] sm:$0xff] %v4430_v16  ;;  %7606 = vst [vmem:[#allocation44_spill] sm:$0xff] %v4434_v17  ;;  %v4438_v18 = vld [vmem:[#allocation2 + $0x110] sm:$0xff]  ;;  %v4442_v19 = vld [vmem:[#allocation2 + $0x108] sm:$0xff] }
  0x3d   :  { %411 = vmatprep.subr.mxu1 %v89_v42  ;;  %520 = vmatprep.subr.mxu0 %v93_v38  ;;  %7607 = vst [vmem:[#allocation45_spill] sm:$0xff] %v4438_v18  ;;  %7608 = vst [vmem:[#allocation46_spill] sm:$0xff] %v4442_v19  ;;  %v4446_v20 = vld [vmem:[#allocation2 + $0x100] sm:$0xff] }
  0x3e   :  { %412 = vmatpush1.msra.mxu1 %v88_v43  ;;  %521 = vmatpush1.msra.mxu0 %v92_v39  ;;  %7609 = vst [vmem:[#allocation47_spill] sm:$0xff] %v4446_v20 }
  0x3f   :  { %413 = vmatprep.subr.mxu1 %v87_v44  ;;  %522 = vmatprep.subr.mxu0 %v91_v40 }
  0x40   :  { %414 = vmatpush1.msra.mxu1 %v86_v45  ;;  %523 = vmatpush1.msra.mxu0 %v90_v41  ;;  %v4482_v41 = vld [vmem:[#allocation5 + $0xf8] sm:$0xff] }
  0x41   :  { %415 = vmatprep.subr.mxu1 %v85_v46  ;;  %524 = vmatprep.subr.mxu0 %v89_v42 }
  0x42   :  { %416 = vmatpush1.msra.mxu1 %v4309_v47  ;;  %525 = vmatpush1.msra.mxu0 %v88_v43 }
  0x43   :  { %417 = vmatprep.subr.mxu1 %v4311_v48  ;;  %526 = vmatprep.subr.mxu0 %v87_v44 }
  0x44   :  { %418 = vmatpush1.msra.mxu1 %v4313_v49  ;;  %527 = vmatpush1.msra.mxu0 %v86_v45 }
  0x45   :  { %419 = vmatprep.subr.mxu1 %v4316_v50  ;;  %528 = vmatprep.subr.mxu0 %v85_v46 }
  0x46   :  { %420 = vmatpush1.msra.mxu1 %v4319_v51  ;;  %529 = vmatpush1.msra.mxu0 %v4309_v47  ;;  %v4662_v47 = vld [vmem:[#allocation5 + $0x180] sm:$0xff] }
  0x47   :  { %421 = vmatprep.subr.mxu1 %v4322_v52  ;;  %530 = vmatprep.subr.mxu0 %v4311_v48  ;;  %v4659_v48 = vld [vmem:[#allocation5 + $0x188] sm:$0xff]  ;;  %7632 = vst [vmem:[#allocation70_spill] sm:$0xff] %v4662_v47 }
  0x48   :  { %422 = vmatpush2.msra.mxu1 %v4325_v53  ;;  %531 = vmatpush1.msra.mxu0 %v4313_v49  ;;  %v4656_v49 = vld [vmem:[#allocation5 + $0x190] sm:$0xff]  ;;  %7631 = vst [vmem:[#allocation69_spill] sm:$0xff] %v4659_v48 }
  0x49   :  { %423 = vmatprep.subr.mxu1 %v4328_v54  ;;  %532 = vmatprep.subr.mxu0 %v4316_v50  ;;  %v4653_v50 = vld [vmem:[#allocation5 + $0x198] sm:$0xff]  ;;  %7630 = vst [vmem:[#allocation68_spill] sm:$0xff] %v4656_v49 }
  0x4a   :  { %424 = vmatpush2.msra.mxu1 %v4331_v55  ;;  %533 = vmatpush1.msra.mxu0 %v4319_v51  ;;  %v4650_v51 = vld [vmem:[#allocation5 + $0x1a0] sm:$0xff]  ;;  %7629 = vst [vmem:[#allocation67_spill] sm:$0xff] %v4653_v50 }
  0x4b   :  { %425 = vmatprep.subr.mxu1 %v4334_v56  ;;  %534 = vmatprep.subr.mxu0 %v4322_v52  ;;  %v4647_v52 = vld [vmem:[#allocation5 + $0x1a8] sm:$0xff]  ;;  %7628 = vst [vmem:[#allocation66_spill] sm:$0xff] %v4650_v51 }
  0x4c   :  { %426 = vmatpush2.msra.mxu1 %v4338_v57  ;;  %535 = vmatpush2.msra.mxu0 %v4325_v53  ;;  %v4644_v53 = vld [vmem:[#allocation5 + $0x1b0] sm:$0xff]  ;;  %7627 = vst [vmem:[#allocation65_spill] sm:$0xff] %v4647_v52 }
  0x4d   :  { %427 = vmatprep.subr.mxu1 %v4342_v58  ;;  %536 = vmatprep.subr.mxu0 %v4328_v54  ;;  %v4641_v54 = vld [vmem:[#allocation5 + $0x1b8] sm:$0xff]  ;;  %7626 = vst [vmem:[#allocation64_spill] sm:$0xff] %v4644_v53 }
  0x4e   :  { %428 = vmatpush2.msra.mxu1 %v4346_v59  ;;  %537 = vmatpush2.msra.mxu0 %v4331_v55  ;;  %v4638_v55 = vld [vmem:[#allocation5 + $0x1c0] sm:$0xff]  ;;  %7625 = vst [vmem:[#allocation63_spill] sm:$0xff] %v4641_v54 }
  0x4f   :  { %429 = vmatprep.subr.mxu1 %v4350_v60  ;;  %538 = vmatprep.subr.mxu0 %v4334_v56  ;;  %v4635_v56 = vld [vmem:[#allocation5 + $0x1c8] sm:$0xff]  ;;  %7624 = vst [vmem:[#allocation62_spill] sm:$0xff] %v4638_v55 }
  0x50   :  { %430 = vmatpush2.msra.mxu1 %v4354_v61  ;;  %539 = vmatpush2.msra.mxu0 %v4338_v57  ;;  %v4632_v57 = vld [vmem:[#allocation5 + $0x1d0] sm:$0xff]  ;;  %7623 = vst [vmem:[#allocation61_spill] sm:$0xff] %v4635_v56 }
  0x51   :  { %431 = vmatprep.subr.mxu1 %v4358_v62  ;;  %540 = vmatprep.subr.mxu0 %v4342_v58  ;;  %v4629_v58 = vld [vmem:[#allocation5 + $0x1d8] sm:$0xff]  ;;  %7622 = vst [vmem:[#allocation60_spill] sm:$0xff] %v4632_v57 }
  0x52   :  { %432 = vmatpush2.msra.mxu1 %v4362_v63  ;;  %541 = vmatpush2.msra.mxu0 %v4346_v59  ;;  %v4626_v59 = vld [vmem:[#allocation5 + $0x1e0] sm:$0xff]  ;;  %7621 = vst [vmem:[#allocation59_spill] sm:$0xff] %v4629_v58 }
  0x53   :  { %433 = vmatprep.subr.mxu1 %v4366_v1  ;;  %542 = vmatprep.subr.mxu0 %v4350_v60  ;;  %v4623_v60 = vld [vmem:[#allocation5 + $0x1e8] sm:$0xff]  ;;  %7620 = vst [vmem:[#allocation58_spill] sm:$0xff] %v4626_v59 }
  0x54   :  { %434 = vmatpush2.msra.mxu1 %v4370_v2  ;;  %543 = vmatpush2.msra.mxu0 %v4354_v61  ;;  %v4620_v61 = vld [vmem:[#allocation5 + $0x1f0] sm:$0xff]  ;;  %7619 = vst [vmem:[#allocation57_spill] sm:$0xff] %v4623_v60 }
  0x55   :  { %435 = vmatprep.subr.mxu1 %v4374_v3  ;;  %544 = vmatprep.subr.mxu0 %v4358_v62  ;;  %v4617_v62 = vld [vmem:[#allocation5 + $0x1f8] sm:$0xff]  ;;  %7618 = vst [vmem:[#allocation56_spill] sm:$0xff] %v4620_v61 }
  0x56   :  { %436 = vmatpush2.msra.mxu1 %v4378_v4  ;;  %545 = vmatpush2.msra.mxu0 %v4362_v63  ;;  %v4614_v63 = vld [vmem:[#allocation5] sm:$0xff] }
  0x57   :  { %437 = vmatprep.subr.mxu1 %v4382_v5  ;;  %546 = vmatprep.subr.mxu0 %v4366_v1  ;;  %v4611_v1 = vld [vmem:[#allocation5 + $0x8] sm:$0xff] }
  0x58   :  { %438 = vmatpush2.msra.mxu1 %v4386_v6  ;;  %547 = vmatpush2.msra.mxu0 %v4370_v2  ;;  %v4608_v2 = vld [vmem:[#allocation5 + $0x10] sm:$0xff] }
  0x59   :  { %439 = vmatprep.subr.mxu1 %v4390_v7  ;;  %548 = vmatprep.subr.mxu0 %v4374_v3  ;;  %v4605_v3 = vld [vmem:[#allocation5 + $0x18] sm:$0xff] }
  0x5a   :  { %440 = vmatpush2.msra.mxu1 %v4394_v8  ;;  %549 = vmatpush2.msra.mxu0 %v4378_v4  ;;  %v4602_v4 = vld [vmem:[#allocation5 + $0x20] sm:$0xff] }
  0x5b   :  { %441 = vmatprep.subr.mxu1 %v4398_v9  ;;  %550 = vmatprep.subr.mxu0 %v4382_v5  ;;  %v4599_v5 = vld [vmem:[#allocation5 + $0x28] sm:$0xff] }
  0x5c   :  { %442 = vmatpush2.msra.mxu1 %v4402_v10  ;;  %551 = vmatpush2.msra.mxu0 %v4386_v6  ;;  %v4596_v6 = vld [vmem:[#allocation5 + $0x30] sm:$0xff] }
  0x5d   :  { %443 = vmatprep.subr.mxu1 %v4406_v11  ;;  %552 = vmatprep.subr.mxu0 %v4390_v7  ;;  %v4593_v7 = vld [vmem:[#allocation5 + $0x38] sm:$0xff] }
  0x5e   :  { %444 = vmatpush2.msra.mxu1 %v4410_v12  ;;  %553 = vmatpush2.msra.mxu0 %v4394_v8  ;;  %v4590_v8 = vld [vmem:[#allocation5 + $0x40] sm:$0xff] }
  0x5f   :  { %445 = vmatprep.subr.mxu1 %v4414_v13  ;;  %554 = vmatprep.subr.mxu0 %v4398_v9  ;;  %v4587_v9 = vld [vmem:[#allocation5 + $0x48] sm:$0xff] }
  0x60   :  { %446 = vmatpush2.msra.mxu1 %v4418_v14  ;;  %555 = vmatpush2.msra.mxu0 %v4402_v10  ;;  %v4584_v10 = vld [vmem:[#allocation5 + $0x50] sm:$0xff] }
  0x61   :  { %447 = vmatprep.subr.mxu1 %v4426_v15  ;;  %556 = vmatprep.subr.mxu0 %v4406_v11  ;;  %v4581_v11 = vld [vmem:[#allocation5 + $0x58] sm:$0xff] }
  0x62   :  { %448 = vmatpush2.msra.mxu1 %v4430_v16  ;;  %557 = vmatpush2.msra.mxu0 %v4410_v12  ;;  %v4578_v12 = vld [vmem:[#allocation5 + $0x60] sm:$0xff] }
  0x63   :  { %449 = vmatprep.subr.mxu1 %v4434_v17  ;;  %558 = vmatprep.subr.mxu0 %v4414_v13  ;;  %v4575_v13 = vld [vmem:[#allocation5 + $0x68] sm:$0xff] }
  0x64   :  { %450 = vmatpush2.msra.mxu1 %v4438_v18  ;;  %559 = vmatpush2.msra.mxu0 %v4418_v14  ;;  %v4572_v14 = vld [vmem:[#allocation5 + $0x70] sm:$0xff] }
  0x65   :  { %451 = vmatprep.subr.mxu1 %v4442_v19  ;;  %560 = vmatprep.subr.mxu0 %v4426_v15  ;;  %v4561_v15 = vld [vmem:[#allocation5 + $0x88] sm:$0xff] }
  0x66   :  { %452 = vmatpush2.msra.mxu1 %v4446_v20  ;;  %561 = vmatpush2.msra.mxu0 %v4430_v16  ;;  %v4557_v16 = vld [vmem:[#allocation5 + $0x90] sm:$0xff] }
  0x67   :  { %562 = vmatprep.subr.mxu0 %v4434_v17 }
  0x68   :  { %563 = vmatpush2.msra.mxu0 %v4438_v18  ;;  %v4537_v18 = vld [vmem:[#allocation5 + $0xb0] sm:$0xff] }
  0x69   :  { %564 = vmatprep.subr.mxu0 %v4442_v19 }
  0x6a   :  { %565 = vmatpush2.msra.mxu0 %v4446_v20 }
  0x6b   :  { %737 = vmatprep.subr.mxu0 %v4482_v41 }
  0x99   :  { %v263_v21 = vpop.permute.xlu0 %262 }
  0x9a   :  { %v273_v30 = vpop.permute.xlu1 %272 }
  0x9d   :  { %v268_v27 = vpop.permute.xlu0 %267 }
  0x9e   :  { %v278_v37 = vpop.permute.xlu1 %277 }
  0xe1   :  { %v366_v22 = vpop.f32.mrf.mxu1 }
  0xe2   :  { %v4459_v25 = vadd.f32 %v366_v22, %v263_v21 }
  0xe3   :  { %v368_v23 = vpop.f32.mrf.mxu1 }
  0xe4   :  { %v4457_v24 = vadd.f32 %v368_v23, %v263_v21  ;;  %7611 = vst [vmem:[#allocation49_spill] sm:$0xff] %v4459_v25 }
  0xe5   :  { %v372_v26 = vpop.f32.mrf.mxu1 }
  0xe6   :  { %7610 = vst [vmem:[#allocation48_spill] sm:$0xff] %v4457_v24  ;;  %453 = vmatprep.mubr.f32.mxu1 %v4457_v24  ;;  %v4465_v31 = vadd.f32 %v372_v26, %v268_v27 }
  0xe7   :  { %v374_v28 = vpop.f32.mrf.mxu1  ;;  %454 = vmatmul.mubr.f32.vlgmr.msra.gmra.mxu1 %v4459_v25 }
  0xe8   :  { %v4463_v29 = vadd.f32 %v374_v28, %v268_v27  ;;  %7613 = vst [vmem:[#allocation51_spill] sm:$0xff] %v4465_v31 }
  0xe9   :  { %v378_v32 = vpop.f32.mrf.mxu1 }
  0xea   :  { %7612 = vst [vmem:[#allocation50_spill] sm:$0xff] %v4463_v29  ;;  %459 = vmatprep.mubr.f32.mxu1 %v4463_v29  ;;  %v4471_v35 = vadd.f32 %v378_v32, %v273_v30 }
  0xeb   :  { %v380_v33 = vpop.f32.mrf.mxu1  ;;  %460 = vmatmul.mubr.f32.gmra.mxu1 %v4465_v31 }
  0xec   :  { %v4469_v34 = vadd.f32 %v380_v33, %v273_v30  ;;  %7615 = vst [vmem:[#allocation53_spill] sm:$0xff] %v4471_v35 }
  0xed   :  { %v384_v36 = vpop.f32.mrf.mxu1 }
  0xee   :  { %7614 = vst [vmem:[#allocation52_spill] sm:$0xff] %v4469_v34  ;;  %465 = vmatprep.mubr.f32.mxu1 %v4469_v34  ;;  %v4477_v40 = vadd.f32 %v384_v36, %v278_v37  ;;  %v4495_v36 = vld [vmem:[#allocation5 + $0xf0] sm:$0xff] }
  0xef   :  { %v386_v38 = vpop.f32.mrf.mxu1  ;;  %466 = vmatmul.mubr.f32.gmra.mxu1 %v4471_v35 }
  0xf0   :  { %v4475_v39 = vadd.f32 %v386_v38, %v278_v37  ;;  %7617 = vst [vmem:[#allocation55_spill] sm:$0xff] %v4477_v40 }
  0xf2   :  { %7616 = vst [vmem:[#allocation54_spill] sm:$0xff] %v4475_v39  ;;  %471 = vmatprep.mubr.f32.mxu1 %v4475_v39 }
  0xf3   :  { %472 = vmatmul.mubr.f32.gmra.mxu1 %v4477_v40 }
  0xf4   :  { %712 = vmatprep.mubr.f32.mxu1 %v7058_v0 }
 0x1a7   :  { %v455_v42 = vpop.f32.mrf.mxu1 }
 0x1a8   :  { %v478_v43 = vsub.f32 %v455_v42, %v4459_v25  ;;  %v4499_v42 = vld [vmem:[#allocation5 + $0xe8] sm:$0xff] }
 0x1a9   :  { %v457_v44 = vpop.f32.mrf.mxu1 }
 0x1aa   :  { %v479_v45 = vsub.f32 %v457_v44, %v4457_v24  ;;  %v486_v46 = vmul.f32 0.25, %v478_v43  ;;  %v4502_v44 = vld [vmem:[#allocation5 + $0xe0] sm:$0xff] }
 0x1ab   :  { %v461_v21 = vpop.f32.mrf.mxu1 }
 0x1ac   :  { %v487_v22 = vmul.f32 0.25, %v479_v45  ;;  %v480_v23 = vsub.f32 %v461_v21, %v4465_v31  ;;  %v4493_v30 = vadd.f32 %v486_v46, %v4459_v25  ;;  %v4509_v21 = vld [vmem:[#allocation5 + $0xd8] sm:$0xff] }
 0x1ad   :  { %v463_v26 = vpop.f32.mrf.mxu1 }
 0x1ae   :  { %v4489_v27 = vadd.f32 %v487_v22, %v4457_v24  ;;  %v481_v28 = vsub.f32 %v463_v26, %v4463_v29  ;;  %v488_v32 = vmul.f32 0.25, %v480_v23 }
 0x1af   :  { %v467_v33 = vpop.f32.mrf.mxu1 }
 0x1b0   :  { %v489_v37 = vmul.f32 0.25, %v481_v28  ;;  %v482_v38 = vsub.f32 %v467_v33, %v4471_v35  ;;  %566 = vmatprep.mubr.f32.mxu0 %v4489_v27  ;;  %v4512_v22 = vadd.f32 %v488_v32, %v4465_v31  ;;  %v4515_v28 = vld [vmem:[#allocation5 + $0xd0] sm:$0xff]  ;;  %v4524_v32 = vld [vmem:[#allocation5 + $0xc0] sm:$0xff] }
 0x1b1   :  { %v469_v43 = vpop.f32.mrf.mxu1  ;;  %567 = vmatmul.mubr.f32.vlgmr.msra.gmra.mxu0 %v4493_v30 }
 0x1b2   :  { %v4505_v45 = vadd.f32 %v489_v37, %v4463_v29  ;;  %v483_v46 = vsub.f32 %v469_v43, %v4469_v34  ;;  %738 = vmatpush1.msra.mxu0 %v4495_v36  ;;  %v490_v23 = vmul.f32 0.25, %v482_v38  ;;  %v4520_v37 = vld [vmem:[#allocation5 + $0xc8] sm:$0xff] }
 0x1b3   :  { %739 = vmatprep.subr.mxu0 %v4499_v42  ;;  %v473_v26 = vpop.f32.mrf.mxu1 }
 0x1b4   :  { %v491_v33 = vmul.f32 0.25, %v483_v46  ;;  %v484_v0 = vsub.f32 %v473_v26, %v4477_v40  ;;  %740 = vmatpush1.msra.mxu0 %v4502_v44  ;;  %572 = vmatprep.mubr.f32.mxu0 %v4505_v45  ;;  %v4531_v26 = vld [vmem:[#allocation5 + $0xb8] sm:$0xff]  ;;  %v4534_v20 = vadd.f32 %v490_v23, %v4471_v35 }
 0x1b5   :  { %741 = vmatprep.subr.mxu0 %v4509_v21  ;;  %v475_v43 = vpop.f32.mrf.mxu1  ;;  %573 = vmatmul.mubr.f32.gmra.mxu0 %v4512_v22 }
 0x1b6   :  { %v4527_v38 = vadd.f32 %v491_v33, %v4469_v34  ;;  %v485_v46 = vsub.f32 %v475_v43, %v4475_v39  ;;  %742 = vmatpush1.msra.mxu0 %v4515_v28  ;;  %v492_v19 = vmul.f32 0.25, %v484_v0  ;;  %v4541_v33 = vld [vmem:[#allocation5 + $0xa8] sm:$0xff]  ;;  %v4545_v43 = vld [vmem:[#allocation5 + $0xa0] sm:$0xff]  ;;  %v4551_v0 = vld [vmem:[#allocation5 + $0x98] sm:$0xff] }
 0x1b7   :  { %743 = vmatprep.subr.mxu0 %v4520_v37 }
 0x1b8   :  { %v493_v17 = vmul.f32 0.25, %v485_v46  ;;  %744 = vmatpush1.msra.mxu0 %v4524_v32  ;;  %578 = vmatprep.mubr.f32.mxu0 %v4527_v38  ;;  %v4554_v46 = vadd.f32 %v492_v19, %v4477_v40  ;;  %v4569_v19 = vld [vmem:[#allocation5 + $0x78] sm:$0xff] }
 0x1b9   :  { %745 = vmatprep.subr.mxu0 %v4531_v26  ;;  %579 = vmatmul.mubr.f32.gmra.mxu0 %v4534_v20 }
 0x1ba   :  { %v4548_v23 = vadd.f32 %v493_v17, %v4475_v39  ;;  %746 = vmatpush1.msra.mxu0 %v4537_v18  ;;  %v4565_v17 = vld [vmem:[#allocation5 + $0x80] sm:$0xff] }
 0x1bb   :  { %747 = vmatprep.subr.mxu0 %v4541_v33 }
 0x1bc   :  { %748 = vmatpush1.msra.mxu0 %v4545_v43  ;;  %584 = vmatprep.mubr.f32.mxu0 %v4548_v23 }
 0x1bd   :  { %749 = vmatprep.subr.mxu0 %v4551_v0  ;;  %585 = vmatmul.mubr.f32.gmra.mxu0 %v4554_v46 }
 0x1be   :  { %750 = vmatpush1.msra.mxu0 %v4557_v16  ;;  %801 = vmatprep.mubr.f32.mxu0 %v4457_v24 }
 0x1bf   :  { %751 = vmatprep.subr.mxu0 %v4561_v15 }
 0x1c0   :  { %752 = vmatpush1.msra.mxu0 %v4565_v17 }
 0x1c1   :  { %753 = vmatprep.subr.mxu0 %v4569_v19 }
 0x1c2   :  { %754 = vmatpush1.msra.mxu0 %v4572_v14 }
 0x1c3   :  { %755 = vmatprep.subr.mxu0 %v4575_v13 }
 0x1c4   :  { %756 = vmatpush1.msra.mxu0 %v4578_v12 }
 0x1c5   :  { %757 = vmatprep.subr.mxu0 %v4581_v11 }
 0x1c6   :  { %758 = vmatpush1.msra.mxu0 %v4584_v10 }
 0x1c7   :  { %759 = vmatprep.subr.mxu0 %v4587_v9 }
 0x1c8   :  { %760 = vmatpush1.msra.mxu0 %v4590_v8 }
 0x1c9   :  { %761 = vmatprep.subr.mxu0 %v4593_v7 }
 0x1ca   :  { %762 = vmatpush1.msra.mxu0 %v4596_v6 }
 0x1cb   :  { %763 = vmatprep.subr.mxu0 %v4599_v5 }
 0x1cc   :  { %764 = vmatpush1.msra.mxu0 %v4602_v4 }
 0x1cd   :  { %765 = vmatprep.subr.mxu0 %v4605_v3 }
 0x1ce   :  { %766 = vmatpush1.msra.mxu0 %v4608_v2 }
 0x1cf   :  { %767 = vmatprep.subr.mxu0 %v4611_v1 }
 0x1d0   :  { %768 = vmatpush1.msra.mxu0 %v4614_v63 }
 0x1d1   :  { %769 = vmatprep.subr.mxu0 %v4617_v62 }
 0x1d2   :  { %770 = vmatpush2.msra.mxu0 %v4620_v61 }
 0x1d3   :  { %771 = vmatprep.subr.mxu0 %v4623_v60 }
 0x1d4   :  { %772 = vmatpush2.msra.mxu0 %v4626_v59 }
 0x1d5   :  { %773 = vmatprep.subr.mxu0 %v4629_v58 }
 0x1d6   :  { %774 = vmatpush2.msra.mxu0 %v4632_v57 }
 0x1d7   :  { %775 = vmatprep.subr.mxu0 %v4635_v56 }
 0x1d8   :  { %776 = vmatpush2.msra.mxu0 %v4638_v55 }
 0x1d9   :  { %777 = vmatprep.subr.mxu0 %v4641_v54  ;;  %v4665_v54 = vld [vmem:[#allocation5 + $0x178] sm:$0xff] }
 0x1da   :  { %778 = vmatpush2.msra.mxu0 %v4644_v53  ;;  %7633 = vst [vmem:[#allocation71_spill] sm:$0xff] %v4665_v54  ;;  %v4668_v53 = vld [vmem:[#allocation5 + $0x170] sm:$0xff] }
 0x1db   :  { %779 = vmatprep.subr.mxu0 %v4647_v52  ;;  %7634 = vst [vmem:[#allocation72_spill] sm:$0xff] %v4668_v53  ;;  %v4671_v52 = vld [vmem:[#allocation5 + $0x168] sm:$0xff] }
 0x1dc   :  { %780 = vmatpush2.msra.mxu0 %v4650_v51  ;;  %7635 = vst [vmem:[#allocation73_spill] sm:$0xff] %v4671_v52  ;;  %v4674_v51 = vld [vmem:[#allocation5 + $0x160] sm:$0xff] }
 0x1dd   :  { %781 = vmatprep.subr.mxu0 %v4653_v50  ;;  %7636 = vst [vmem:[#allocation74_spill] sm:$0xff] %v4674_v51  ;;  %v4677_v50 = vld [vmem:[#allocation5 + $0x158] sm:$0xff] }
 0x1de   :  { %782 = vmatpush2.msra.mxu0 %v4656_v49  ;;  %7637 = vst [vmem:[#allocation75_spill] sm:$0xff] %v4677_v50  ;;  %v4680_v49 = vld [vmem:[#allocation5 + $0x150] sm:$0xff] }
 0x1df   :  { %783 = vmatprep.subr.mxu0 %v4659_v48  ;;  %7638 = vst [vmem:[#allocation76_spill] sm:$0xff] %v4680_v49  ;;  %v4683_v48 = vld [vmem:[#allocation5 + $0x148] sm:$0xff] }
 0x1e0   :  { %784 = vmatpush2.msra.mxu0 %v4662_v47  ;;  %7639 = vst [vmem:[#allocation77_spill] sm:$0xff] %v4683_v48  ;;  %v4686_v47 = vld [vmem:[#allocation5 + $0x140] sm:$0xff] }
 0x1e1   :  { %785 = vmatprep.subr.mxu0 %v4665_v54  ;;  %7640 = vst [vmem:[#allocation78_spill] sm:$0xff] %v4686_v47  ;;  %v4689_v54 = vld [vmem:[#allocation5 + $0x138] sm:$0xff] }
 0x1e2   :  { %786 = vmatpush2.msra.mxu0 %v4668_v53  ;;  %7641 = vst [vmem:[#allocation79_spill] sm:$0xff] %v4689_v54  ;;  %v4692_v53 = vld [vmem:[#allocation5 + $0x130] sm:$0xff] }
 0x1e3   :  { %787 = vmatprep.subr.mxu0 %v4671_v52  ;;  %7642 = vst [vmem:[#allocation80_spill] sm:$0xff] %v4692_v53  ;;  %v4695_v52 = vld [vmem:[#allocation5 + $0x128] sm:$0xff] }
 0x1e4   :  { %788 = vmatpush2.msra.mxu0 %v4674_v51  ;;  %7643 = vst [vmem:[#allocation81_spill] sm:$0xff] %v4695_v52  ;;  %v4698_v51 = vld [vmem:[#allocation5 + $0x120] sm:$0xff] }
 0x1e5   :  { %789 = vmatprep.subr.mxu0 %v4677_v50  ;;  %7644 = vst [vmem:[#allocation82_spill] sm:$0xff] %v4698_v51  ;;  %v4701_v50 = vld [vmem:[#allocation5 + $0x118] sm:$0xff] }
 0x1e6   :  { %790 = vmatpush2.msra.mxu0 %v4680_v49  ;;  %7645 = vst [vmem:[#allocation83_spill] sm:$0xff] %v4701_v50  ;;  %v4704_v49 = vld [vmem:[#allocation5 + $0x110] sm:$0xff] }
 0x1e7   :  { %791 = vmatprep.subr.mxu0 %v4683_v48  ;;  %7646 = vst [vmem:[#allocation84_spill] sm:$0xff] %v4704_v49  ;;  %v4707_v48 = vld [vmem:[#allocation5 + $0x108] sm:$0xff] }
 0x1e8   :  { %792 = vmatpush2.msra.mxu0 %v4686_v47  ;;  %7647 = vst [vmem:[#allocation85_spill] sm:$0xff] %v4707_v48  ;;  %v4710_v47 = vld [vmem:[#allocation5 + $0x100] sm:$0xff] }
 0x1e9   :  { %793 = vmatprep.subr.mxu0 %v4689_v54  ;;  %7648 = vst [vmem:[#allocation86_spill] sm:$0xff] %v4710_v47 }
 0x1ea   :  { %794 = vmatpush2.msra.mxu0 %v4692_v53 }
 0x1eb   :  { %795 = vmatprep.subr.mxu0 %v4695_v52 }
 0x1ec   :  { %796 = vmatpush2.msra.mxu0 %v4698_v51 }
 0x1ed   :  { %797 = vmatprep.subr.mxu0 %v4701_v50  ;;  %v7649_v50 = vmov 0.0  }
 0x1ee   :  { %798 = vmatpush2.msra.mxu0 %v4704_v49 }
 0x1ef   :  { %799 = vmatprep.subr.mxu0 %v4707_v48 }
 0x1f0   :  { %800 = vmatpush2.msra.mxu0 %v4710_v47 }
 0x1f1   :  { %802 = vmatmul.mubr.f32.vlgmr.msra.gmra.mxu0 %v4459_v25 }
 0x1f2   :  { %807 = vmatprep.mubr.f32.mxu0 %v4463_v29 }
 0x1f5   :  { %808 = vmatmul.mubr.f32.gmra.mxu0 %v4465_v31 }
 0x1f6   :  { %813 = vmatprep.mubr.f32.mxu0 %v4469_v34 }
 0x1f9   :  { %814 = vmatmul.mubr.f32.gmra.mxu0 %v4471_v35 }
 0x1fa   :  { %819 = vmatprep.mubr.f32.mxu0 %v4475_v39 }
 0x1fd   :  { %820 = vmatmul.mubr.f32.gmra.mxu0 %v4477_v40 }
 0x1fe   :  { %1059 = vmatprep.mubr.f32.mxu0 %v7649_v50 }
 0x271   :  { %v568_v49 = vpop.f32.mrf.mxu0 }
 0x272   :  { %v591_v58 = vsub.f32 %v568_v49, %v4493_v30 }
 0x273   :  { %v570_v48 = vpop.f32.mrf.mxu0 }
 0x274   :  { %v592_v56 = vsub.f32 %v570_v48, %v4489_v27 }
 0x275   :  { %v574_v51 = vpop.f32.mrf.mxu0 }
 0x276   :  { %v593_v25 = vsub.f32 %v574_v51, %v4512_v22  ;;  %v600_v61 = vmul.f32 0.25, %v592_v56  ;;  %v217_v56 = vld [vmem:[%s7047_s5 + $0x8] sm:$0xff] }
 0x277   :  { %v576_v47 = vpop.f32.mrf.mxu0 }
 0x278   :  { %v594_v39 = vsub.f32 %v576_v47, %v4505_v45  ;;  %v601_v60 = vmul.f32 0.25, %v593_v25 }
 0x279   :  { %v580_v52 = vpop.f32.mrf.mxu0 }
 0x27a   :  { %v595_v34 = vsub.f32 %v580_v52, %v4534_v20  ;;  %v609_v49 = vadd.f32 %v601_v60, %v4512_v22  ;;  %v7650_v60 = vld [vmem:[#allocation56_spill] sm:$0xff]  ;;  %v7675_v22 = vld [vmem:[#allocation78_spill] sm:$0xff] }
 0x27b   :  { %v582_v53 = vpop.f32.mrf.mxu0 }
 0x27c   :  { %v596_v29 = vsub.f32 %v582_v53, %v4527_v38  ;;  %v603_v59 = vmul.f32 0.25, %v595_v34  ;;  %v602_v53 = vmul.f32 0.25, %v594_v39  ;;  %v7667_v34 = vld [vmem:[#allocation72_spill] sm:$0xff]  ;;  %v7668_v39 = vld [vmem:[#allocation73_spill] sm:$0xff] }
 0x27d   :  { %v586_v54 = vpop.f32.mrf.mxu0 }
 0x27e   :  { %v597_v31 = vsub.f32 %v586_v54, %v4554_v46  ;;  %v604_v24 = vmul.f32 0.25, %v596_v29  ;;  %v611_v51 = vadd.f32 %v603_v59, %v4534_v20  ;;  %v610_v48 = vadd.f32 %v602_v53, %v4505_v45  ;;  %v219_v59 = vld [vmem:[%s7047_s5 + $0x18] sm:$0xff]  ;;  %v7664_v20 = vld [vmem:[#allocation69_spill] sm:$0xff]  ;;  %v7682_v53 = vld [vmem:[#allocation83_spill] sm:$0xff] }
 0x27f   :  { %v588_v35 = vpop.f32.mrf.mxu0  ;;  %v608_v29 = vadd.f32 %v600_v61, %v4489_v27  ;;  %v7651_v61 = vld [vmem:[#allocation57_spill] sm:$0xff]  ;;  %v7670_v27 = vld [vmem:[#allocation75_spill] sm:$0xff]  ;;  %v7674_v45 = vld [vmem:[#allocation50_spill] sm:$0xff] }
 0x280   :  { %v598_v40 = vsub.f32 %v588_v35, %v4548_v23  ;;  %v605_v55 = vmul.f32 0.25, %v597_v31  ;;  %v612_v47 = vadd.f32 %v604_v24, %v4527_v38  ;;  %v599_v35 = vmul.f32 0.25, %v591_v58  ;;  %v218_v58 = vld [vmem:[%s7047_s5 + $0x10] sm:$0xff]  ;;  %v7665_v24 = vld [vmem:[#allocation70_spill] sm:$0xff]  ;;  %v7666_v31 = vld [vmem:[#allocation71_spill] sm:$0xff] }
 0x282   :  { %v606_v57 = vmul.f32 0.25, %v598_v40  ;;  %v613_v52 = vadd.f32 %v605_v55, %v4554_v46  ;;  %v216_v55 = vld [vmem:[%s7047_s5] sm:$0xff]  ;;  %v7669_v40 = vld [vmem:[#allocation74_spill] sm:$0xff] }
 0x284   :  { %v614_v54 = vadd.f32 %v606_v57, %v4548_v23  ;;  %v607_v57 = vadd.f32 %v599_v35, %v4493_v30  ;;  %v7671_v30 = vld [vmem:[#allocation76_spill] sm:$0xff]  ;;  %v7684_v35 = vld [vmem:[#allocation53_spill] sm:$0xff] }
 0x286   :  { %672 = vmatprep.subr.mxu1 %v614_v54  ;;  %v7683_v54 = vld [vmem:[#allocation84_spill] sm:$0xff] }
 0x287   :  { %673 = vmatpush1.msra.mxu1 %v613_v52 }
 0x288   :  { %674 = vmatprep.subr.mxu1 %v612_v47 }
 0x289   :  { %675 = vmatpush1.msra.mxu1 %v611_v51 }
 0x28a   :  { %676 = vmatprep.subr.mxu1 %v610_v48  ;;  %v7685_v48 = vld [vmem:[#allocation85_spill] sm:$0xff] }
 0x28b   :  { %677 = vmatpush1.msra.mxu1 %v609_v49 }
 0x28c   :  { %678 = vmatprep.subr.mxu1 %v608_v29 }
 0x28d   :  { %679 = vmatpush1.msra.mxu1 %v607_v57  ;;  %v7686_v57 = vld [vmem:[#allocation54_spill] sm:$0xff] }
 0x28e   :  { %3713 = vmatmul.mubr.msk.f32.vlgmr.msra.gmra.mxu1 %vm635_vm2, %v216_v55  ;;  %850 = vmatprep.subr.mxu1 %v4482_v41 }
 0x28f   :  { %851 = vmatpush1.msra.mxu1 %v4495_v36  ;;  %718 = vmatprep.mubr.f32.mxu1 %v7649_v50  ;;  %v7672_v36 = vld [vmem:[#allocation49_spill] sm:$0xff] }
 0x290   :  { %852 = vmatprep.subr.mxu1 %v4499_v42 }
 0x291   :  { %853 = vmatpush1.msra.mxu1 %v4502_v44  ;;  %v7673_v44 = vld [vmem:[#allocation77_spill] sm:$0xff] }
 0x292   :  { %3714 = vmatmul.mubr.msk.f32.gmra.mxu1 %vm635_vm2, %v217_v56  ;;  %854 = vmatprep.subr.mxu1 %v4509_v21  ;;  %v7687_v56 = vld [vmem:[#allocation86_spill] sm:$0xff] }
 0x293   :  { %855 = vmatpush1.msra.mxu1 %v4515_v28  ;;  %724 = vmatprep.mubr.f32.mxu1 %v7649_v50 }
 0x294   :  { %856 = vmatprep.subr.mxu1 %v4520_v37  ;;  %v7676_v37 = vld [vmem:[#allocation79_spill] sm:$0xff] }
 0x295   :  { %857 = vmatpush1.msra.mxu1 %v4524_v32  ;;  %v7677_v32 = vld [vmem:[#allocation80_spill] sm:$0xff] }
 0x296   :  { %3715 = vmatmul.mubr.msk.f32.gmra.mxu1 %vm635_vm2, %v218_v58  ;;  %858 = vmatprep.subr.mxu1 %v4531_v26  ;;  %v7678_v26 = vld [vmem:[#allocation51_spill] sm:$0xff]  ;;  %v4840_v58 = vld [vmem:[#allocation2 + $0xf8] sm:$0xff] }
 0x297   :  { %859 = vmatpush1.msra.mxu1 %v4537_v18  ;;  %730 = vmatprep.mubr.f32.mxu1 %v7649_v50  ;;  %v7663_v18 = vld [vmem:[#allocation68_spill] sm:$0xff] }
 0x298   :  { %860 = vmatprep.subr.mxu1 %v4541_v33 }
 0x299   :  { %861 = vmatpush1.msra.mxu1 %v4545_v43  ;;  %v7679_v43 = vld [vmem:[#allocation81_spill] sm:$0xff] }
 0x29a   :  { %3716 = vmatmul.mubr.msk.f32.gmra.mxu1 %vm635_vm2, %v219_v59  ;;  %862 = vmatprep.subr.mxu1 %v4551_v0  ;;  %v7680_v0 = vld [vmem:[#allocation52_spill] sm:$0xff]  ;;  %v4844_v59 = vld [vmem:[#allocation2 + $0xf0] sm:$0xff] }
 0x29b   :  { %863 = vmatpush1.msra.mxu1 %v4557_v16  ;;  %v7662_v16 = vld [vmem:[#allocation67_spill] sm:$0xff] }
 0x29c   :  { %864 = vmatprep.subr.mxu1 %v4561_v15 }
 0x29d   :  { %865 = vmatpush1.msra.mxu1 %v4565_v17  ;;  %v7681_v17 = vld [vmem:[#allocation82_spill] sm:$0xff] }
 0x29e   :  { %866 = vmatprep.subr.mxu1 %v4569_v19 }
 0x29f   :  { %867 = vmatpush1.msra.mxu1 %v4572_v14  ;;  %v7661_v14 = vld [vmem:[#allocation66_spill] sm:$0xff] }
 0x2a0   :  { %868 = vmatprep.subr.mxu1 %v4575_v13  ;;  %v7660_v13 = vld [vmem:[#allocation65_spill] sm:$0xff] }
 0x2a1   :  { %869 = vmatpush1.msra.mxu1 %v4578_v12 }
 0x2a2   :  { %870 = vmatprep.subr.mxu1 %v4581_v11  ;;  %v7659_v11 = vld [vmem:[#allocation64_spill] sm:$0xff] }
 0x2a3   :  { %871 = vmatpush1.msra.mxu1 %v4584_v10  ;;  %v7658_v10 = vld [vmem:[#allocation63_spill] sm:$0xff] }
 0x2a4   :  { %872 = vmatprep.subr.mxu1 %v4587_v9  ;;  %v7656_v9 = vld [vmem:[#allocation61_spill] sm:$0xff] }
 0x2a5   :  { %873 = vmatpush1.msra.mxu1 %v4590_v8  ;;  %v7654_v8 = vld [vmem:[#allocation60_spill] sm:$0xff] }
 0x2a6   :  { %874 = vmatprep.subr.mxu1 %v4593_v7 }
 0x2a7   :  { %875 = vmatpush1.msra.mxu1 %v4596_v6  ;;  %v7652_v6 = vld [vmem:[#allocation58_spill] sm:$0xff] }
 0x2a8   :  { %876 = vmatprep.subr.mxu1 %v4599_v5  ;;  %v7653_v5 = vld [vmem:[#allocation59_spill] sm:$0xff] }
 0x2a9   :  { %877 = vmatpush1.msra.mxu1 %v4602_v4 }
 0x2aa   :  { %878 = vmatprep.subr.mxu1 %v4605_v3  ;;  %v7655_v3 = vld [vmem:[#allocation48_spill] sm:$0xff] }
 0x2ab   :  { %879 = vmatpush1.msra.mxu1 %v4608_v2 }
 0x2ac   :  { %880 = vmatprep.subr.mxu1 %v4611_v1  ;;  %v7657_v1 = vld [vmem:[#allocation62_spill] sm:$0xff] }
 0x2ad   :  { %881 = vmatpush1.msra.mxu1 %v4614_v63 }
 0x2ae   :  { %882 = vmatprep.subr.mxu1 %v4617_v62 }
 0x2af   :  { %883 = vmatpush2.msra.mxu1 %v7650_v60 }
 0x2b0   :  { %884 = vmatprep.subr.mxu1 %v7651_v61 }
 0x2b1   :  { %v803_v7 = vpop.f32.mrf.mxu0  ;;  %885 = vmatpush2.msra.mxu1 %v7652_v6 }
 0x2b2   :  { %886 = vmatprep.subr.mxu1 %v7653_v5  ;;  %v826_v42 = vsub.f32 %v803_v7, %v7672_v36  ;;  %v7688_v7 = vld [vmem:[#allocation55_spill] sm:$0xff]  ;;  %v4851_v5 = vld [vmem:[#allocation2 + $0xe8] sm:$0xff] }
 0x2b3   :  { %v805_v4 = vpop.f32.mrf.mxu0  ;;  %887 = vmatpush2.msra.mxu1 %v7654_v8 }
 0x2b4   :  { %v827_v2 = vsub.f32 %v805_v4, %v7655_v3  ;;  %888 = vmatprep.subr.mxu1 %v7656_v9  ;;  %v834_v38 = vmul.f32 0.25, %v826_v42  ;;  %v4861_v9 = vld [vmem:[#allocation2 + $0xd8] sm:$0xff]  ;;  %v4925_v42 = vld [vmem:[#allocation2 + $0x50] sm:$0xff] }
 0x2b5   :  { %889 = vmatpush2.msra.mxu1 %v7657_v1  ;;  %v809_v62 = vpop.f32.mrf.mxu0  ;;  %v4865_v1 = vld [vmem:[#allocation2 + $0xd0] sm:$0xff] }
 0x2b6   :  { %v835_v63 = vmul.f32 0.25, %v827_v2  ;;  %890 = vmatprep.subr.mxu1 %v7658_v10  ;;  %v828_v33 = vsub.f32 %v809_v62, %v7678_v26  ;;  %v4830_v52 = vadd.f32 %v834_v38, %v7672_v36  ;;  %v4857_v2 = vld [vmem:[#allocation2 + $0xe0] sm:$0xff]  ;;  %v4871_v10 = vld [vmem:[#allocation2 + $0xc8] sm:$0xff] }
 0x2b7   :  { %891 = vmatpush2.msra.mxu1 %v7659_v11  ;;  %v811_v15 = vpop.f32.mrf.mxu0  ;;  %v7690_v38 = vld [vmem:[#allocation12_spill] sm:$0xff] }
 0x2b8   :  { %v4802_v12 = vadd.f32 %v835_v63, %v7655_v3  ;;  %892 = vmatprep.subr.mxu1 %v7660_v13  ;;  %v829_v21 = vsub.f32 %v811_v15, %v7674_v45  ;;  %v836_v47 = vmul.f32 0.25, %v828_v33  ;;  %v4877_v13 = vld [vmem:[#allocation2 + $0xc0] sm:$0xff]  ;;  %v4885_v15 = vld [vmem:[#allocation2 + $0xb0] sm:$0xff] }
 0x2b9   :  { %893 = vmatpush2.msra.mxu1 %v7661_v14  ;;  %v815_v25 = vpop.f32.mrf.mxu0  ;;  %v4881_v14 = vld [vmem:[#allocation2 + $0xb8] sm:$0xff]  ;;  %v7691_v33 = vld [vmem:[#allocation13_spill] sm:$0xff] }
 0x2ba   :  { %914 = vmatprep.mubr.f32.mxu1 %v4802_v12  ;;  %894 = vmatprep.subr.mxu1 %v7662_v16  ;;  %v837_v23 = vmul.f32 0.25, %v829_v21  ;;  %v830_v51 = vsub.f32 %v815_v25, %v7684_v35  ;;  %v4848_v60 = vadd.f32 %v836_v47, %v7678_v26  ;;  %v4901_v25 = vld [vmem:[#allocation2 + $0x90] sm:$0xff]  ;;  %v4931_v21 = vld [vmem:[#allocation2 + $0x40] sm:$0xff] }
 0x2bb   :  { %895 = vmatpush2.msra.mxu1 %v7663_v18  ;;  %v817_v41 = vpop.f32.mrf.mxu0  ;;  %v4891_v18 = vld [vmem:[#allocation2 + $0xa8] sm:$0xff]  ;;  %v7699_v47 = vld [vmem:[#allocation21_spill] sm:$0xff] }
 0x2bc   :  { %896 = vmatprep.subr.mxu1 %v7664_v20  ;;  %v831_v46 = vsub.f32 %v817_v41, %v7680_v0  ;;  %v4835_v49 = vadd.f32 %v837_v23, %v7674_v45  ;;  %v838_v61 = vmul.f32 0.25, %v830_v51  ;;  %v4894_v20 = vld [vmem:[#allocation2 + $0xa0] sm:$0xff]  ;;  %v4916_v41 = vld [vmem:[#allocation2 + $0x68] sm:$0xff]  ;;  %v7700_v51 = vld [vmem:[#allocation22_spill] sm:$0xff] }
 0x2bd   :  { %897 = vmatpush2.msra.mxu1 %v7665_v24  ;;  %v821_v28 = vpop.f32.mrf.mxu0  ;;  %v4898_v24 = vld [vmem:[#allocation2 + $0x98] sm:$0xff]  ;;  %v7693_v23 = vld [vmem:[#allocation15_spill] sm:$0xff] }
 0x2be   :  { %898 = vmatprep.subr.mxu1 %v7666_v31  ;;  %v839_v29 = vmul.f32 0.25, %v831_v46  ;;  %v832_v6 = vsub.f32 %v821_v28, %v7688_v7  ;;  %v4869_v63 = vadd.f32 %v838_v61, %v7684_v35  ;;  %v4904_v31 = vld [vmem:[#allocation2 + $0x88] sm:$0xff]  ;;  %v4937_v28 = vld [vmem:[#allocation2 + $0x30] sm:$0xff]  ;;  %v7705_v61 = vld [vmem:[#allocation27_spill] sm:$0xff] }
 0x2bf   :  { %899 = vmatpush2.msra.mxu1 %v7667_v34  ;;  %v823_v19 = vpop.f32.mrf.mxu0  ;;  %v4907_v34 = vld [vmem:[#allocation2 + $0x80] sm:$0xff]  ;;  %v7694_v46 = vld [vmem:[#allocation16_spill] sm:$0xff] }
 0x2c0   :  { %900 = vmatprep.subr.mxu1 %v7668_v39  ;;  %v833_v55 = vsub.f32 %v823_v19, %v7686_v57  ;;  %v4855_v4 = vadd.f32 %v839_v29, %v7680_v0  ;;  %v840_v62 = vmul.f32 0.25, %v832_v6  ;;  %v4910_v39 = vld [vmem:[#allocation2 + $0x78] sm:$0xff]  ;;  %v7702_v29 = vld [vmem:[#allocation24_spill] sm:$0xff] }
 0x2c1   :  { %901 = vmatpush2.msra.mxu1 %v7669_v40  ;;  %v4913_v40 = vld [vmem:[#allocation2 + $0x70] sm:$0xff]  ;;  %v7696_v19 = vld [vmem:[#allocation18_spill] sm:$0xff]  ;;  %v7706_v6 = vld [vmem:[#allocation28_spill] sm:$0xff] }
 0x2c2   :  { %902 = vmatprep.subr.mxu1 %v7670_v27  ;;  %v841_v8 = vmul.f32 0.25, %v833_v55  ;;  %v4889_v16 = vadd.f32 %v840_v62, %v7688_v7  ;;  %v4919_v27 = vld [vmem:[#allocation2 + $0x60] sm:$0xff]  ;;  %v7703_v55 = vld [vmem:[#allocation25_spill] sm:$0xff]  ;;  %v7708_v62 = vld [vmem:[#allocation30_spill] sm:$0xff] }
 0x2c3   :  { %903 = vmatpush2.msra.mxu1 %v7671_v30  ;;  %v4922_v30 = vld [vmem:[#allocation2 + $0x58] sm:$0xff] }
 0x2c4   :  { %904 = vmatprep.subr.mxu1 %v7673_v44  ;;  %v4875_v11 = vadd.f32 %v841_v8, %v7686_v57  ;;  %v4928_v44 = vld [vmem:[#allocation2 + $0x48] sm:$0xff]  ;;  %v7707_v8 = vld [vmem:[#allocation29_spill] sm:$0xff] }
 0x2c5   :  { %905 = vmatpush2.msra.mxu1 %v7675_v22  ;;  %v4934_v22 = vld [vmem:[#allocation2 + $0x38] sm:$0xff] }
 0x2c6   :  { %906 = vmatprep.subr.mxu1 %v7676_v37  ;;  %v4940_v37 = vld [vmem:[#allocation2 + $0x28] sm:$0xff] }
 0x2c7   :  { %907 = vmatpush2.msra.mxu1 %v7677_v32  ;;  %v7689_v32 = vld [vmem:[#allocation11_spill] sm:$0xff] }
 0x2c8   :  { %908 = vmatprep.subr.mxu1 %v7679_v43  ;;  %v7692_v43 = vld [vmem:[#allocation14_spill] sm:$0xff] }
 0x2c9   :  { %909 = vmatpush2.msra.mxu1 %v7681_v17  ;;  %v7695_v17 = vld [vmem:[#allocation17_spill] sm:$0xff] }
 0x2ca   :  { %910 = vmatprep.subr.mxu1 %v7682_v53  ;;  %v7697_v53 = vld [vmem:[#allocation19_spill] sm:$0xff] }
 0x2cb   :  { %911 = vmatpush2.msra.mxu1 %v7683_v54  ;;  %v7698_v54 = vld [vmem:[#allocation20_spill] sm:$0xff] }
 0x2cc   :  { %912 = vmatprep.subr.mxu1 %v7685_v48  ;;  %v7701_v48 = vld [vmem:[#allocation23_spill] sm:$0xff] }
 0x2cd   :  { %913 = vmatpush2.msra.mxu1 %v7687_v56  ;;  %v7704_v56 = vld [vmem:[#allocation26_spill] sm:$0xff] }
 0x2ce   :  { %915 = vmatmul.mubr.f32.vlgmr.msra.gmra.mxu1 %v4830_v52  ;;  %1108 = vmatprep.subr.mxu1 %v4840_v58 }
 0x2cf   :  { %920 = vmatprep.mubr.f32.mxu1 %v4835_v49  ;;  %1109 = vmatpush1.msra.mxu1 %v4844_v59 }
 0x2d0   :  { %1110 = vmatprep.subr.mxu1 %v4851_v5 }
 0x2d1   :  { %1111 = vmatpush1.msra.mxu1 %v4857_v2 }
 0x2d2   :  { %921 = vmatmul.mubr.f32.gmra.mxu1 %v4848_v60  ;;  %1112 = vmatprep.subr.mxu1 %v4861_v9 }
 0x2d3   :  { %926 = vmatprep.mubr.f32.mxu1 %v4855_v4  ;;  %1113 = vmatpush1.msra.mxu1 %v4865_v1 }
 0x2d4   :  { %1114 = vmatprep.subr.mxu1 %v4871_v10 }
 0x2d5   :  { %1115 = vmatpush1.msra.mxu1 %v4877_v13 }
 0x2d6   :  { %927 = vmatmul.mubr.f32.gmra.mxu1 %v4869_v63  ;;  %1116 = vmatprep.subr.mxu1 %v4881_v14 }
 0x2d7   :  { %932 = vmatprep.mubr.f32.mxu1 %v4875_v11  ;;  %1117 = vmatpush1.msra.mxu1 %v4885_v15 }
 0x2d8   :  { %1118 = vmatprep.subr.mxu1 %v4891_v18 }
 0x2d9   :  { %1119 = vmatpush1.msra.mxu1 %v4894_v20 }
 0x2da   :  { %933 = vmatmul.mubr.f32.gmra.mxu1 %v4889_v16  ;;  %1120 = vmatprep.subr.mxu1 %v4898_v24 }
 0x2db   :  { %1121 = vmatpush1.msra.mxu1 %v4901_v25 }
 0x2dc   :  { %1122 = vmatprep.subr.mxu1 %v4904_v31 }
 0x2dd   :  { %1123 = vmatpush1.msra.mxu1 %v4907_v34 }
 0x2de   :  { %1124 = vmatprep.subr.mxu1 %v4910_v39 }
 0x2df   :  { %1125 = vmatpush1.msra.mxu1 %v4913_v40 }
 0x2e0   :  { %1126 = vmatprep.subr.mxu1 %v4916_v41 }
 0x2e1   :  { %1127 = vmatpush1.msra.mxu1 %v4919_v27 }
 0x2e2   :  { %1128 = vmatprep.subr.mxu1 %v4922_v30 }
 0x2e3   :  { %1129 = vmatpush1.msra.mxu1 %v4925_v42 }
 0x2e4   :  { %1130 = vmatprep.subr.mxu1 %v4928_v44 }
 0x2e5   :  { %1131 = vmatpush1.msra.mxu1 %v4931_v21 }
 0x2e6   :  { %1132 = vmatprep.subr.mxu1 %v4934_v22 }
 0x2e7   :  { %1133 = vmatpush1.msra.mxu1 %v4937_v28 }
 0x2e8   :  { %1134 = vmatprep.subr.mxu1 %v4940_v37 }
 0x2e9   :  { %1135 = vmatpush1.msra.mxu1 %v7689_v32  ;;  %v7709_v32 = vld [vmem:[#allocation31_spill] sm:$0xff] }
 0x2ea   :  { %1136 = vmatprep.subr.mxu1 %v7690_v38  ;;  %v7710_v38 = vld [vmem:[#allocation32_spill] sm:$0xff] }
 0x2eb   :  { %1137 = vmatpush1.msra.mxu1 %v7691_v33  ;;  %v7711_v33 = vld [vmem:[#allocation33_spill] sm:$0xff] }
 0x2ec   :  { %1138 = vmatprep.subr.mxu1 %v7692_v43  ;;  %v7712_v43 = vld [vmem:[#allocation34_spill] sm:$0xff] }
 0x2ed   :  { %1139 = vmatpush1.msra.mxu1 %v7693_v23  ;;  %v7713_v23 = vld [vmem:[#allocation35_spill] sm:$0xff] }
 0x2ee   :  { %1140 = vmatprep.subr.mxu1 %v7694_v46  ;;  %v7714_v46 = vld [vmem:[#allocation36_spill] sm:$0xff] }
 0x2ef   :  { %1141 = vmatpush2.msra.mxu1 %v7695_v17  ;;  %v7715_v17 = vld [vmem:[#allocation37_spill] sm:$0xff] }
 0x2f0   :  { %1142 = vmatprep.subr.mxu1 %v7696_v19  ;;  %v7716_v19 = vld [vmem:[#allocation38_spill] sm:$0xff] }
 0x2f1   :  { %1143 = vmatpush2.msra.mxu1 %v7697_v53  ;;  %v7717_v53 = vld [vmem:[#allocation39_spill] sm:$0xff] }
 0x2f2   :  { %1144 = vmatprep.subr.mxu1 %v7698_v54  ;;  %v7718_v54 = vld [vmem:[#allocation40_spill] sm:$0xff] }
 0x2f3   :  { %1145 = vmatpush2.msra.mxu1 %v7699_v47  ;;  %v7719_v47 = vld [vmem:[#allocation41_spill] sm:$0xff] }
 0x2f4   :  { %1146 = vmatprep.subr.mxu1 %v7700_v51  ;;  %v7720_v51 = vld [vmem:[#allocation42_spill] sm:$0xff] }
 0x2f5   :  { %1147 = vmatpush2.msra.mxu1 %v7701_v48  ;;  %v7721_v48 = vld [vmem:[#allocation43_spill] sm:$0xff] }
 0x2f6   :  { %1148 = vmatprep.subr.mxu1 %v7702_v29  ;;  %v7722_v29 = vld [vmem:[#allocation44_spill] sm:$0xff] }
 0x2f7   :  { %1149 = vmatpush2.msra.mxu1 %v7703_v55  ;;  %v7723_v55 = vld [vmem:[#allocation45_spill] sm:$0xff] }
 0x2f8   :  { %1150 = vmatprep.subr.mxu1 %v7704_v56  ;;  %v7724_v56 = vld [vmem:[#allocation46_spill] sm:$0xff] }
 0x2f9   :  { %1151 = vmatpush2.msra.mxu1 %v7705_v61  ;;  %v7725_v61 = vld [vmem:[#allocation47_spill] sm:$0xff] }
 0x2fa   :  { %1152 = vmatprep.subr.mxu1 %v7706_v6 }
 0x2fb   :  { %1153 = vmatpush2.msra.mxu1 %v7707_v8 }
 0x2fc   :  { %1154 = vmatprep.subr.mxu1 %v7708_v62 }
 0x2fd   :  { %1155 = vmatpush2.msra.mxu1 %v7709_v32 }
 0x2fe   :  { %1156 = vmatprep.subr.mxu1 %v7710_v38 }
 0x2ff   :  { %1157 = vmatpush2.msra.mxu1 %v7711_v33 }
 0x300   :  { %1158 = vmatprep.subr.mxu1 %v7712_v43 }
 0x301   :  { %1159 = vmatpush2.msra.mxu1 %v7713_v23 }
 0x302   :  { %1160 = vmatprep.subr.mxu1 %v7714_v46 }
 0x303   :  { %1161 = vmatpush2.msra.mxu1 %v7715_v17 }
 0x304   :  { %1162 = vmatprep.subr.mxu1 %v7716_v19 }
 0x305   :  { %1163 = vmatpush2.msra.mxu1 %v7717_v53 }
 0x306   :  { %1164 = vmatprep.subr.mxu1 %v7718_v54 }
 0x307   :  { %1165 = vmatpush2.msra.mxu1 %v7719_v47 }
 0x308   :  { %1166 = vmatprep.subr.mxu1 %v7720_v51 }
 0x309   :  { %1167 = vmatpush2.msra.mxu1 %v7721_v48 }
 0x30a   :  { %1168 = vmatprep.subr.mxu1 %v7722_v29 }
 0x30b   :  { %1169 = vmatpush2.msra.mxu1 %v7723_v55 }
 0x30c   :  { %1170 = vmatprep.subr.mxu1 %v7724_v56 }
 0x30d   :  { %1171 = vmatpush2.msra.mxu1 %v7725_v61 }
 0x34e   :  { %v4980_v6 = vpop.f32.mrf.mxu1 }
 0x350   :  { %v4982_v8 = vpop.f32.mrf.mxu1 }
 0x352   :  { %v4984_v62 = vpop.f32.mrf.mxu1 }
 0x354   :  { %v4986_v32 = vpop.f32.mrf.mxu1 }
 0x356   :  { %v4988_v38 = vpop.f32.mrf.mxu1 }
 0x358   :  { %v4990_v33 = vpop.f32.mrf.mxu1 }
 0x359   :  { %7726 = vst [vmem:[#allocation56_spill] sm:$0xff] %v4990_v33 }
 0x35a   :  { %v4992_v43 = vpop.f32.mrf.mxu1 }
 0x35b   :  { %7727 = vst [vmem:[#allocation57_spill] sm:$0xff] %v4992_v43 }
 0x35c   :  { %v4994_v23 = vpop.f32.mrf.mxu1 }
 0x35d   :  { %7728 = vst [vmem:[#allocation58_spill] sm:$0xff] %v4994_v23 }
 0x38e   :  { %v916_v46 = vpop.f32.mrf.mxu1 }
 0x38f   :  { %v939_v45 = vsub.f32 %v916_v46, %v4830_v52 }
 0x390   :  { %v918_v17 = vpop.f32.mrf.mxu1 }
 0x391   :  { %v940_v0 = vsub.f32 %v918_v17, %v4802_v12 }
 0x392   :  { %v922_v19 = vpop.f32.mrf.mxu1 }
 0x393   :  { %v941_v57 = vsub.f32 %v922_v19, %v4848_v60  ;;  %v948_v36 = vmul.f32 0.25, %v940_v0  ;;  %v224_v0 = vld [vmem:[%s7049_s7] sm:$0xff] }
 0x394   :  { %v924_v53 = vpop.f32.mrf.mxu1 }
 0x395   :  { %v942_v61 = vsub.f32 %v924_v53, %v4835_v49  ;;  %v949_v33 = vmul.f32 0.25, %v941_v57  ;;  %v956_v46 = vadd.f32 %v948_v36, %v4802_v12  ;;  %v225_v12 = vld [vmem:[%s7049_s7 + $0x8] sm:$0xff]  ;;  %v226_v36 = vld [vmem:[%s7049_s7 + $0x10] sm:$0xff] }
 0x396   :  { %v928_v54 = vpop.f32.mrf.mxu1  ;;  %v5067_v57 = vld [vmem:[#allocation2 + $0x8] sm:$0xff] }
 0x397   :  { %v943_v55 = vsub.f32 %v928_v54, %v4869_v63  ;;  %7732 = vst [vmem:[#allocation61_spill] sm:$0xff] %v5067_v57 }
 0x398   :  { %v930_v47 = vpop.f32.mrf.mxu1 }
 0x399   :  { %v944_v48 = vsub.f32 %v930_v47, %v4855_v4  ;;  %v951_v43 = vmul.f32 0.25, %v943_v55  ;;  %v950_v47 = vmul.f32 0.25, %v942_v61 }
 0x39a   :  { %v934_v51 = vpop.f32.mrf.mxu1 }
 0x39b   :  { %v945_v29 = vsub.f32 %v934_v51, %v4889_v16  ;;  %v952_v23 = vmul.f32 0.25, %v944_v48  ;;  %v959_v19 = vadd.f32 %v951_v43, %v4869_v63  ;;  %v958_v17 = vadd.f32 %v950_v47, %v4835_v49  ;;  %v5064_v49 = vld [vmem:[#allocation2 + $0x10] sm:$0xff]  ;;  %v5094_v63 = vld [vmem:[#allocation2 + $0x1c0] sm:$0xff]  ;;  %v5169_v43 = vld [vmem:[#allocation5 + $0xf8] sm:$0xff]  ;;  %v5174_v48 = vpop.permute.xlu1 %965 }
 0x39c   :  { %v936_v56 = vpop.f32.mrf.mxu1  ;;  %7731 = vst [vmem:[#allocation48_spill] sm:$0xff] %v5064_v49  ;;  %7741 = vst [vmem:[#allocation70_spill] sm:$0xff] %v5094_v63 }
 0x39d   :  { %v946_v7 = vsub.f32 %v936_v56, %v4875_v11  ;;  %v953_v35 = vmul.f32 0.25, %v945_v29  ;;  %v960_v53 = vadd.f32 %v952_v23, %v4855_v4  ;;  %v947_v56 = vmul.f32 0.25, %v939_v45  ;;  %v227_v45 = vld [vmem:[%s7049_s7 + $0x18] sm:$0xff]  ;;  %v5082_v4 = vld [vmem:[#allocation2 + $0x1e0] sm:$0xff]  ;;  %v5172_v23 = vpop.permute.xlu0 %617  ;;  %7767 = vst [vmem:[#allocation20_spill] sm:$0xff] %v5174_v48 }
 0x39e   :  { %7737 = vst [vmem:[#allocation66_spill] sm:$0xff] %v5082_v4  ;;  %7766 = vst [vmem:[#allocation19_spill] sm:$0xff] %v5172_v23  ;;  %v715_v47 = vadd.f32 %v4980_v6, %v5172_v23 }
 0x39f   :  { %v954_v26 = vmul.f32 0.25, %v946_v7  ;;  %v961_v54 = vadd.f32 %v953_v35, %v4889_v16  ;;  %v957_v7 = vadd.f32 %v949_v33, %v4848_v60  ;;  %v5061_v35 = vld [vmem:[#allocation2 + $0x18] sm:$0xff]  ;;  %v5076_v60 = vld [vmem:[#allocation2 + $0x1f0] sm:$0xff]  ;;  %v5166_v33 = vld [vmem:[#allocation2 + $0x100] sm:$0xff]  ;;  %v5178_v55 = vpop.permute.xlu1 %970 }
 0x3a0   :  { %7730 = vst [vmem:[#allocation60_spill] sm:$0xff] %v5061_v35  ;;  %7735 = vst [vmem:[#allocation64_spill] sm:$0xff] %v5076_v60  ;;  %v5112_v16 = vld [vmem:[#allocation2 + $0x190] sm:$0xff] }
 0x3a1   :  { %v962_v51 = vadd.f32 %v954_v26, %v4875_v11  ;;  %v955_v26 = vadd.f32 %v947_v56, %v4830_v52  ;;  %v5058_v52 = vld [vmem:[#allocation2 + $0x20] sm:$0xff]  ;;  %v5100_v11 = vld [vmem:[#allocation2 + $0x1b0] sm:$0xff]  ;;  %7747 = vst [vmem:[#allocation76_spill] sm:$0xff] %v5112_v16  ;;  %7765 = vst [vmem:[#allocation18_spill] sm:$0xff] %v5166_v33  ;;  %v5176_v29 = vpop.permute.xlu0 %622 }
 0x3a2   :  { %7729 = vst [vmem:[#allocation59_spill] sm:$0xff] %v5058_v52  ;;  %7743 = vst [vmem:[#allocation72_spill] sm:$0xff] %v5100_v11 }
 0x3a3   :  { %1019 = vmatprep.subr.mxu0 %v962_v51  ;;  %7768 = vst [vmem:[#allocation21_spill] sm:$0xff] %v5176_v29  ;;  %7769 = vst [vmem:[#allocation22_spill] sm:$0xff] %v5178_v55 }
 0x3a4   :  { %1020 = vmatpush1.msra.mxu0 %v961_v54 }
 0x3a5   :  { %1021 = vmatprep.subr.mxu0 %v960_v53  ;;  %v717_v53 = vadd.f32 %v4982_v8, %v5172_v23 }
 0x3a6   :  { %1022 = vmatpush1.msra.mxu0 %v959_v19 }
 0x3a7   :  { %1023 = vmatprep.subr.mxu0 %v958_v17 }
 0x3a8   :  { %1024 = vmatpush1.msra.mxu0 %v957_v7  ;;  %v5186_v7 = vpop.permute.xlu0 %627 }
 0x3a9   :  { %1025 = vmatprep.subr.mxu0 %v956_v46  ;;  %7770 = vst [vmem:[#allocation23_spill] sm:$0xff] %v5186_v7  ;;  %v721_v46 = vadd.f32 %v4984_v62, %v5176_v29 }
 0x3aa   :  { %1026 = vmatpush1.msra.mxu0 %v955_v26 }
 0x3ab   :  { %3717 = vmatmul.mubr.msk.f32.vlgmr.msra.gmra.mxu0 %vm635_vm2, %v224_v0  ;;  %1221 = vmatprep.subr.mxu0 %v4840_v58  ;;  %v5070_v58 = vld [vmem:[#allocation2] sm:$0xff] }
 0x3ac   :  { %1065 = vmatprep.mubr.f32.mxu0 %v7649_v50  ;;  %1222 = vmatpush1.msra.mxu0 %v4844_v59  ;;  %7733 = vst [vmem:[#allocation62_spill] sm:$0xff] %v5070_v58  ;;  %v5073_v59 = vld [vmem:[#allocation2 + $0x1f8] sm:$0xff] }
 0x3ad   :  { %1223 = vmatprep.subr.mxu0 %v4851_v5  ;;  %7734 = vst [vmem:[#allocation63_spill] sm:$0xff] %v5073_v59  ;;  %v5079_v5 = vld [vmem:[#allocation2 + $0x1e8] sm:$0xff] }
 0x3ae   :  { %1224 = vmatpush1.msra.mxu0 %v4857_v2  ;;  %7736 = vst [vmem:[#allocation65_spill] sm:$0xff] %v5079_v5  ;;  %v5085_v2 = vld [vmem:[#allocation2 + $0x1d8] sm:$0xff] }
 0x3af   :  { %3718 = vmatmul.mubr.msk.f32.gmra.mxu0 %vm635_vm2, %v225_v12  ;;  %1225 = vmatprep.subr.mxu0 %v4861_v9  ;;  %7738 = vst [vmem:[#allocation67_spill] sm:$0xff] %v5085_v2  ;;  %v5088_v9 = vld [vmem:[#allocation2 + $0x1d0] sm:$0xff]  ;;  %v5191_v12 = vpop.permute.xlu1 %975 }
 0x3b0   :  { %1071 = vmatprep.mubr.f32.mxu0 %v7649_v50  ;;  %1226 = vmatpush1.msra.mxu0 %v4865_v1  ;;  %7739 = vst [vmem:[#allocation68_spill] sm:$0xff] %v5088_v9  ;;  %v5091_v1 = vld [vmem:[#allocation2 + $0x1c8] sm:$0xff]  ;;  %7771 = vst [vmem:[#allocation24_spill] sm:$0xff] %v5191_v12 }
 0x3b1   :  { %1227 = vmatprep.subr.mxu0 %v4871_v10  ;;  %7740 = vst [vmem:[#allocation69_spill] sm:$0xff] %v5091_v1  ;;  %v5097_v10 = vld [vmem:[#allocation2 + $0x1b8] sm:$0xff] }
 0x3b2   :  { %1228 = vmatpush1.msra.mxu0 %v4877_v13  ;;  %7742 = vst [vmem:[#allocation71_spill] sm:$0xff] %v5097_v10  ;;  %v5103_v13 = vld [vmem:[#allocation2 + $0x1a8] sm:$0xff] }
 0x3b3   :  { %3719 = vmatmul.mubr.msk.f32.gmra.mxu0 %vm635_vm2, %v226_v36  ;;  %1229 = vmatprep.subr.mxu0 %v4881_v14  ;;  %7744 = vst [vmem:[#allocation73_spill] sm:$0xff] %v5103_v13  ;;  %v5106_v14 = vld [vmem:[#allocation2 + $0x1a0] sm:$0xff] }
 0x3b4   :  { %1077 = vmatprep.mubr.f32.mxu0 %v7649_v50  ;;  %1230 = vmatpush1.msra.mxu0 %v4885_v15  ;;  %7745 = vst [vmem:[#allocation74_spill] sm:$0xff] %v5106_v14  ;;  %v5109_v15 = vld [vmem:[#allocation2 + $0x198] sm:$0xff] }
 0x3b5   :  { %1231 = vmatprep.subr.mxu0 %v4891_v18  ;;  %7746 = vst [vmem:[#allocation75_spill] sm:$0xff] %v5109_v15  ;;  %v5115_v18 = vld [vmem:[#allocation2 + $0x188] sm:$0xff] }
 0x3b6   :  { %1232 = vmatpush1.msra.mxu0 %v4894_v20  ;;  %7748 = vst [vmem:[#allocation77_spill] sm:$0xff] %v5115_v18  ;;  %v5118_v20 = vld [vmem:[#allocation2 + $0x180] sm:$0xff] }
 0x3b7   :  { %3720 = vmatmul.mubr.msk.f32.gmra.mxu0 %vm635_vm2, %v227_v45  ;;  %1233 = vmatprep.subr.mxu0 %v4898_v24  ;;  %7749 = vst [vmem:[#allocation78_spill] sm:$0xff] %v5118_v20  ;;  %v5121_v24 = vld [vmem:[#allocation2 + $0x178] sm:$0xff]  ;;  %v723_v45 = vadd.f32 %v4986_v32, %v5176_v29  ;;  %v5205_v32 = vpop.permute.xlu0 %632 }
 0x3b8   :  { %1234 = vmatpush1.msra.mxu0 %v4901_v25  ;;  %7750 = vst [vmem:[#allocation79_spill] sm:$0xff] %v5121_v24  ;;  %v5124_v25 = vld [vmem:[#allocation2 + $0x170] sm:$0xff]  ;;  %7775 = vst [vmem:[#allocation27_spill] sm:$0xff] %v5205_v32 }
 0x3b9   :  { %1235 = vmatprep.subr.mxu0 %v4904_v31  ;;  %7751 = vst [vmem:[#allocation80_spill] sm:$0xff] %v5124_v25  ;;  %v5127_v31 = vld [vmem:[#allocation2 + $0x168] sm:$0xff] }
 0x3ba   :  { %1236 = vmatpush1.msra.mxu0 %v4907_v34  ;;  %7752 = vst [vmem:[#allocation81_spill] sm:$0xff] %v5127_v31  ;;  %v5130_v34 = vld [vmem:[#allocation2 + $0x160] sm:$0xff] }
 0x3bb   :  { %1237 = vmatprep.subr.mxu0 %v4910_v39  ;;  %7753 = vst [vmem:[#allocation82_spill] sm:$0xff] %v5130_v34  ;;  %v5133_v39 = vld [vmem:[#allocation2 + $0x158] sm:$0xff] }
 0x3bc   :  { %1238 = vmatpush1.msra.mxu0 %v4913_v40  ;;  %7754 = vst [vmem:[#allocation83_spill] sm:$0xff] %v5133_v39  ;;  %v5136_v40 = vld [vmem:[#allocation2 + $0x150] sm:$0xff] }
 0x3bd   :  { %1239 = vmatprep.subr.mxu0 %v4916_v41  ;;  %7755 = vst [vmem:[#allocation84_spill] sm:$0xff] %v5136_v40  ;;  %v5139_v41 = vld [vmem:[#allocation2 + $0x148] sm:$0xff] }
 0x3be   :  { %1240 = vmatpush1.msra.mxu0 %v4919_v27  ;;  %7756 = vst [vmem:[#allocation85_spill] sm:$0xff] %v5139_v41  ;;  %v5142_v27 = vld [vmem:[#allocation2 + $0x140] sm:$0xff] }
 0x3bf   :  { %1241 = vmatprep.subr.mxu0 %v4922_v30  ;;  %7757 = vst [vmem:[#allocation86_spill] sm:$0xff] %v5142_v27  ;;  %v5145_v30 = vld [vmem:[#allocation2 + $0x138] sm:$0xff] }
 0x3c0   :  { %1242 = vmatpush1.msra.mxu0 %v4925_v42  ;;  %7758 = vst [vmem:[#allocation11_spill] sm:$0xff] %v5145_v30  ;;  %v5148_v42 = vld [vmem:[#allocation2 + $0x130] sm:$0xff] }
 0x3c1   :  { %1243 = vmatprep.subr.mxu0 %v4928_v44  ;;  %7759 = vst [vmem:[#allocation12_spill] sm:$0xff] %v5148_v42  ;;  %v5151_v44 = vld [vmem:[#allocation2 + $0x128] sm:$0xff] }
 0x3c2   :  { %1244 = vmatpush1.msra.mxu0 %v4931_v21  ;;  %7760 = vst [vmem:[#allocation13_spill] sm:$0xff] %v5151_v44  ;;  %v5154_v21 = vld [vmem:[#allocation2 + $0x120] sm:$0xff] }
 0x3c3   :  { %1245 = vmatprep.subr.mxu0 %v4934_v22  ;;  %7761 = vst [vmem:[#allocation14_spill] sm:$0xff] %v5154_v21  ;;  %v5157_v22 = vld [vmem:[#allocation2 + $0x118] sm:$0xff] }
 0x3c4   :  { %1246 = vmatpush1.msra.mxu0 %v4937_v28  ;;  %7762 = vst [vmem:[#allocation15_spill] sm:$0xff] %v5157_v22  ;;  %v5160_v28 = vld [vmem:[#allocation2 + $0x110] sm:$0xff] }
 0x3c5   :  { %1247 = vmatprep.subr.mxu0 %v4940_v37  ;;  %7763 = vst [vmem:[#allocation16_spill] sm:$0xff] %v5160_v28  ;;  %v5163_v37 = vld [vmem:[#allocation2 + $0x108] sm:$0xff] }
 0x3c6   :  { %1248 = vmatpush1.msra.mxu0 %v5058_v52  ;;  %7764 = vst [vmem:[#allocation17_spill] sm:$0xff] %v5163_v37  ;;  %v5421_v52 = vld [vmem:[#allocation5 + $0x188] sm:$0xff] }
 0x3c7   :  { %1249 = vmatprep.subr.mxu0 %v5061_v35  ;;  %v5418_v35 = vld [vmem:[#allocation5 + $0x190] sm:$0xff]  ;;  %7837 = vst [vmem:[#allocation109_spill] sm:$0xff] %v5421_v52 }
 0x3c8   :  { %1250 = vmatpush1.msra.mxu0 %v5064_v49  ;;  %v5415_v49 = vld [vmem:[#allocation5 + $0x198] sm:$0xff]  ;;  %7836 = vst [vmem:[#allocation108_spill] sm:$0xff] %v5418_v35 }
 0x3c9   :  { %1251 = vmatprep.subr.mxu0 %v5067_v57  ;;  %v5412_v57 = vld [vmem:[#allocation5 + $0x1a0] sm:$0xff]  ;;  %7835 = vst [vmem:[#allocation107_spill] sm:$0xff] %v5415_v49 }
 0x3ca   :  { %1252 = vmatpush1.msra.mxu0 %v5070_v58  ;;  %v5409_v58 = vld [vmem:[#allocation5 + $0x1a8] sm:$0xff]  ;;  %7834 = vst [vmem:[#allocation106_spill] sm:$0xff] %v5412_v57 }
 0x3cb   :  { %1253 = vmatprep.subr.mxu0 %v5073_v59  ;;  %v5406_v59 = vld [vmem:[#allocation5 + $0x1b0] sm:$0xff]  ;;  %7833 = vst [vmem:[#allocation105_spill] sm:$0xff] %v5409_v58 }
 0x3cc   :  { %1254 = vmatpush2.msra.mxu0 %v5076_v60  ;;  %v5403_v60 = vld [vmem:[#allocation5 + $0x1b8] sm:$0xff]  ;;  %7832 = vst [vmem:[#allocation104_spill] sm:$0xff] %v5406_v59 }
 0x3cd   :  { %1255 = vmatprep.subr.mxu0 %v5079_v5  ;;  %v5400_v5 = vld [vmem:[#allocation5 + $0x1c0] sm:$0xff]  ;;  %7831 = vst [vmem:[#allocation103_spill] sm:$0xff] %v5403_v60 }
 0x3ce   :  { %1256 = vmatpush2.msra.mxu0 %v5082_v4  ;;  %v5397_v4 = vld [vmem:[#allocation5 + $0x1c8] sm:$0xff]  ;;  %7830 = vst [vmem:[#allocation102_spill] sm:$0xff] %v5400_v5 }
 0x3cf   :  { %1257 = vmatprep.subr.mxu0 %v5085_v2  ;;  %v5394_v2 = vld [vmem:[#allocation5 + $0x1d0] sm:$0xff]  ;;  %7829 = vst [vmem:[#allocation101_spill] sm:$0xff] %v5397_v4 }
 0x3d0   :  { %1258 = vmatpush2.msra.mxu0 %v5088_v9  ;;  %v5391_v9 = vld [vmem:[#allocation5 + $0x1d8] sm:$0xff]  ;;  %7828 = vst [vmem:[#allocation100_spill] sm:$0xff] %v5394_v2 }
 0x3d1   :  { %1259 = vmatprep.subr.mxu0 %v5091_v1  ;;  %v5388_v1 = vld [vmem:[#allocation5 + $0x1e0] sm:$0xff]  ;;  %7827 = vst [vmem:[#allocation99_spill] sm:$0xff] %v5391_v9 }
 0x3d2   :  { %1260 = vmatpush2.msra.mxu0 %v5094_v63  ;;  %v5385_v63 = vld [vmem:[#allocation5 + $0x1e8] sm:$0xff]  ;;  %7826 = vst [vmem:[#allocation98_spill] sm:$0xff] %v5388_v1 }
 0x3d3   :  { %1261 = vmatprep.subr.mxu0 %v5097_v10  ;;  %v5382_v10 = vld [vmem:[#allocation5 + $0x1f0] sm:$0xff]  ;;  %7825 = vst [vmem:[#allocation97_spill] sm:$0xff] %v5385_v63 }
 0x3d4   :  { %1262 = vmatpush2.msra.mxu0 %v5100_v11  ;;  %v5379_v11 = vld [vmem:[#allocation5 + $0x1f8] sm:$0xff]  ;;  %7824 = vst [vmem:[#allocation96_spill] sm:$0xff] %v5382_v10 }
 0x3d5   :  { %1263 = vmatprep.subr.mxu0 %v5103_v13  ;;  %v5376_v13 = vld [vmem:[#allocation5] sm:$0xff]  ;;  %7823 = vst [vmem:[#allocation95_spill] sm:$0xff] %v5379_v11 }
 0x3d6   :  { %1264 = vmatpush2.msra.mxu0 %v5106_v14  ;;  %v5373_v14 = vld [vmem:[#allocation5 + $0x8] sm:$0xff]  ;;  %7822 = vst [vmem:[#allocation94_spill] sm:$0xff] %v5376_v13 }
 0x3d7   :  { %1265 = vmatprep.subr.mxu0 %v5109_v15  ;;  %v5370_v15 = vld [vmem:[#allocation5 + $0x10] sm:$0xff]  ;;  %7821 = vst [vmem:[#allocation93_spill] sm:$0xff] %v5373_v14 }
 0x3d8   :  { %1266 = vmatpush2.msra.mxu0 %v5112_v16  ;;  %v5367_v16 = vld [vmem:[#allocation5 + $0x18] sm:$0xff]  ;;  %7820 = vst [vmem:[#allocation92_spill] sm:$0xff] %v5370_v15 }
 0x3d9   :  { %1267 = vmatprep.subr.mxu0 %v5115_v18  ;;  %v5364_v18 = vld [vmem:[#allocation5 + $0x20] sm:$0xff]  ;;  %7819 = vst [vmem:[#allocation91_spill] sm:$0xff] %v5367_v16 }
 0x3da   :  { %1268 = vmatpush2.msra.mxu0 %v5118_v20  ;;  %v5361_v20 = vld [vmem:[#allocation5 + $0x28] sm:$0xff]  ;;  %7818 = vst [vmem:[#allocation90_spill] sm:$0xff] %v5364_v18 }
 0x3db   :  { %1269 = vmatprep.subr.mxu0 %v5121_v24  ;;  %v5358_v24 = vld [vmem:[#allocation5 + $0x30] sm:$0xff]  ;;  %7817 = vst [vmem:[#allocation89_spill] sm:$0xff] %v5361_v20 }
 0x3dc   :  { %1270 = vmatpush2.msra.mxu0 %v5124_v25  ;;  %v5355_v25 = vld [vmem:[#allocation5 + $0x38] sm:$0xff]  ;;  %7816 = vst [vmem:[#allocation88_spill] sm:$0xff] %v5358_v24 }
 0x3dd   :  { %1271 = vmatprep.subr.mxu0 %v5127_v31  ;;  %v5352_v31 = vld [vmem:[#allocation5 + $0x40] sm:$0xff]  ;;  %7815 = vst [vmem:[#allocation87_spill] sm:$0xff] %v5355_v25 }
 0x3de   :  { %1272 = vmatpush2.msra.mxu0 %v5130_v34  ;;  %v5349_v34 = vld [vmem:[#allocation5 + $0x48] sm:$0xff] }
 0x3df   :  { %1273 = vmatprep.subr.mxu0 %v5133_v39  ;;  %v5346_v39 = vld [vmem:[#allocation5 + $0x50] sm:$0xff] }
 0x3e0   :  { %1274 = vmatpush2.msra.mxu0 %v5136_v40  ;;  %v5343_v40 = vld [vmem:[#allocation5 + $0x58] sm:$0xff] }
 0x3e1   :  { %1275 = vmatprep.subr.mxu0 %v5139_v41  ;;  %v5340_v41 = vld [vmem:[#allocation5 + $0x60] sm:$0xff] }
 0x3e2   :  { %1276 = vmatpush2.msra.mxu0 %v5142_v27  ;;  %v5337_v27 = vld [vmem:[#allocation5 + $0x68] sm:$0xff] }
 0x3e3   :  { %1277 = vmatprep.subr.mxu0 %v5145_v30  ;;  %v5334_v30 = vld [vmem:[#allocation5 + $0x70] sm:$0xff] }
 0x3e4   :  { %1278 = vmatpush2.msra.mxu0 %v5148_v42  ;;  %v5331_v42 = vld [vmem:[#allocation5 + $0x78] sm:$0xff] }
 0x3e5   :  { %1279 = vmatprep.subr.mxu0 %v5151_v44  ;;  %v5328_v44 = vld [vmem:[#allocation5 + $0x80] sm:$0xff] }
 0x3e6   :  { %1280 = vmatpush2.msra.mxu0 %v5154_v21  ;;  %v5317_v21 = vld [vmem:[#allocation5 + $0x98] sm:$0xff] }
 0x3e7   :  { %1281 = vmatprep.subr.mxu0 %v5157_v22  ;;  %v5313_v22 = vld [vmem:[#allocation5 + $0xa0] sm:$0xff]  ;;  %7803 = vst [vmem:[#allocation46_spill] sm:$0xff] %v5317_v21 }
 0x3e8   :  { %1282 = vmatpush2.msra.mxu0 %v5160_v28  ;;  %v5293_v28 = vld [vmem:[#allocation5 + $0xc0] sm:$0xff]  ;;  %7802 = vst [vmem:[#allocation45_spill] sm:$0xff] %v5313_v22 }
 0x3e9   :  { %1283 = vmatprep.subr.mxu0 %v5163_v37  ;;  %7798 = vst [vmem:[#allocation41_spill] sm:$0xff] %v5293_v28 }
 0x3ea   :  { %1284 = vmatpush2.msra.mxu0 %v5166_v33  ;;  %v5290_v33 = vld [vmem:[#allocation5 + $0xc8] sm:$0xff] }
 0x3eb   :  { %1423 = vmatprep.subr.mxu0 %v5169_v43  ;;  %7797 = vst [vmem:[#allocation40_spill] sm:$0xff] %v5290_v33 }
 0x46b   :  { %v1061_v61 = vpop.f32.mrf.mxu0 }
 0x46c   :  { %v1062_v51 = vadd.f32 %v1061_v61, %v5174_v48 }
 0x46d   :  { %v1063_v54 = vpop.f32.mrf.mxu0 }
 0x46e   :  { %v1084_v56 = vadd.f32 %v1062_v51, %v715_v47  ;;  %v1064_v19 = vadd.f32 %v1063_v54, %v5174_v48  ;;  %v727_v54 = vadd.f32 %v4988_v38, %v5186_v7 }
 0x46f   :  { %v1067_v17 = vpop.f32.mrf.mxu0 }
 0x470   :  { %v1085_v26 = vadd.f32 %v1064_v19, %v717_v53  ;;  %v1068_v0 = vadd.f32 %v1067_v17, %v5178_v55  ;;  %v1092_v6 = vmul.f32 0.25, %v1084_v56  ;;  %v7773_v17 = vld [vmem:[#allocation49_spill] sm:$0xff] }
 0x471   :  { %v1069_v36 = vpop.f32.mrf.mxu0 }
 0x472   :  { %v1093_v8 = vmul.f32 0.25, %v1085_v26  ;;  %v1086_v61 = vadd.f32 %v1068_v0, %v721_v46  ;;  %v1070_v47 = vadd.f32 %v1069_v36, %v5178_v55  ;;  %v5203_v56 = vadd.f32 %v1092_v6, %v7773_v17  ;;  %v7776_v46 = vld [vmem:[#allocation56_spill] sm:$0xff]  ;;  %v7778_v6 = vld [vmem:[#allocation57_spill] sm:$0xff] }
 0x473   :  { %v1073_v51 = vpop.f32.mrf.mxu0  ;;  %v729_v26 = vadd.f32 %v7776_v46, %v5186_v7  ;;  %v7783_v46 = vld [vmem:[#allocation58_spill] sm:$0xff]  ;;  %7806 = vst [vmem:[#allocation56_spill] sm:$0xff] %v5328_v44  ;;  %7807 = vst [vmem:[#allocation57_spill] sm:$0xff] %v5331_v42 }
 0x474   :  { %v5199_v62 = vadd.f32 %v1093_v8, %v7655_v3  ;;  %v1087_v53 = vadd.f32 %v1070_v47, %v723_v45  ;;  %v1074_v19 = vadd.f32 %v1073_v51, %v5191_v12  ;;  %7774 = vst [vmem:[#allocation26_spill] sm:$0xff] %v5203_v56  ;;  %v1094_v48 = vmul.f32 0.25, %v1086_v61  ;;  %v5211_v3 = vpop.permute.xlu1 %980  ;;  %v7779_v61 = vld [vmem:[#allocation50_spill] sm:$0xff]  ;;  %7810 = vst [vmem:[#allocation58_spill] sm:$0xff] %v5340_v41 }
 0x475   :  { %v1075_v23 = vpop.f32.mrf.mxu0  ;;  %7777 = vst [vmem:[#allocation28_spill] sm:$0xff] %v5211_v3  ;;  %v733_v8 = vadd.f32 %v7778_v6, %v5205_v32  ;;  %7808 = vst [vmem:[#allocation50_spill] sm:$0xff] %v5334_v30 }
 0x476   :  { %7772 = vst [vmem:[#allocation25_spill] sm:$0xff] %v5199_v62  ;;  %v1095_v0 = vmul.f32 0.25, %v1087_v53  ;;  %v1088_v36 = vadd.f32 %v1074_v19, %v727_v54  ;;  %v1076_v38 = vadd.f32 %v1075_v23, %v5191_v12  ;;  %1172 = vmatprep.mubr.f32.mxu1 %v5199_v62  ;;  %v7781_v53 = vld [vmem:[#allocation51_spill] sm:$0xff]  ;;  %v735_v12 = vadd.f32 %v7783_v46, %v5205_v32 }
 0x477   :  { %v1079_v45 = vpop.f32.mrf.mxu0  ;;  %1173 = vmatmul.mubr.f32.vlgmr.msra.gmra.mxu1 %v5203_v56  ;;  %v5221_v54 = vadd.f32 %v1094_v48, %v7781_v53  ;;  %7809 = vst [vmem:[#allocation51_spill] sm:$0xff] %v5337_v27 }
 0x478   :  { %v5217_v47 = vadd.f32 %v1095_v0, %v7779_v61  ;;  %v1089_v51 = vadd.f32 %v1076_v38, %v729_v26  ;;  %v1080_v17 = vadd.f32 %v1079_v45, %v5211_v3  ;;  %v1096_v23 = vmul.f32 0.25, %v1088_v36  ;;  %v7784_v0 = vld [vmem:[#allocation52_spill] sm:$0xff]  ;;  %v7786_v45 = vld [vmem:[#allocation53_spill] sm:$0xff] }
 0x479   :  { %7782 = vst [vmem:[#allocation30_spill] sm:$0xff] %v5221_v54  ;;  %v1081_v19 = vpop.f32.mrf.mxu0  ;;  %7811 = vst [vmem:[#allocation52_spill] sm:$0xff] %v5343_v40 }
 0x47a   :  { %7780 = vst [vmem:[#allocation29_spill] sm:$0xff] %v5217_v47  ;;  %v1097_v7 = vmul.f32 0.25, %v1089_v51  ;;  %v1090_v55 = vadd.f32 %v1080_v17, %v733_v8  ;;  %v1082_v29 = vadd.f32 %v1081_v19, %v5211_v3  ;;  %1178 = vmatprep.mubr.f32.mxu1 %v5217_v47  ;;  %v5232_v48 = vadd.f32 %v1096_v23, %v7786_v45  ;;  %v7788_v8 = vld [vmem:[#allocation54_spill] sm:$0xff]  ;;  %v7790_v51 = vld [vmem:[#allocation55_spill] sm:$0xff]  ;;  %v5284_v3 = vld [vmem:[#allocation5 + $0xd0] sm:$0xff] }
 0x47b   :  { %1179 = vmatmul.mubr.f32.gmra.mxu1 %v5221_v54  ;;  %7796 = vst [vmem:[#allocation39_spill] sm:$0xff] %v5284_v3  ;;  %7812 = vst [vmem:[#allocation53_spill] sm:$0xff] %v5346_v39 }
 0x47c   :  { %v5229_v26 = vadd.f32 %v1097_v7, %v7784_v0  ;;  %v1091_v38 = vadd.f32 %v1082_v29, %v735_v12  ;;  %7787 = vst [vmem:[#allocation32_spill] sm:$0xff] %v5232_v48  ;;  %v1098_v36 = vmul.f32 0.25, %v1090_v55  ;;  %7813 = vst [vmem:[#allocation54_spill] sm:$0xff] %v5349_v34 }
 0x47d   :  { %7814 = vst [vmem:[#allocation55_spill] sm:$0xff] %v5352_v31 }
 0x47e   :  { %7785 = vst [vmem:[#allocation31_spill] sm:$0xff] %v5229_v26  ;;  %v1099_v6 = vmul.f32 0.25, %v1091_v38  ;;  %1184 = vmatprep.mubr.f32.mxu1 %v5229_v26  ;;  %v5240_v17 = vadd.f32 %v1098_v36, %v7790_v51 }
 0x47f   :  { %1185 = vmatmul.mubr.f32.gmra.mxu1 %v5232_v48 }
 0x480   :  { %v5237_v61 = vadd.f32 %v1099_v6, %v7788_v8  ;;  %7791 = vst [vmem:[#allocation34_spill] sm:$0xff] %v5240_v17 }
 0x482   :  { %7789 = vst [vmem:[#allocation33_spill] sm:$0xff] %v5237_v61  ;;  %1190 = vmatprep.mubr.f32.mxu1 %v5237_v61 }
 0x483   :  { %1191 = vmatmul.mubr.f32.gmra.mxu1 %v5240_v17 }
 0x484   :  { %1398 = vmatprep.mubr.f32.mxu1 %v7649_v50 }
 0x537   :  { %v1174_v29 = vpop.f32.mrf.mxu1 }
 0x538   :  { %v1197_v55 = vsub.f32 %v1174_v29, %v5203_v56 }
 0x539   :  { %v1176_v7 = vpop.f32.mrf.mxu1 }
 0x53a   :  { %v1198_v12 = vsub.f32 %v1176_v7, %v5199_v62  ;;  %v1205_v53 = vmul.f32 0.25, %v1197_v55 }
 0x53b   :  { %v1180_v23 = vpop.f32.mrf.mxu1 }
 0x53c   :  { %v1206_v19 = vmul.f32 0.25, %v1198_v12  ;;  %v1199_v46 = vsub.f32 %v1180_v23, %v5221_v54  ;;  %v5253_v36 = vadd.f32 %v1205_v53, %v5203_v56  ;;  %v5262_v23 = vld [vmem:[#allocation5 + $0xf0] sm:$0xff] }
 0x53d   :  { %v1182_v0 = vpop.f32.mrf.mxu1  ;;  %7792 = vst [vmem:[#allocation35_spill] sm:$0xff] %v5262_v23 }
 0x53e   :  { %v5249_v38 = vadd.f32 %v1206_v19, %v5199_v62  ;;  %v1200_v45 = vsub.f32 %v1182_v0, %v5217_v47  ;;  %v1207_v6 = vmul.f32 0.25, %v1199_v46  ;;  %v5268_v46 = vld [vmem:[#allocation5 + $0xe8] sm:$0xff] }
 0x53f   :  { %v1186_v8 = vpop.f32.mrf.mxu1  ;;  %7793 = vst [vmem:[#allocation36_spill] sm:$0xff] %v5268_v46 }
 0x540   :  { %v1208_v51 = vmul.f32 0.25, %v1200_v45  ;;  %v1201_v29 = vsub.f32 %v1186_v8, %v5232_v48  ;;  %1285 = vmatprep.mubr.f32.mxu0 %v5249_v38  ;;  %v5266_v53 = vadd.f32 %v1207_v6, %v5221_v54 }
 0x541   :  { %v1188_v55 = vpop.f32.mrf.mxu1  ;;  %1286 = vmatmul.mubr.f32.vlgmr.msra.gmra.mxu0 %v5253_v36 }
 0x542   :  { %v5259_v7 = vadd.f32 %v1208_v51, %v5217_v47  ;;  %v1202_v12 = vsub.f32 %v1188_v55, %v5229_v26  ;;  %1424 = vmatpush1.msra.mxu0 %v5262_v23  ;;  %v1209_v19 = vmul.f32 0.25, %v1201_v29  ;;  %v5272_v51 = vld [vmem:[#allocation5 + $0xe0] sm:$0xff]  ;;  %v5276_v55 = vld [vmem:[#allocation5 + $0xd8] sm:$0xff] }
 0x543   :  { %1425 = vmatprep.subr.mxu0 %v5268_v46  ;;  %v1192_v0 = vpop.f32.mrf.mxu1  ;;  %7794 = vst [vmem:[#allocation37_spill] sm:$0xff] %v5272_v51  ;;  %7795 = vst [vmem:[#allocation38_spill] sm:$0xff] %v5276_v55 }
 0x544   :  { %v1210_v45 = vmul.f32 0.25, %v1202_v12  ;;  %v1203_v8 = vsub.f32 %v1192_v0, %v5240_v17  ;;  %1426 = vmatpush1.msra.mxu0 %v5272_v51  ;;  %1291 = vmatprep.mubr.f32.mxu0 %v5259_v7  ;;  %v5288_v0 = vadd.f32 %v1209_v19, %v5232_v48 }
 0x545   :  { %1427 = vmatprep.subr.mxu0 %v5276_v55  ;;  %v1194_v6 = vpop.f32.mrf.mxu1  ;;  %1292 = vmatmul.mubr.f32.gmra.mxu0 %v5266_v53 }
 0x546   :  { %v5281_v29 = vadd.f32 %v1210_v45, %v5229_v26  ;;  %v1204_v12 = vsub.f32 %v1194_v6, %v5237_v61  ;;  %1428 = vmatpush1.msra.mxu0 %v5284_v3  ;;  %v1211_v32 = vmul.f32 0.25, %v1203_v8  ;;  %v5297_v45 = vld [vmem:[#allocation5 + $0xb8] sm:$0xff]  ;;  %v5304_v8 = vld [vmem:[#allocation5 + $0xb0] sm:$0xff] }
 0x547   :  { %1429 = vmatprep.subr.mxu0 %v5290_v33  ;;  %7799 = vst [vmem:[#allocation42_spill] sm:$0xff] %v5297_v45  ;;  %7800 = vst [vmem:[#allocation43_spill] sm:$0xff] %v5304_v8 }
 0x548   :  { %v1212_v37 = vmul.f32 0.25, %v1204_v12  ;;  %1430 = vmatpush1.msra.mxu0 %v5293_v28  ;;  %1297 = vmatprep.mubr.f32.mxu0 %v5281_v29  ;;  %v5308_v6 = vadd.f32 %v1211_v32, %v5240_v17  ;;  %v5310_v12 = vld [vmem:[#allocation5 + $0xa8] sm:$0xff] }
 0x549   :  { %1431 = vmatprep.subr.mxu0 %v5297_v45  ;;  %1298 = vmatmul.mubr.f32.gmra.mxu0 %v5288_v0  ;;  %7801 = vst [vmem:[#allocation44_spill] sm:$0xff] %v5310_v12  ;;  %v5325_v32 = vld [vmem:[#allocation5 + $0x88] sm:$0xff] }
 0x54a   :  { %v5302_v19 = vadd.f32 %v1212_v37, %v5237_v61  ;;  %1432 = vmatpush1.msra.mxu0 %v5304_v8  ;;  %v5321_v37 = vld [vmem:[#allocation5 + $0x90] sm:$0xff]  ;;  %7805 = vst [vmem:[#allocation49_spill] sm:$0xff] %v5325_v32 }
 0x54b   :  { %1433 = vmatprep.subr.mxu0 %v5310_v12  ;;  %7804 = vst [vmem:[#allocation47_spill] sm:$0xff] %v5321_v37 }
 0x54c   :  { %1434 = vmatpush1.msra.mxu0 %v5313_v22  ;;  %1303 = vmatprep.mubr.f32.mxu0 %v5302_v19 }
 0x54d   :  { %1435 = vmatprep.subr.mxu0 %v5317_v21  ;;  %1304 = vmatmul.mubr.f32.gmra.mxu0 %v5308_v6 }
 0x54e   :  { %1436 = vmatpush1.msra.mxu0 %v5321_v37  ;;  %1487 = vmatprep.mubr.f32.mxu0 %v5199_v62 }
 0x54f   :  { %1437 = vmatprep.subr.mxu0 %v5325_v32 }
 0x550   :  { %1438 = vmatpush1.msra.mxu0 %v5328_v44 }
 0x551   :  { %1439 = vmatprep.subr.mxu0 %v5331_v42 }
 0x552   :  { %1440 = vmatpush1.msra.mxu0 %v5334_v30 }
 0x553   :  { %1441 = vmatprep.subr.mxu0 %v5337_v27 }
 0x554   :  { %1442 = vmatpush1.msra.mxu0 %v5340_v41 }
 0x555   :  { %1443 = vmatprep.subr.mxu0 %v5343_v40 }
 0x556   :  { %1444 = vmatpush1.msra.mxu0 %v5346_v39 }
 0x557   :  { %1445 = vmatprep.subr.mxu0 %v5349_v34 }
 0x558   :  { %1446 = vmatpush1.msra.mxu0 %v5352_v31 }
 0x559   :  { %1447 = vmatprep.subr.mxu0 %v5355_v25 }
 0x55a   :  { %1448 = vmatpush1.msra.mxu0 %v5358_v24 }
 0x55b   :  { %1449 = vmatprep.subr.mxu0 %v5361_v20 }
 0x55c   :  { %1450 = vmatpush1.msra.mxu0 %v5364_v18 }
 0x55d   :  { %1451 = vmatprep.subr.mxu0 %v5367_v16 }
 0x55e   :  { %1452 = vmatpush1.msra.mxu0 %v5370_v15 }
 0x55f   :  { %1453 = vmatprep.subr.mxu0 %v5373_v14 }
 0x560   :  { %1454 = vmatpush1.msra.mxu0 %v5376_v13 }
 0x561   :  { %1455 = vmatprep.subr.mxu0 %v5379_v11 }
 0x562   :  { %1456 = vmatpush2.msra.mxu0 %v5382_v10 }
 0x563   :  { %1457 = vmatprep.subr.mxu0 %v5385_v63 }
 0x564   :  { %1458 = vmatpush2.msra.mxu0 %v5388_v1 }
 0x565   :  { %1459 = vmatprep.subr.mxu0 %v5391_v9 }
 0x566   :  { %1460 = vmatpush2.msra.mxu0 %v5394_v2 }
 0x567   :  { %1461 = vmatprep.subr.mxu0 %v5397_v4 }
 0x568   :  { %1462 = vmatpush2.msra.mxu0 %v5400_v5 }
 0x569   :  { %1463 = vmatprep.subr.mxu0 %v5403_v60 }
 0x56a   :  { %1464 = vmatpush2.msra.mxu0 %v5406_v59  ;;  %v5424_v59 = vld [vmem:[#allocation5 + $0x180] sm:$0xff] }
 0x56b   :  { %1465 = vmatprep.subr.mxu0 %v5409_v58  ;;  %7838 = vst [vmem:[#allocation110_spill] sm:$0xff] %v5424_v59  ;;  %v5427_v58 = vld [vmem:[#allocation5 + $0x178] sm:$0xff] }
 0x56c   :  { %1466 = vmatpush2.msra.mxu0 %v5412_v57  ;;  %7839 = vst [vmem:[#allocation111_spill] sm:$0xff] %v5427_v58  ;;  %v5430_v57 = vld [vmem:[#allocation5 + $0x170] sm:$0xff] }
 0x56d   :  { %1467 = vmatprep.subr.mxu0 %v5415_v49  ;;  %7840 = vst [vmem:[#allocation112_spill] sm:$0xff] %v5430_v57  ;;  %v5433_v49 = vld [vmem:[#allocation5 + $0x168] sm:$0xff] }
 0x56e   :  { %1468 = vmatpush2.msra.mxu0 %v5418_v35  ;;  %7841 = vst [vmem:[#allocation113_spill] sm:$0xff] %v5433_v49  ;;  %v5436_v35 = vld [vmem:[#allocation5 + $0x160] sm:$0xff] }
 0x56f   :  { %1469 = vmatprep.subr.mxu0 %v5421_v52  ;;  %7842 = vst [vmem:[#allocation114_spill] sm:$0xff] %v5436_v35  ;;  %v5439_v52 = vld [vmem:[#allocation5 + $0x158] sm:$0xff] }
 0x570   :  { %1470 = vmatpush2.msra.mxu0 %v5424_v59  ;;  %7843 = vst [vmem:[#allocation115_spill] sm:$0xff] %v5439_v52  ;;  %v5442_v59 = vld [vmem:[#allocation5 + $0x150] sm:$0xff] }
 0x571   :  { %1471 = vmatprep.subr.mxu0 %v5427_v58  ;;  %7844 = vst [vmem:[#allocation116_spill] sm:$0xff] %v5442_v59  ;;  %v5445_v58 = vld [vmem:[#allocation5 + $0x148] sm:$0xff] }
 0x572   :  { %1472 = vmatpush2.msra.mxu0 %v5430_v57  ;;  %7845 = vst [vmem:[#allocation117_spill] sm:$0xff] %v5445_v58  ;;  %v5448_v57 = vld [vmem:[#allocation5 + $0x140] sm:$0xff] }
 0x573   :  { %1473 = vmatprep.subr.mxu0 %v5433_v49  ;;  %7846 = vst [vmem:[#allocation118_spill] sm:$0xff] %v5448_v57  ;;  %v5451_v49 = vld [vmem:[#allocation5 + $0x138] sm:$0xff] }
 0x574   :  { %1474 = vmatpush2.msra.mxu0 %v5436_v35  ;;  %7847 = vst [vmem:[#allocation119_spill] sm:$0xff] %v5451_v49  ;;  %v5454_v35 = vld [vmem:[#allocation5 + $0x130] sm:$0xff] }
 0x575   :  { %1475 = vmatprep.subr.mxu0 %v5439_v52  ;;  %7848 = vst [vmem:[#allocation120_spill] sm:$0xff] %v5454_v35  ;;  %v5457_v52 = vld [vmem:[#allocation5 + $0x128] sm:$0xff] }
 0x576   :  { %1476 = vmatpush2.msra.mxu0 %v5442_v59  ;;  %7849 = vst [vmem:[#allocation121_spill] sm:$0xff] %v5457_v52  ;;  %v5460_v59 = vld [vmem:[#allocation5 + $0x120] sm:$0xff] }
 0x577   :  { %1477 = vmatprep.subr.mxu0 %v5445_v58  ;;  %7850 = vst [vmem:[#allocation122_spill] sm:$0xff] %v5460_v59  ;;  %v5463_v58 = vld [vmem:[#allocation5 + $0x118] sm:$0xff] }
 0x578   :  { %1478 = vmatpush2.msra.mxu0 %v5448_v57  ;;  %7851 = vst [vmem:[#allocation123_spill] sm:$0xff] %v5463_v58  ;;  %v5466_v57 = vld [vmem:[#allocation5 + $0x110] sm:$0xff] }
 0x579   :  { %1479 = vmatprep.subr.mxu0 %v5451_v49  ;;  %7852 = vst [vmem:[#allocation124_spill] sm:$0xff] %v5466_v57  ;;  %v5469_v49 = vld [vmem:[#allocation5 + $0x108] sm:$0xff] }
 0x57a   :  { %1480 = vmatpush2.msra.mxu0 %v5454_v35  ;;  %7853 = vst [vmem:[#allocation125_spill] sm:$0xff] %v5469_v49  ;;  %v5472_v35 = vld [vmem:[#allocation5 + $0x100] sm:$0xff] }
 0x57b   :  { %1481 = vmatprep.subr.mxu0 %v5457_v52  ;;  %7854 = vst [vmem:[#allocation126_spill] sm:$0xff] %v5472_v35 }
 0x57c   :  { %1482 = vmatpush2.msra.mxu0 %v5460_v59 }
 0x57d   :  { %1483 = vmatprep.subr.mxu0 %v5463_v58 }
 0x57e   :  { %1484 = vmatpush2.msra.mxu0 %v5466_v57 }
 0x57f   :  { %1485 = vmatprep.subr.mxu0 %v5469_v49 }
 0x580   :  { %1486 = vmatpush2.msra.mxu0 %v5472_v35 }
 0x581   :  { %1488 = vmatmul.mubr.f32.vlgmr.msra.gmra.mxu0 %v5203_v56 }
 0x582   :  { %1493 = vmatprep.mubr.f32.mxu0 %v5217_v47 }
 0x585   :  { %1494 = vmatmul.mubr.f32.gmra.mxu0 %v5221_v54 }
 0x586   :  { %1499 = vmatprep.mubr.f32.mxu0 %v5229_v26 }
 0x589   :  { %1500 = vmatmul.mubr.f32.gmra.mxu0 %v5232_v48 }
 0x58a   :  { %1505 = vmatprep.mubr.f32.mxu0 %v5237_v61 }
 0x58d   :  { %1506 = vmatmul.mubr.f32.gmra.mxu0 %v5240_v17 }
 0x58e   :  { %1713 = vmatprep.mubr.f32.mxu0 %v7649_v50 }
 0x601   :  { %v1287_v49 = vpop.f32.mrf.mxu0 }
 0x602   :  { %v1310_v9 = vsub.f32 %v1287_v49, %v5253_v36 }
 0x603   :  { %v1289_v57 = vpop.f32.mrf.mxu0 }
 0x604   :  { %v1311_v4 = vsub.f32 %v1289_v57, %v5249_v38 }
 0x605   :  { %v1293_v58 = vpop.f32.mrf.mxu0 }
 0x606   :  { %v1312_v60 = vsub.f32 %v1293_v58, %v5266_v53  ;;  %v1319_v10 = vmul.f32 0.25, %v1311_v4  ;;  %v5514_v4 = vld [vmem:[%s7047_s5 + $0x8] sm:$0xff] }
 0x607   :  { %v1295_v35 = vpop.f32.mrf.mxu0  ;;  %7856 = vst [vmem:[#allocation128_spill] sm:$0xff] %v5514_v4 }
 0x608   :  { %v1313_v61 = vsub.f32 %v1295_v35, %v5259_v7  ;;  %v1320_v63 = vmul.f32 0.25, %v1312_v60 }
 0x609   :  { %v1299_v59 = vpop.f32.mrf.mxu0 }
 0x60a   :  { %v1314_v26 = vsub.f32 %v1299_v59, %v5288_v0  ;;  %v1328_v49 = vadd.f32 %v1320_v63, %v5266_v53  ;;  %v7860_v63 = vld [vmem:[#allocation97_spill] sm:$0xff] }
 0x60b   :  { %v1301_v52 = vpop.f32.mrf.mxu0 }
 0x60c   :  { %v1315_v47 = vsub.f32 %v1301_v52, %v5281_v29  ;;  %v1322_v1 = vmul.f32 0.25, %v1314_v26  ;;  %v1321_v52 = vmul.f32 0.25, %v1313_v61  ;;  %v7863_v26 = vld [vmem:[#allocation100_spill] sm:$0xff]  ;;  %v7864_v61 = vld [vmem:[#allocation25_spill] sm:$0xff] }
 0x60d   :  { %v1305_v56 = vpop.f32.mrf.mxu0 }
 0x60e   :  { %v1316_v54 = vsub.f32 %v1305_v56, %v5308_v6  ;;  %v1323_v62 = vmul.f32 0.25, %v1315_v47  ;;  %v1330_v58 = vadd.f32 %v1322_v1, %v5288_v0  ;;  %v1329_v57 = vadd.f32 %v1321_v52, %v5259_v7  ;;  %v7859_v1 = vld [vmem:[#allocation96_spill] sm:$0xff]  ;;  %v7870_v52 = vld [vmem:[#allocation106_spill] sm:$0xff] }
 0x60f   :  { %v1307_v48 = vpop.f32.mrf.mxu0  ;;  %v1327_v47 = vadd.f32 %v1319_v10, %v5249_v38  ;;  %v7865_v38 = vld [vmem:[#allocation101_spill] sm:$0xff]  ;;  %v7868_v0 = vld [vmem:[#allocation104_spill] sm:$0xff] }
 0x610   :  { %v1317_v17 = vsub.f32 %v1307_v48, %v5302_v19  ;;  %v1324_v5 = vmul.f32 0.25, %v1316_v54  ;;  %v1331_v35 = vadd.f32 %v1323_v62, %v5281_v29  ;;  %v1318_v48 = vmul.f32 0.25, %v1310_v9  ;;  %v5538_v9 = vld [vmem:[%s7047_s5 + $0x18] sm:$0xff]  ;;  %v7862_v62 = vld [vmem:[#allocation99_spill] sm:$0xff] }
 0x611   :  { %7858 = vst [vmem:[#allocation130_spill] sm:$0xff] %v5538_v9  ;;  %v7867_v29 = vld [vmem:[#allocation103_spill] sm:$0xff] }
 0x612   :  { %v1325_v2 = vmul.f32 0.25, %v1317_v17  ;;  %v1332_v59 = vadd.f32 %v1324_v5, %v5308_v6  ;;  %v1326_v60 = vadd.f32 %v1318_v48, %v5253_v36  ;;  %v5502_v5 = vld [vmem:[%s7047_s5] sm:$0xff]  ;;  %v7866_v36 = vld [vmem:[#allocation102_spill] sm:$0xff]  ;;  %v7869_v6 = vld [vmem:[#allocation105_spill] sm:$0xff] }
 0x613   :  { %7855 = vst [vmem:[#allocation127_spill] sm:$0xff] %v5502_v5  ;;  %v7873_v48 = vld [vmem:[#allocation109_spill] sm:$0xff] }
 0x614   :  { %v1333_v56 = vadd.f32 %v1325_v2, %v5302_v19  ;;  %v5526_v2 = vld [vmem:[%s7047_s5 + $0x10] sm:$0xff] }
 0x615   :  { %7857 = vst [vmem:[#allocation129_spill] sm:$0xff] %v5526_v2 }
 0x616   :  { %1358 = vmatprep.subr.mxu1 %v1333_v56 }
 0x617   :  { %1359 = vmatpush1.msra.mxu1 %v1332_v59  ;;  %v7871_v59 = vld [vmem:[#allocation107_spill] sm:$0xff] }
 0x618   :  { %1360 = vmatprep.subr.mxu1 %v1331_v35  ;;  %v7872_v35 = vld [vmem:[#allocation108_spill] sm:$0xff] }
 0x619   :  { %1361 = vmatpush1.msra.mxu1 %v1330_v58  ;;  %v7874_v58 = vld [vmem:[#allocation110_spill] sm:$0xff] }
 0x61a   :  { %1362 = vmatprep.subr.mxu1 %v1329_v57 }
 0x61b   :  { %1363 = vmatpush1.msra.mxu1 %v1328_v49  ;;  %v7875_v49 = vld [vmem:[#allocation111_spill] sm:$0xff] }
 0x61c   :  { %1364 = vmatprep.subr.mxu1 %v1327_v47  ;;  %v7876_v47 = vld [vmem:[#allocation112_spill] sm:$0xff] }
 0x61d   :  { %1365 = vmatpush1.msra.mxu1 %v1326_v60  ;;  %v7877_v60 = vld [vmem:[#allocation113_spill] sm:$0xff] }
 0x61e   :  { %3721 = vmatmul.mubr.msk.f32.vlgmr.msra.gmra.mxu1 %vm635_vm2, %v5502_v5  ;;  %1536 = vmatprep.subr.mxu1 %v5169_v43  ;;  %v7861_v43 = vld [vmem:[#allocation98_spill] sm:$0xff]  ;;  %v7882_v5 = vld [vmem:[#allocation117_spill] sm:$0xff] }
 0x61f   :  { %1537 = vmatpush1.msra.mxu1 %v5262_v23  ;;  %1404 = vmatprep.mubr.f32.mxu1 %v7649_v50 }
 0x620   :  { %1538 = vmatprep.subr.mxu1 %v5268_v46 }
 0x621   :  { %1539 = vmatpush1.msra.mxu1 %v5272_v51 }
 0x622   :  { %3722 = vmatmul.mubr.msk.f32.gmra.mxu1 %vm635_vm2, %v5514_v4  ;;  %1540 = vmatprep.subr.mxu1 %v5276_v55 }
 0x623   :  { %1541 = vmatpush1.msra.mxu1 %v5284_v3  ;;  %1410 = vmatprep.mubr.f32.mxu1 %v7649_v50 }
 0x624   :  { %1542 = vmatprep.subr.mxu1 %v5290_v33 }
 0x625   :  { %1543 = vmatpush1.msra.mxu1 %v5293_v28 }
 0x626   :  { %3723 = vmatmul.mubr.msk.f32.gmra.mxu1 %vm635_vm2, %v5526_v2  ;;  %1544 = vmatprep.subr.mxu1 %v5297_v45  ;;  %v7881_v2 = vld [vmem:[#allocation26_spill] sm:$0xff] }
 0x627   :  { %1545 = vmatpush1.msra.mxu1 %v5304_v8  ;;  %1416 = vmatprep.mubr.f32.mxu1 %v7649_v50 }
 0x628   :  { %1546 = vmatprep.subr.mxu1 %v5310_v12  ;;  %v7911_v12 = vld [vmem:[#allocation68_spill] sm:$0xff] }
 0x629   :  { %1547 = vmatpush1.msra.mxu1 %v5313_v22  ;;  %v7910_v22 = vld [vmem:[#allocation67_spill] sm:$0xff] }
 0x62a   :  { %3724 = vmatmul.mubr.msk.f32.gmra.mxu1 %vm635_vm2, %v5538_v9  ;;  %1548 = vmatprep.subr.mxu1 %v5317_v21  ;;  %v7880_v9 = vld [vmem:[#allocation116_spill] sm:$0xff]  ;;  %v7909_v21 = vld [vmem:[#allocation66_spill] sm:$0xff] }
 0x62b   :  { %1549 = vmatpush1.msra.mxu1 %v5321_v37  ;;  %v7908_v37 = vld [vmem:[#allocation65_spill] sm:$0xff] }
 0x62c   :  { %1550 = vmatprep.subr.mxu1 %v5325_v32  ;;  %v7907_v32 = vld [vmem:[#allocation64_spill] sm:$0xff] }
 0x62d   :  { %1551 = vmatpush1.msra.mxu1 %v5328_v44  ;;  %v7906_v44 = vld [vmem:[#allocation63_spill] sm:$0xff] }
 0x62e   :  { %1552 = vmatprep.subr.mxu1 %v5331_v42  ;;  %v7905_v42 = vld [vmem:[#allocation62_spill] sm:$0xff] }
 0x62f   :  { %1553 = vmatpush1.msra.mxu1 %v5334_v30  ;;  %v7904_v30 = vld [vmem:[#allocation61_spill] sm:$0xff] }
 0x630   :  { %1554 = vmatprep.subr.mxu1 %v5337_v27  ;;  %v7903_v27 = vld [vmem:[#allocation48_spill] sm:$0xff] }
 0x631   :  { %1555 = vmatpush1.msra.mxu1 %v5340_v41  ;;  %v7902_v41 = vld [vmem:[#allocation60_spill] sm:$0xff] }
 0x632   :  { %1556 = vmatprep.subr.mxu1 %v5343_v40  ;;  %v7901_v40 = vld [vmem:[#allocation59_spill] sm:$0xff] }
 0x633   :  { %1557 = vmatpush1.msra.mxu1 %v5346_v39  ;;  %v5712_v39 = vld [vmem:[#allocation2 + $0x28] sm:$0xff] }
 0x634   :  { %1558 = vmatprep.subr.mxu1 %v5349_v34  ;;  %v5709_v34 = vld [vmem:[#allocation2 + $0x30] sm:$0xff]  ;;  %7900 = vst [vmem:[#allocation132_spill] sm:$0xff] %v5712_v39 }
 0x635   :  { %1559 = vmatpush1.msra.mxu1 %v5352_v31  ;;  %v5706_v31 = vld [vmem:[#allocation2 + $0x38] sm:$0xff]  ;;  %7899 = vst [vmem:[#allocation131_spill] sm:$0xff] %v5709_v34 }
 0x636   :  { %1560 = vmatprep.subr.mxu1 %v5355_v25  ;;  %v5703_v25 = vld [vmem:[#allocation2 + $0x40] sm:$0xff]  ;;  %7898 = vst [vmem:[#allocation25_spill] sm:$0xff] %v5706_v31 }
 0x637   :  { %1561 = vmatpush1.msra.mxu1 %v5358_v24  ;;  %v5700_v24 = vld [vmem:[#allocation2 + $0x48] sm:$0xff] }
 0x638   :  { %1562 = vmatprep.subr.mxu1 %v5361_v20  ;;  %v5697_v20 = vld [vmem:[#allocation2 + $0x50] sm:$0xff] }
 0x639   :  { %1563 = vmatpush1.msra.mxu1 %v5364_v18  ;;  %v5694_v18 = vld [vmem:[#allocation2 + $0x58] sm:$0xff] }
 0x63a   :  { %1564 = vmatprep.subr.mxu1 %v5367_v16  ;;  %v5691_v16 = vld [vmem:[#allocation2 + $0x60] sm:$0xff] }
 0x63b   :  { %1565 = vmatpush1.msra.mxu1 %v5370_v15  ;;  %v5688_v15 = vld [vmem:[#allocation2 + $0x68] sm:$0xff] }
 0x63c   :  { %1566 = vmatprep.subr.mxu1 %v5373_v14  ;;  %v5685_v14 = vld [vmem:[#allocation2 + $0x70] sm:$0xff] }
 0x63d   :  { %1567 = vmatpush1.msra.mxu1 %v5376_v13  ;;  %v5682_v13 = vld [vmem:[#allocation2 + $0x78] sm:$0xff] }
 0x63e   :  { %1568 = vmatprep.subr.mxu1 %v5379_v11  ;;  %v5679_v11 = vld [vmem:[#allocation2 + $0x80] sm:$0xff] }
 0x63f   :  { %1569 = vmatpush2.msra.mxu1 %v7859_v1  ;;  %v5673_v1 = vld [vmem:[#allocation2 + $0x90] sm:$0xff] }
 0x640   :  { %1570 = vmatprep.subr.mxu1 %v7860_v63  ;;  %v5670_v63 = vld [vmem:[#allocation2 + $0x98] sm:$0xff] }
 0x641   :  { %v1489_v10 = vpop.f32.mrf.mxu0  ;;  %1571 = vmatpush2.msra.mxu1 %v7861_v43  ;;  %v5666_v43 = vld [vmem:[#allocation2 + $0xa0] sm:$0xff] }
 0x642   :  { %1572 = vmatprep.subr.mxu1 %v7862_v62  ;;  %v1512_v4 = vsub.f32 %v1489_v10, %v7881_v2  ;;  %v7890_v10 = vld [vmem:[#allocation122_spill] sm:$0xff] }
 0x643   :  { %v1491_v54 = vpop.f32.mrf.mxu0  ;;  %1573 = vmatpush2.msra.mxu1 %v7863_v26  ;;  %v5649_v26 = vld [vmem:[#allocation2 + $0xc0] sm:$0xff]  ;;  %v5653_v62 = vld [vmem:[#allocation2 + $0xb8] sm:$0xff] }
 0x644   :  { %v1513_v17 = vsub.f32 %v1491_v54, %v7864_v61  ;;  %1574 = vmatprep.subr.mxu1 %v7865_v38  ;;  %v7878_v54 = vld [vmem:[#allocation114_spill] sm:$0xff] }
 0x645   :  { %1575 = vmatpush2.msra.mxu1 %v7866_v36  ;;  %v1495_v53 = vpop.f32.mrf.mxu0  ;;  %v7894_v36 = vld [vmem:[#allocation125_spill] sm:$0xff]  ;;  %v5633_v38 = vld [vmem:[#allocation2 + $0xd8] sm:$0xff] }
 0x646   :  { %v1521_v7 = vmul.f32 0.25, %v1513_v17  ;;  %1576 = vmatprep.subr.mxu1 %v7867_v29  ;;  %v7891_v29 = vld [vmem:[#allocation123_spill] sm:$0xff] }
 0x647   :  { %1577 = vmatpush2.msra.mxu1 %v7868_v0  ;;  %v1497_v56 = vpop.f32.mrf.mxu0 }
 0x648   :  { %v5574_v19 = vadd.f32 %v1521_v7, %v7864_v61  ;;  %1578 = vmatprep.subr.mxu1 %v7869_v6  ;;  %v7879_v7 = vld [vmem:[#allocation115_spill] sm:$0xff]  ;;  %v7888_v6 = vld [vmem:[#allocation121_spill] sm:$0xff] }
 0x649   :  { %1579 = vmatpush2.msra.mxu1 %v7870_v52  ;;  %v1501_v57 = vpop.f32.mrf.mxu0 }
 0x64a   :  { %1600 = vmatprep.mubr.f32.mxu1 %v5574_v19  ;;  %1580 = vmatprep.subr.mxu1 %v7871_v59  ;;  %v7885_v59 = vld [vmem:[#allocation119_spill] sm:$0xff] }
 0x64b   :  { %1581 = vmatpush2.msra.mxu1 %v7872_v35  ;;  %v1503_v17 = vpop.f32.mrf.mxu0  ;;  %v7884_v35 = vld [vmem:[#allocation118_spill] sm:$0xff] }
 0x64c   :  { %1582 = vmatprep.subr.mxu1 %v7873_v48  ;;  %v7883_v48 = vld [vmem:[#allocation29_spill] sm:$0xff] }
 0x64d   :  { %1583 = vmatpush2.msra.mxu1 %v7874_v58  ;;  %v1515_v58 = vsub.f32 %v1497_v56, %v7883_v48  ;;  %v7892_v56 = vld [vmem:[#allocation124_spill] sm:$0xff] }
 0x64e   :  { %1584 = vmatprep.subr.mxu1 %v7875_v49  ;;  %v1507_v49 = vpop.f32.mrf.mxu0 }
 0x64f   :  { %1585 = vmatpush2.msra.mxu1 %v7876_v47  ;;  %v7886_v47 = vld [vmem:[#allocation120_spill] sm:$0xff] }
 0x650   :  { %1586 = vmatprep.subr.mxu1 %v7877_v60  ;;  %v1520_v60 = vmul.f32 0.25, %v1512_v4 }
 0x651   :  { %1587 = vmatpush2.msra.mxu1 %v7878_v54  ;;  %v7887_v54 = vld [vmem:[#allocation30_spill] sm:$0xff] }
 0x652   :  { %1588 = vmatprep.subr.mxu1 %v7879_v7  ;;  %v1514_v52 = vsub.f32 %v1495_v53, %v7887_v54  ;;  %v1523_v7 = vmul.f32 0.25, %v1515_v58 }
 0x653   :  { %1589 = vmatpush2.msra.mxu1 %v7880_v9  ;;  %v7889_v9 = vld [vmem:[#allocation31_spill] sm:$0xff] }
 0x654   :  { %1590 = vmatprep.subr.mxu1 %v7882_v5  ;;  %v1517_v0 = vsub.f32 %v1503_v17, %v7889_v9  ;;  %v1509_v5 = vpop.f32.mrf.mxu0  ;;  %v5607_v53 = vadd.f32 %v1523_v7, %v7883_v48  ;;  %v7895_v17 = vld [vmem:[#allocation33_spill] sm:$0xff]  ;;  %v5623_v7 = vld [vmem:[#allocation2 + $0xe8] sm:$0xff] }
 0x655   :  { %1591 = vmatpush2.msra.mxu1 %v7884_v35  ;;  %v5602_v35 = vadd.f32 %v1520_v60, %v7881_v2  ;;  %v7897_v60 = vld [vmem:[#allocation34_spill] sm:$0xff] }
 0x656   :  { %1592 = vmatprep.subr.mxu1 %v7885_v59  ;;  %v1522_v59 = vmul.f32 0.25, %v1514_v52  ;;  %v1525_v58 = vmul.f32 0.25, %v1517_v0  ;;  %v5616_v52 = vld [vmem:[#allocation2 + $0xf0] sm:$0xff] }
 0x657   :  { %1593 = vmatpush2.msra.mxu1 %v7886_v47  ;;  %v7893_v47 = vld [vmem:[#allocation32_spill] sm:$0xff] }
 0x658   :  { %1594 = vmatprep.subr.mxu1 %v7888_v6  ;;  %v1516_v4 = vsub.f32 %v1501_v57, %v7893_v47  ;;  %v1519_v6 = vsub.f32 %v1509_v5, %v7895_v17  ;;  %v5620_v57 = vadd.f32 %v1522_v59, %v7887_v54  ;;  %v1518_v5 = vsub.f32 %v1507_v49, %v7897_v60  ;;  %v5637_v59 = vld [vmem:[#allocation2 + $0xd0] sm:$0xff] }
 0x659   :  { %1595 = vmatpush2.msra.mxu1 %v7890_v10  ;;  %v7896_v10 = vld [vmem:[#allocation126_spill] sm:$0xff] }
 0x65a   :  { %1596 = vmatprep.subr.mxu1 %v7891_v29  ;;  %v5612_v29 = vld [vmem:[#allocation2 + $0xf8] sm:$0xff]  ;;  %v1524_v0 = vmul.f32 0.25, %v1516_v4  ;;  %v5643_v4 = vld [vmem:[#allocation2 + $0xc8] sm:$0xff] }
 0x65b   :  { %1597 = vmatpush2.msra.mxu1 %v7892_v56  ;;  %v5629_v56 = vld [vmem:[#allocation2 + $0xe0] sm:$0xff] }
 0x65c   :  { %1598 = vmatprep.subr.mxu1 %v7894_v36  ;;  %v1527_v36 = vmul.f32 0.25, %v1519_v6  ;;  %v5641_v49 = vadd.f32 %v1524_v0, %v7893_v47  ;;  %v1526_v6 = vmul.f32 0.25, %v1518_v5  ;;  %v5657_v0 = vld [vmem:[#allocation2 + $0xb0] sm:$0xff] }
 0x65d   :  { %1599 = vmatpush2.msra.mxu1 %v7896_v10  ;;  %v5627_v10 = vadd.f32 %v1525_v58, %v7889_v9 }
 0x65e   :  { %1601 = vmatmul.mubr.f32.vlgmr.msra.gmra.mxu1 %v5602_v35  ;;  %1762 = vmatprep.subr.mxu1 %v5612_v29  ;;  %v5647_v58 = vadd.f32 %v1527_v36, %v7895_v17  ;;  %v5661_v5 = vadd.f32 %v1526_v6, %v7897_v60  ;;  %v5663_v36 = vld [vmem:[#allocation2 + $0xa8] sm:$0xff] }
 0x65f   :  { %1606 = vmatprep.mubr.f32.mxu1 %v5607_v53  ;;  %1763 = vmatpush1.msra.mxu1 %v5616_v52  ;;  %v5676_v6 = vld [vmem:[#allocation2 + $0x88] sm:$0xff] }
 0x660   :  { %1764 = vmatprep.subr.mxu1 %v5623_v7 }
 0x661   :  { %1765 = vmatpush1.msra.mxu1 %v5629_v56 }
 0x662   :  { %1607 = vmatmul.mubr.f32.gmra.mxu1 %v5620_v57  ;;  %1766 = vmatprep.subr.mxu1 %v5633_v38 }
 0x663   :  { %1612 = vmatprep.mubr.f32.mxu1 %v5627_v10  ;;  %1767 = vmatpush1.msra.mxu1 %v5637_v59 }
 0x664   :  { %1768 = vmatprep.subr.mxu1 %v5643_v4 }
 0x665   :  { %1769 = vmatpush1.msra.mxu1 %v5649_v26 }
 0x666   :  { %1613 = vmatmul.mubr.f32.gmra.mxu1 %v5641_v49  ;;  %1770 = vmatprep.subr.mxu1 %v5653_v62 }
 0x667   :  { %1618 = vmatprep.mubr.f32.mxu1 %v5647_v58  ;;  %1771 = vmatpush1.msra.mxu1 %v5657_v0 }
 0x668   :  { %1772 = vmatprep.subr.mxu1 %v5663_v36 }
 0x669   :  { %1773 = vmatpush1.msra.mxu1 %v5666_v43 }
 0x66a   :  { %1619 = vmatmul.mubr.f32.gmra.mxu1 %v5661_v5  ;;  %1774 = vmatprep.subr.mxu1 %v5670_v63 }
 0x66b   :  { %1775 = vmatpush1.msra.mxu1 %v5673_v1 }
 0x66c   :  { %1776 = vmatprep.subr.mxu1 %v5676_v6 }
 0x66d   :  { %1777 = vmatpush1.msra.mxu1 %v5679_v11 }
 0x66e   :  { %1778 = vmatprep.subr.mxu1 %v5682_v13 }
 0x66f   :  { %1779 = vmatpush1.msra.mxu1 %v5685_v14 }
 0x670   :  { %1780 = vmatprep.subr.mxu1 %v5688_v15 }
 0x671   :  { %1781 = vmatpush1.msra.mxu1 %v5691_v16 }
 0x672   :  { %1782 = vmatprep.subr.mxu1 %v5694_v18 }
 0x673   :  { %1783 = vmatpush1.msra.mxu1 %v5697_v20 }
 0x674   :  { %1784 = vmatprep.subr.mxu1 %v5700_v24 }
 0x675   :  { %1785 = vmatpush1.msra.mxu1 %v5703_v25 }
 0x676   :  { %1786 = vmatprep.subr.mxu1 %v5706_v31 }
 0x677   :  { %1787 = vmatpush1.msra.mxu1 %v5709_v34 }
 0x678   :  { %1788 = vmatprep.subr.mxu1 %v5712_v39 }
 0x679   :  { %1789 = vmatpush1.msra.mxu1 %v7901_v40  ;;  %v7912_v40 = vld [vmem:[#allocation69_spill] sm:$0xff] }
 0x67a   :  { %1790 = vmatprep.subr.mxu1 %v7902_v41  ;;  %v7913_v41 = vld [vmem:[#allocation70_spill] sm:$0xff] }
 0x67b   :  { %1791 = vmatpush1.msra.mxu1 %v7903_v27  ;;  %v7914_v27 = vld [vmem:[#allocation71_spill] sm:$0xff] }
 0x67c   :  { %1792 = vmatprep.subr.mxu1 %v7904_v30  ;;  %v7915_v30 = vld [vmem:[#allocation72_spill] sm:$0xff] }
 0x67d   :  { %1793 = vmatpush1.msra.mxu1 %v7905_v42  ;;  %v7916_v42 = vld [vmem:[#allocation73_spill] sm:$0xff] }
 0x67e   :  { %1794 = vmatprep.subr.mxu1 %v7906_v44  ;;  %v7917_v44 = vld [vmem:[#allocation74_spill] sm:$0xff] }
 0x67f   :  { %1795 = vmatpush2.msra.mxu1 %v7907_v32  ;;  %v7918_v32 = vld [vmem:[#allocation75_spill] sm:$0xff] }
 0x680   :  { %1796 = vmatprep.subr.mxu1 %v7908_v37  ;;  %v7919_v37 = vld [vmem:[#allocation76_spill] sm:$0xff] }
 0x681   :  { %1797 = vmatpush2.msra.mxu1 %v7909_v21  ;;  %v7920_v21 = vld [vmem:[#allocation77_spill] sm:$0xff] }
 0x682   :  { %1798 = vmatprep.subr.mxu1 %v7910_v22  ;;  %v7921_v22 = vld [vmem:[#allocation78_spill] sm:$0xff] }
 0x683   :  { %1799 = vmatpush2.msra.mxu1 %v7911_v12  ;;  %v7922_v12 = vld [vmem:[#allocation79_spill] sm:$0xff] }
 0x684   :  { %1800 = vmatprep.subr.mxu1 %v7912_v40  ;;  %v7923_v40 = vld [vmem:[#allocation80_spill] sm:$0xff] }
 0x685   :  { %1801 = vmatpush2.msra.mxu1 %v7913_v41  ;;  %v7924_v41 = vld [vmem:[#allocation81_spill] sm:$0xff] }
 0x686   :  { %1802 = vmatprep.subr.mxu1 %v7914_v27  ;;  %v7925_v27 = vld [vmem:[#allocation82_spill] sm:$0xff] }
 0x687   :  { %1803 = vmatpush2.msra.mxu1 %v7915_v30  ;;  %v7926_v30 = vld [vmem:[#allocation83_spill] sm:$0xff] }
 0x688   :  { %1804 = vmatprep.subr.mxu1 %v7916_v42  ;;  %v7927_v42 = vld [vmem:[#allocation84_spill] sm:$0xff] }
 0x689   :  { %1805 = vmatpush2.msra.mxu1 %v7917_v44  ;;  %v7928_v44 = vld [vmem:[#allocation85_spill] sm:$0xff] }
 0x68a   :  { %1806 = vmatprep.subr.mxu1 %v7918_v32  ;;  %v7929_v32 = vld [vmem:[#allocation86_spill] sm:$0xff] }
 0x68b   :  { %1807 = vmatpush2.msra.mxu1 %v7919_v37  ;;  %v7930_v37 = vld [vmem:[#allocation11_spill] sm:$0xff] }
 0x68c   :  { %1808 = vmatprep.subr.mxu1 %v7920_v21  ;;  %v7931_v21 = vld [vmem:[#allocation12_spill] sm:$0xff] }
 0x68d   :  { %1809 = vmatpush2.msra.mxu1 %v7921_v22  ;;  %v7932_v22 = vld [vmem:[#allocation13_spill] sm:$0xff] }
 0x68e   :  { %1810 = vmatprep.subr.mxu1 %v7922_v12  ;;  %v7933_v12 = vld [vmem:[#allocation14_spill] sm:$0xff] }
 0x68f   :  { %1811 = vmatpush2.msra.mxu1 %v7923_v40  ;;  %v7934_v40 = vld [vmem:[#allocation15_spill] sm:$0xff] }
 0x690   :  { %1812 = vmatprep.subr.mxu1 %v7924_v41  ;;  %v7935_v41 = vld [vmem:[#allocation16_spill] sm:$0xff] }
 0x691   :  { %1813 = vmatpush2.msra.mxu1 %v7925_v27  ;;  %v7936_v27 = vld [vmem:[#allocation17_spill] sm:$0xff] }
 0x692   :  { %1814 = vmatprep.subr.mxu1 %v7926_v30  ;;  %v7937_v30 = vld [vmem:[#allocation18_spill] sm:$0xff] }
 0x693   :  { %1815 = vmatpush2.msra.mxu1 %v7927_v42 }
 0x694   :  { %1816 = vmatprep.subr.mxu1 %v7928_v44 }
 0x695   :  { %1817 = vmatpush2.msra.mxu1 %v7929_v32 }
 0x696   :  { %1818 = vmatprep.subr.mxu1 %v7930_v37 }
 0x697   :  { %1819 = vmatpush2.msra.mxu1 %v7931_v21 }
 0x698   :  { %1820 = vmatprep.subr.mxu1 %v7932_v22 }
 0x699   :  { %1821 = vmatpush2.msra.mxu1 %v7933_v12 }
 0x69a   :  { %1822 = vmatprep.subr.mxu1 %v7934_v40 }
 0x69b   :  { %1823 = vmatpush2.msra.mxu1 %v7935_v41 }
 0x69c   :  { %1824 = vmatprep.subr.mxu1 %v7936_v27 }
 0x69d   :  { %1825 = vmatpush2.msra.mxu1 %v7937_v30 }
 0x6de   :  { %v5752_v42 = vpop.f32.mrf.mxu1 }
 0x6e0   :  { %v5754_v44 = vpop.f32.mrf.mxu1 }
 0x6e2   :  { %v5756_v32 = vpop.f32.mrf.mxu1 }
 0x6e4   :  { %v5758_v37 = vpop.f32.mrf.mxu1 }
 0x6e6   :  { %v5760_v21 = vpop.f32.mrf.mxu1 }
 0x6e8   :  { %v5762_v22 = vpop.f32.mrf.mxu1 }
 0x6e9   :  { %7938 = vst [vmem:[#allocation59_spill] sm:$0xff] %v5762_v22 }
 0x6ea   :  { %v5764_v12 = vpop.f32.mrf.mxu1 }
 0x6eb   :  { %7939 = vst [vmem:[#allocation60_spill] sm:$0xff] %v5764_v12 }
 0x6ec   :  { %v5766_v40 = vpop.f32.mrf.mxu1 }
 0x6ed   :  { %7940 = vst [vmem:[#allocation48_spill] sm:$0xff] %v5766_v40 }
 0x71e   :  { %v1602_v41 = vpop.f32.mrf.mxu1 }
 0x71f   :  { %v1625_v48 = vsub.f32 %v1602_v41, %v5602_v35  ;;  %v5884_v41 = vld [vmem:[#allocation2 + $0x1b0] sm:$0xff] }
 0x720   :  { %v1604_v27 = vpop.f32.mrf.mxu1  ;;  %7959 = vst [vmem:[#allocation79_spill] sm:$0xff] %v5884_v41 }
 0x721   :  { %v1626_v9 = vsub.f32 %v1604_v27, %v5574_v19  ;;  %v5887_v27 = vld [vmem:[#allocation2 + $0x1a8] sm:$0xff] }
 0x722   :  { %v1608_v8 = vpop.f32.mrf.mxu1  ;;  %7960 = vst [vmem:[#allocation80_spill] sm:$0xff] %v5887_v27 }
 0x723   :  { %v1627_v17 = vsub.f32 %v1608_v8, %v5620_v57  ;;  %v1634_v2 = vmul.f32 0.25, %v1626_v9  ;;  %v5787_v9 = vld [vmem:[%s7049_s7] sm:$0xff] }
 0x724   :  { %v1610_v30 = vpop.f32.mrf.mxu1  ;;  %7941 = vst [vmem:[#allocation61_spill] sm:$0xff] %v5787_v9 }
 0x725   :  { %v1628_v23 = vsub.f32 %v1610_v30, %v5607_v53  ;;  %v1635_v22 = vmul.f32 0.25, %v1627_v17  ;;  %v5857_v17 = vld [vmem:[#allocation2 + $0x1f8] sm:$0xff] }
 0x726   :  { %v1614_v45 = vpop.f32.mrf.mxu1  ;;  %7950 = vst [vmem:[#allocation70_spill] sm:$0xff] %v5857_v17 }
 0x727   :  { %v1629_v51 = vsub.f32 %v1614_v45, %v5641_v49  ;;  %v1643_v8 = vadd.f32 %v1635_v22, %v5620_v57  ;;  %v5860_v57 = vld [vmem:[#allocation2 + $0x1f0] sm:$0xff]  ;;  %v5875_v22 = vld [vmem:[#allocation2 + $0x1c8] sm:$0xff] }
 0x728   :  { %v1616_v28 = vpop.f32.mrf.mxu1  ;;  %7951 = vst [vmem:[#allocation71_spill] sm:$0xff] %v5860_v57  ;;  %7956 = vst [vmem:[#allocation76_spill] sm:$0xff] %v5875_v22 }
 0x729   :  { %v1630_v3 = vsub.f32 %v1616_v28, %v5627_v10  ;;  %v1637_v12 = vmul.f32 0.25, %v1629_v51  ;;  %v1636_v28 = vmul.f32 0.25, %v1628_v23  ;;  %v1642_v23 = vadd.f32 %v1634_v2, %v5574_v19  ;;  %v5799_v2 = vld [vmem:[%s7049_s7 + $0x8] sm:$0xff]  ;;  %v5811_v19 = vld [vmem:[%s7049_s7 + $0x10] sm:$0xff] }
 0x72a   :  { %v1620_v33 = vpop.f32.mrf.mxu1  ;;  %7942 = vst [vmem:[#allocation62_spill] sm:$0xff] %v5799_v2  ;;  %7943 = vst [vmem:[#allocation63_spill] sm:$0xff] %v5811_v19 }
 0x72b   :  { %v1631_v55 = vsub.f32 %v1620_v33, %v5661_v5  ;;  %v1638_v40 = vmul.f32 0.25, %v1630_v3  ;;  %v1644_v3 = vadd.f32 %v1636_v28, %v5607_v53  ;;  %v5854_v53 = vld [vmem:[#allocation2] sm:$0xff] }
 0x72c   :  { %v1622_v46 = vpop.f32.mrf.mxu1  ;;  %7949 = vst [vmem:[#allocation69_spill] sm:$0xff] %v5854_v53  ;;  %v5890_v28 = vld [vmem:[#allocation2 + $0x1a0] sm:$0xff] }
 0x72d   :  { %v1632_v60 = vsub.f32 %v1622_v46, %v5647_v58  ;;  %v1639_v47 = vmul.f32 0.25, %v1631_v55  ;;  %v1646_v30 = vadd.f32 %v1638_v40, %v5627_v10  ;;  %v1633_v46 = vmul.f32 0.25, %v1625_v48  ;;  %v5842_v48 = vld [vmem:[#allocation2 + $0x20] sm:$0xff]  ;;  %v5851_v10 = vld [vmem:[#allocation2 + $0x8] sm:$0xff]  ;;  %v5881_v40 = vld [vmem:[#allocation2 + $0x1b8] sm:$0xff]  ;;  %7961 = vst [vmem:[#allocation81_spill] sm:$0xff] %v5890_v28 }
 0x72e   :  { %v1645_v55 = vadd.f32 %v1637_v12, %v5641_v49  ;;  %7945 = vst [vmem:[#allocation65_spill] sm:$0xff] %v5842_v48  ;;  %7948 = vst [vmem:[#allocation68_spill] sm:$0xff] %v5851_v10  ;;  %v5866_v49 = vld [vmem:[#allocation2 + $0x1e0] sm:$0xff] }
 0x72f   :  { %v1640_v54 = vmul.f32 0.25, %v1632_v60  ;;  %v1647_v45 = vadd.f32 %v1639_v47, %v5661_v5  ;;  %v1641_v51 = vadd.f32 %v1633_v46, %v5602_v35  ;;  %v5823_v35 = vld [vmem:[%s7049_s7 + $0x18] sm:$0xff]  ;;  %v5863_v60 = vld [vmem:[#allocation2 + $0x1e8] sm:$0xff]  ;;  %7953 = vst [vmem:[#allocation73_spill] sm:$0xff] %v5866_v49  ;;  %v5872_v5 = vld [vmem:[#allocation2 + $0x1d0] sm:$0xff] }
 0x730   :  { %7944 = vst [vmem:[#allocation64_spill] sm:$0xff] %v5823_v35  ;;  %v5845_v47 = vld [vmem:[#allocation2 + $0x18] sm:$0xff]  ;;  %7952 = vst [vmem:[#allocation72_spill] sm:$0xff] %v5863_v60  ;;  %v5878_v12 = vld [vmem:[#allocation2 + $0x1c0] sm:$0xff] }
 0x731   :  { %v1648_v33 = vadd.f32 %v1640_v54, %v5647_v58  ;;  %7946 = vst [vmem:[#allocation66_spill] sm:$0xff] %v5845_v47  ;;  %v5848_v54 = vld [vmem:[#allocation2 + $0x10] sm:$0xff]  ;;  %v5869_v58 = vld [vmem:[#allocation2 + $0x1d8] sm:$0xff]  ;;  %7955 = vst [vmem:[#allocation75_spill] sm:$0xff] %v5872_v5 }
 0x732   :  { %7947 = vst [vmem:[#allocation67_spill] sm:$0xff] %v5848_v54  ;;  %7954 = vst [vmem:[#allocation74_spill] sm:$0xff] %v5869_v58  ;;  %v5902_v46 = vld [vmem:[#allocation2 + $0x180] sm:$0xff] }
 0x733   :  { %1673 = vmatprep.subr.mxu0 %v1648_v33  ;;  %7957 = vst [vmem:[#allocation77_spill] sm:$0xff] %v5878_v12  ;;  %7958 = vst [vmem:[#allocation78_spill] sm:$0xff] %v5881_v40  ;;  %v5893_v33 = vld [vmem:[#allocation2 + $0x198] sm:$0xff] }
 0x734   :  { %1674 = vmatpush1.msra.mxu0 %v1647_v45  ;;  %7962 = vst [vmem:[#allocation82_spill] sm:$0xff] %v5893_v33  ;;  %v5896_v45 = vld [vmem:[#allocation2 + $0x190] sm:$0xff]  ;;  %7965 = vst [vmem:[#allocation85_spill] sm:$0xff] %v5902_v46 }
 0x735   :  { %1675 = vmatprep.subr.mxu0 %v1646_v30  ;;  %7963 = vst [vmem:[#allocation83_spill] sm:$0xff] %v5896_v45  ;;  %v5899_v30 = vld [vmem:[#allocation2 + $0x188] sm:$0xff] }
 0x736   :  { %1676 = vmatpush1.msra.mxu0 %v1645_v55  ;;  %7964 = vst [vmem:[#allocation84_spill] sm:$0xff] %v5899_v30  ;;  %v5905_v55 = vld [vmem:[#allocation2 + $0x178] sm:$0xff] }
 0x737   :  { %1677 = vmatprep.subr.mxu0 %v1644_v3  ;;  %7966 = vst [vmem:[#allocation86_spill] sm:$0xff] %v5905_v55  ;;  %v5908_v3 = vld [vmem:[#allocation2 + $0x170] sm:$0xff] }
 0x738   :  { %1678 = vmatpush1.msra.mxu0 %v1643_v8  ;;  %7967 = vst [vmem:[#allocation11_spill] sm:$0xff] %v5908_v3  ;;  %v5911_v8 = vld [vmem:[#allocation2 + $0x168] sm:$0xff] }
 0x739   :  { %1679 = vmatprep.subr.mxu0 %v1642_v23  ;;  %7968 = vst [vmem:[#allocation12_spill] sm:$0xff] %v5911_v8  ;;  %v5914_v23 = vld [vmem:[#allocation2 + $0x160] sm:$0xff] }
 0x73a   :  { %1680 = vmatpush1.msra.mxu0 %v1641_v51  ;;  %7969 = vst [vmem:[#allocation13_spill] sm:$0xff] %v5914_v23  ;;  %v5917_v51 = vld [vmem:[#allocation2 + $0x158] sm:$0xff] }
 0x73b   :  { %3725 = vmatmul.mubr.msk.f32.vlgmr.msra.gmra.mxu0 %vm635_vm2, %v5787_v9  ;;  %1875 = vmatprep.subr.mxu0 %v5612_v29  ;;  %7970 = vst [vmem:[#allocation14_spill] sm:$0xff] %v5917_v51  ;;  %v5929_v9 = vld [vmem:[#allocation2 + $0x138] sm:$0xff] }
 0x73c   :  { %1719 = vmatprep.mubr.f32.mxu0 %v7649_v50  ;;  %1876 = vmatpush1.msra.mxu0 %v5616_v52  ;;  %7974 = vst [vmem:[#allocation18_spill] sm:$0xff] %v5929_v9 }
 0x73d   :  { %1877 = vmatprep.subr.mxu0 %v5623_v7 }
 0x73e   :  { %1878 = vmatpush1.msra.mxu0 %v5629_v56 }
 0x73f   :  { %3726 = vmatmul.mubr.msk.f32.gmra.mxu0 %vm635_vm2, %v5799_v2  ;;  %1879 = vmatprep.subr.mxu0 %v5633_v38  ;;  %v5926_v2 = vld [vmem:[#allocation2 + $0x140] sm:$0xff] }
 0x740   :  { %1725 = vmatprep.mubr.f32.mxu0 %v7649_v50  ;;  %1880 = vmatpush1.msra.mxu0 %v5637_v59  ;;  %7973 = vst [vmem:[#allocation17_spill] sm:$0xff] %v5926_v2 }
 0x741   :  { %1881 = vmatprep.subr.mxu0 %v5643_v4 }
 0x742   :  { %1882 = vmatpush1.msra.mxu0 %v5649_v26 }
 0x743   :  { %3727 = vmatmul.mubr.msk.f32.gmra.mxu0 %vm635_vm2, %v5811_v19  ;;  %1883 = vmatprep.subr.mxu0 %v5653_v62  ;;  %v5923_v19 = vld [vmem:[#allocation2 + $0x148] sm:$0xff] }
 0x744   :  { %1731 = vmatprep.mubr.f32.mxu0 %v7649_v50  ;;  %1884 = vmatpush1.msra.mxu0 %v5657_v0  ;;  %7972 = vst [vmem:[#allocation16_spill] sm:$0xff] %v5923_v19 }
 0x745   :  { %1885 = vmatprep.subr.mxu0 %v5663_v36 }
 0x746   :  { %1886 = vmatpush1.msra.mxu0 %v5666_v43 }
 0x747   :  { %3728 = vmatmul.mubr.msk.f32.gmra.mxu0 %vm635_vm2, %v5823_v35  ;;  %1887 = vmatprep.subr.mxu0 %v5670_v63  ;;  %v5920_v35 = vld [vmem:[#allocation2 + $0x150] sm:$0xff] }
 0x748   :  { %1888 = vmatpush1.msra.mxu0 %v5673_v1  ;;  %7971 = vst [vmem:[#allocation15_spill] sm:$0xff] %v5920_v35 }
 0x749   :  { %1889 = vmatprep.subr.mxu0 %v5676_v6 }
 0x74a   :  { %1890 = vmatpush1.msra.mxu0 %v5679_v11 }
 0x74b   :  { %1891 = vmatprep.subr.mxu0 %v5682_v13 }
 0x74c   :  { %1892 = vmatpush1.msra.mxu0 %v5685_v14 }
 0x74d   :  { %1893 = vmatprep.subr.mxu0 %v5688_v15 }
 0x74e   :  { %1894 = vmatpush1.msra.mxu0 %v5691_v16 }
 0x74f   :  { %1895 = vmatprep.subr.mxu0 %v5694_v18 }
 0x750   :  { %1896 = vmatpush1.msra.mxu0 %v5697_v20 }
 0x751   :  { %1897 = vmatprep.subr.mxu0 %v5700_v24 }
 0x752   :  { %1898 = vmatpush1.msra.mxu0 %v5703_v25 }
 0x753   :  { %1899 = vmatprep.subr.mxu0 %v5706_v31 }
 0x754   :  { %1900 = vmatpush1.msra.mxu0 %v5709_v34 }
 0x755   :  { %1901 = vmatprep.subr.mxu0 %v5712_v39 }
 0x756   :  { %1902 = vmatpush1.msra.mxu0 %v5842_v48 }
 0x757   :  { %1903 = vmatprep.subr.mxu0 %v5845_v47 }
 0x758   :  { %1904 = vmatpush1.msra.mxu0 %v5848_v54 }
 0x759   :  { %1905 = vmatprep.subr.mxu0 %v5851_v10 }
 0x75a   :  { %1906 = vmatpush1.msra.mxu0 %v5854_v53 }
 0x75b   :  { %1907 = vmatprep.subr.mxu0 %v5857_v17 }
 0x75c   :  { %1908 = vmatpush2.msra.mxu0 %v5860_v57 }
 0x75d   :  { %1909 = vmatprep.subr.mxu0 %v5863_v60 }
 0x75e   :  { %1910 = vmatpush2.msra.mxu0 %v5866_v49  ;;  %v8032_v49 = vld [vmem:[#allocation87_spill] sm:$0xff] }
 0x75f   :  { %1911 = vmatprep.subr.mxu0 %v5869_v58  ;;  %v8030_v58 = vld [vmem:[#allocation54_spill] sm:$0xff] }
 0x760   :  { %1912 = vmatpush2.msra.mxu0 %v5872_v5 }
 0x761   :  { %1913 = vmatprep.subr.mxu0 %v5875_v22 }
 0x762   :  { %1914 = vmatpush2.msra.mxu0 %v5878_v12 }
 0x763   :  { %1915 = vmatprep.subr.mxu0 %v5881_v40 }
 0x764   :  { %1916 = vmatpush2.msra.mxu0 %v5884_v41 }
 0x765   :  { %1917 = vmatprep.subr.mxu0 %v5887_v27  ;;  %v7986_v27 = vld [vmem:[#allocation22_spill] sm:$0xff] }
 0x766   :  { %1918 = vmatpush2.msra.mxu0 %v5890_v28 }
 0x767   :  { %1919 = vmatprep.subr.mxu0 %v5893_v33  ;;  %v7985_v33 = vld [vmem:[#allocation21_spill] sm:$0xff] }
 0x768   :  { %1920 = vmatpush2.msra.mxu0 %v5896_v45 }
 0x769   :  { %1921 = vmatprep.subr.mxu0 %v5899_v30 }
 0x76a   :  { %1922 = vmatpush2.msra.mxu0 %v5902_v46 }
 0x76b   :  { %1923 = vmatprep.subr.mxu0 %v5905_v55 }
 0x76c   :  { %1924 = vmatpush2.msra.mxu0 %v5908_v3  ;;  %v7984_v3 = vld [vmem:[#allocation20_spill] sm:$0xff] }
 0x76d   :  { %1925 = vmatprep.subr.mxu0 %v5911_v8  ;;  %v7983_v8 = vld [vmem:[#allocation19_spill] sm:$0xff] }
 0x76e   :  { %1926 = vmatpush2.msra.mxu0 %v5914_v23  ;;  %v5932_v23 = vld [vmem:[#allocation2 + $0x130] sm:$0xff] }
 0x76f   :  { %1927 = vmatprep.subr.mxu0 %v5917_v51  ;;  %7975 = vst [vmem:[#allocation133_spill] sm:$0xff] %v5932_v23  ;;  %v5935_v51 = vld [vmem:[#allocation2 + $0x128] sm:$0xff] }
 0x770   :  { %1928 = vmatpush2.msra.mxu0 %v5920_v35  ;;  %7976 = vst [vmem:[#allocation134_spill] sm:$0xff] %v5935_v51  ;;  %v5938_v35 = vld [vmem:[#allocation2 + $0x120] sm:$0xff] }
 0x771   :  { %1929 = vmatprep.subr.mxu0 %v5923_v19  ;;  %7977 = vst [vmem:[#allocation135_spill] sm:$0xff] %v5938_v35  ;;  %v5941_v19 = vld [vmem:[#allocation2 + $0x118] sm:$0xff] }
 0x772   :  { %1930 = vmatpush2.msra.mxu0 %v5926_v2  ;;  %7978 = vst [vmem:[#allocation136_spill] sm:$0xff] %v5941_v19  ;;  %v5944_v2 = vld [vmem:[#allocation2 + $0x110] sm:$0xff] }
 0x773   :  { %1931 = vmatprep.subr.mxu0 %v5929_v9  ;;  %7979 = vst [vmem:[#allocation137_spill] sm:$0xff] %v5944_v2  ;;  %v5947_v9 = vld [vmem:[#allocation2 + $0x108] sm:$0xff] }
 0x774   :  { %1932 = vmatpush2.msra.mxu0 %v5932_v23  ;;  %7980 = vst [vmem:[#allocation138_spill] sm:$0xff] %v5947_v9  ;;  %v5950_v23 = vld [vmem:[#allocation2 + $0x100] sm:$0xff] }
 0x775   :  { %1933 = vmatprep.subr.mxu0 %v5935_v51  ;;  %7981 = vst [vmem:[#allocation139_spill] sm:$0xff] %v5950_v23  ;;  %v5953_v51 = vld [vmem:[#allocation5 + $0xf8] sm:$0xff] }
 0x776   :  { %1934 = vmatpush2.msra.mxu0 %v5938_v35  ;;  %7982 = vst [vmem:[#allocation140_spill] sm:$0xff] %v5953_v51 }
 0x777   :  { %1935 = vmatprep.subr.mxu0 %v5941_v19  ;;  %v1401_v19 = vadd.f32 %v5752_v42, %v7983_v8  ;;  %v1409_v42 = vadd.f32 %v5758_v37, %v7985_v33  ;;  %v7992_v37 = vld [vmem:[#allocation59_spill] sm:$0xff] }
 0x778   :  { %1936 = vmatpush2.msra.mxu0 %v5944_v2  ;;  %v1403_v2 = vadd.f32 %v5754_v44, %v7983_v8 }
 0x779   :  { %1937 = vmatprep.subr.mxu0 %v5947_v9 }
 0x77a   :  { %1938 = vmatpush2.msra.mxu0 %v5950_v23  ;;  %v1407_v23 = vadd.f32 %v5756_v32, %v7985_v33 }
 0x77b   :  { %2077 = vmatprep.subr.mxu0 %v5953_v51 }
 0x7fb   :  { %v1715_v35 = vpop.f32.mrf.mxu0 }
 0x7fc   :  { %v1716_v55 = vadd.f32 %v1715_v35, %v7984_v3 }
 0x7fd   :  { %v1717_v46 = vpop.f32.mrf.mxu0 }
 0x7fe   :  { %v1738_v30 = vadd.f32 %v1716_v55, %v1401_v19  ;;  %v1718_v9 = vadd.f32 %v1717_v46, %v7984_v3  ;;  %v7987_v19 = vld [vmem:[#allocation23_spill] sm:$0xff] }
 0x7ff   :  { %v1721_v45 = vpop.f32.mrf.mxu0  ;;  %v1413_v46 = vadd.f32 %v5760_v21, %v7987_v19 }
 0x800   :  { %v1739_v28 = vadd.f32 %v1718_v9, %v1403_v2  ;;  %v1722_v41 = vadd.f32 %v1721_v45, %v7986_v27  ;;  %v1746_v40 = vmul.f32 0.25, %v1738_v30  ;;  %v7989_v9 = vld [vmem:[#allocation24_spill] sm:$0xff]  ;;  %v7990_v45 = vld [vmem:[#allocation26_spill] sm:$0xff] }
 0x801   :  { %v1723_v12 = vpop.f32.mrf.mxu0 }
 0x802   :  { %v1747_v35 = vmul.f32 0.25, %v1739_v28  ;;  %v1740_v22 = vadd.f32 %v1722_v41, %v1407_v23  ;;  %v1724_v5 = vadd.f32 %v1723_v12, %v7986_v27  ;;  %v5975_v30 = vadd.f32 %v1746_v40, %v7990_v45  ;;  %v7998_v27 = vld [vmem:[#allocation30_spill] sm:$0xff] }
 0x803   :  { %v1727_v44 = vpop.f32.mrf.mxu0  ;;  %v1415_v41 = vadd.f32 %v7992_v37, %v7987_v19 }
 0x804   :  { %v5971_v55 = vadd.f32 %v1747_v35, %v7864_v61  ;;  %v1741_v32 = vadd.f32 %v1724_v5, %v1409_v42  ;;  %v1728_v2 = vadd.f32 %v1727_v44, %v7989_v9  ;;  %7991 = vst [vmem:[#allocation26_spill] sm:$0xff] %v5975_v30  ;;  %v1748_v3 = vmul.f32 0.25, %v1740_v22  ;;  %v7993_v61 = vld [vmem:[#allocation27_spill] sm:$0xff]  ;;  %v7994_v5 = vld [vmem:[#allocation60_spill] sm:$0xff]  ;;  %v7995_v35 = vld [vmem:[#allocation29_spill] sm:$0xff] }
 0x805   :  { %v1729_v8 = vpop.f32.mrf.mxu0  ;;  %v1419_v42 = vadd.f32 %v7994_v5, %v7993_v61  ;;  %v7997_v44 = vld [vmem:[#allocation28_spill] sm:$0xff]  ;;  %v8005_v5 = vld [vmem:[#allocation33_spill] sm:$0xff] }
 0x806   :  { %7988 = vst [vmem:[#allocation141_spill] sm:$0xff] %v5971_v55  ;;  %v1749_v28 = vmul.f32 0.25, %v1741_v32  ;;  %v1742_v12 = vadd.f32 %v1728_v2, %v1413_v46  ;;  %v1730_v23 = vadd.f32 %v1729_v8, %v7989_v9  ;;  %1826 = vmatprep.mubr.f32.mxu1 %v5971_v55  ;;  %v5989_v37 = vadd.f32 %v1748_v3, %v7998_v27  ;;  %v8000_v8 = vld [vmem:[#allocation48_spill] sm:$0xff] }
 0x807   :  { %v1733_v21 = vpop.f32.mrf.mxu0  ;;  %1827 = vmatmul.mubr.f32.vlgmr.msra.gmra.mxu1 %v5975_v30  ;;  %v1421_v2 = vadd.f32 %v8000_v8, %v7993_v61 }
 0x808   :  { %v5985_v40 = vadd.f32 %v1749_v28, %v7995_v35  ;;  %v1743_v22 = vadd.f32 %v1730_v23, %v1415_v41  ;;  %v1734_v45 = vadd.f32 %v1733_v21, %v7997_v44  ;;  %7999 = vst [vmem:[#allocation60_spill] sm:$0xff] %v5989_v37  ;;  %v1750_v46 = vmul.f32 0.25, %v1742_v12  ;;  %v8001_v28 = vld [vmem:[#allocation31_spill] sm:$0xff]  ;;  %v8003_v21 = vld [vmem:[#allocation32_spill] sm:$0xff]  ;;  %v8007_v35 = vld [vmem:[#allocation34_spill] sm:$0xff] }
 0x809   :  { %v1735_v32 = vpop.f32.mrf.mxu0 }
 0x80a   :  { %7996 = vst [vmem:[#allocation59_spill] sm:$0xff] %v5985_v40  ;;  %v1751_v9 = vmul.f32 0.25, %v1743_v22  ;;  %v1744_v19 = vadd.f32 %v1734_v45, %v1419_v42  ;;  %v1736_v33 = vadd.f32 %v1735_v32, %v7997_v44  ;;  %1832 = vmatprep.mubr.f32.mxu1 %v5985_v40  ;;  %v6000_v27 = vadd.f32 %v1750_v46, %v8003_v21  ;;  %v8011_v44 = vld [vmem:[#allocation37_spill] sm:$0xff] }
 0x80b   :  { %1833 = vmatmul.mubr.f32.gmra.mxu1 %v5989_v37 }
 0x80c   :  { %v5997_v41 = vadd.f32 %v1751_v9, %v8001_v28  ;;  %v1745_v23 = vadd.f32 %v1736_v33, %v1421_v2  ;;  %8004 = vst [vmem:[#allocation30_spill] sm:$0xff] %v6000_v27  ;;  %v1752_v3 = vmul.f32 0.25, %v1744_v19 }
 0x80e   :  { %8002 = vst [vmem:[#allocation29_spill] sm:$0xff] %v5997_v41  ;;  %v1753_v12 = vmul.f32 0.25, %v1745_v23  ;;  %1838 = vmatprep.mubr.f32.mxu1 %v5997_v41  ;;  %v6008_v22 = vadd.f32 %v1752_v3, %v8007_v35 }
 0x80f   :  { %1839 = vmatmul.mubr.f32.gmra.mxu1 %v6000_v27 }
 0x810   :  { %v6005_v42 = vadd.f32 %v1753_v12, %v8005_v5  ;;  %8008 = vst [vmem:[#allocation31_spill] sm:$0xff] %v6008_v22 }
 0x812   :  { %8006 = vst [vmem:[#allocation48_spill] sm:$0xff] %v6005_v42  ;;  %1844 = vmatprep.mubr.f32.mxu1 %v6005_v42 }
 0x813   :  { %1845 = vmatmul.mubr.f32.gmra.mxu1 %v6008_v22 }
 0x814   :  { %2052 = vmatprep.mubr.f32.mxu1 %v7649_v50 }
 0x8c7   :  { %v1828_v33 = vpop.f32.mrf.mxu1 }
 0x8c8   :  { %v1851_v19 = vsub.f32 %v1828_v33, %v5975_v30 }
 0x8c9   :  { %v1830_v9 = vpop.f32.mrf.mxu1 }
 0x8ca   :  { %v1852_v45 = vsub.f32 %v1830_v9, %v5971_v55  ;;  %v1859_v46 = vmul.f32 0.25, %v1851_v19 }
 0x8cb   :  { %v1834_v32 = vpop.f32.mrf.mxu1 }
 0x8cc   :  { %v1860_v8 = vmul.f32 0.25, %v1852_v45  ;;  %v1853_v2 = vsub.f32 %v1834_v32, %v5989_v37  ;;  %v6021_v3 = vadd.f32 %v1859_v46, %v5975_v30  ;;  %v8009_v32 = vld [vmem:[#allocation35_spill] sm:$0xff] }
 0x8cd   :  { %v1836_v28 = vpop.f32.mrf.mxu1 }
 0x8ce   :  { %v6017_v23 = vadd.f32 %v1860_v8, %v5971_v55  ;;  %v1854_v21 = vsub.f32 %v1836_v28, %v5985_v40  ;;  %v1861_v12 = vmul.f32 0.25, %v1853_v2  ;;  %v8010_v2 = vld [vmem:[#allocation36_spill] sm:$0xff] }
 0x8cf   :  { %v1840_v5 = vpop.f32.mrf.mxu1 }
 0x8d0   :  { %v1862_v35 = vmul.f32 0.25, %v1854_v21  ;;  %v1855_v33 = vsub.f32 %v1840_v5, %v6000_v27  ;;  %1939 = vmatprep.mubr.f32.mxu0 %v6017_v23  ;;  %v6032_v46 = vadd.f32 %v1861_v12, %v5989_v37 }
 0x8d1   :  { %v1842_v19 = vpop.f32.mrf.mxu1  ;;  %1940 = vmatmul.mubr.f32.vlgmr.msra.gmra.mxu0 %v6021_v3 }
 0x8d2   :  { %v6027_v9 = vadd.f32 %v1862_v35, %v5985_v40  ;;  %v1856_v45 = vsub.f32 %v1842_v19, %v5997_v41  ;;  %2078 = vmatpush1.msra.mxu0 %v8009_v32  ;;  %v1863_v8 = vmul.f32 0.25, %v1855_v33  ;;  %v8012_v35 = vld [vmem:[#allocation38_spill] sm:$0xff]  ;;  %v8013_v33 = vld [vmem:[#allocation39_spill] sm:$0xff] }
 0x8d3   :  { %2079 = vmatprep.subr.mxu0 %v8010_v2  ;;  %v1846_v28 = vpop.f32.mrf.mxu1  ;;  %v8014_v2 = vld [vmem:[#allocation40_spill] sm:$0xff] }
 0x8d4   :  { %v1864_v21 = vmul.f32 0.25, %v1856_v45  ;;  %v1857_v5 = vsub.f32 %v1846_v28, %v6008_v22  ;;  %2080 = vmatpush1.msra.mxu0 %v8011_v44  ;;  %1945 = vmatprep.mubr.f32.mxu0 %v6027_v9  ;;  %v6046_v45 = vadd.f32 %v1863_v8, %v6000_v27  ;;  %v8015_v28 = vld [vmem:[#allocation41_spill] sm:$0xff] }
 0x8d5   :  { %2081 = vmatprep.subr.mxu0 %v8012_v35  ;;  %v1848_v61 = vpop.f32.mrf.mxu1  ;;  %1946 = vmatmul.mubr.f32.gmra.mxu0 %v6032_v46  ;;  %v8016_v35 = vld [vmem:[#allocation42_spill] sm:$0xff] }
 0x8d6   :  { %v6041_v19 = vadd.f32 %v1864_v21, %v5997_v41  ;;  %v1858_v12 = vsub.f32 %v1848_v61, %v6005_v42  ;;  %2082 = vmatpush1.msra.mxu0 %v8013_v33  ;;  %v1865_v32 = vmul.f32 0.25, %v1857_v5  ;;  %v8017_v61 = vld [vmem:[#allocation43_spill] sm:$0xff]  ;;  %v8018_v5 = vld [vmem:[#allocation44_spill] sm:$0xff]  ;;  %v8019_v33 = vld [vmem:[#allocation45_spill] sm:$0xff] }
 0x8d7   :  { %2083 = vmatprep.subr.mxu0 %v8014_v2  ;;  %v8021_v2 = vld [vmem:[#allocation47_spill] sm:$0xff] }
 0x8d8   :  { %v1866_v44 = vmul.f32 0.25, %v1858_v12  ;;  %2084 = vmatpush1.msra.mxu0 %v8015_v28  ;;  %1951 = vmatprep.mubr.f32.mxu0 %v6041_v19  ;;  %v6058_v8 = vadd.f32 %v1865_v32, %v6008_v22  ;;  %v8020_v12 = vld [vmem:[#allocation46_spill] sm:$0xff]  ;;  %v8023_v28 = vld [vmem:[#allocation56_spill] sm:$0xff]  ;;  %v8024_v32 = vld [vmem:[#allocation57_spill] sm:$0xff] }
 0x8d9   :  { %2085 = vmatprep.subr.mxu0 %v8016_v35  ;;  %1952 = vmatmul.mubr.f32.gmra.mxu0 %v6046_v45  ;;  %v8025_v35 = vld [vmem:[#allocation50_spill] sm:$0xff] }
 0x8da   :  { %v6054_v21 = vadd.f32 %v1866_v44, %v6005_v42  ;;  %2086 = vmatpush1.msra.mxu0 %v8017_v61  ;;  %v8022_v44 = vld [vmem:[#allocation49_spill] sm:$0xff]  ;;  %v8026_v61 = vld [vmem:[#allocation51_spill] sm:$0xff] }
 0x8db   :  { %2087 = vmatprep.subr.mxu0 %v8018_v5  ;;  %v8027_v5 = vld [vmem:[#allocation58_spill] sm:$0xff] }
 0x8dc   :  { %2088 = vmatpush1.msra.mxu0 %v8019_v33  ;;  %1957 = vmatprep.mubr.f32.mxu0 %v6054_v21  ;;  %v8028_v33 = vld [vmem:[#allocation52_spill] sm:$0xff] }
 0x8dd   :  { %2089 = vmatprep.subr.mxu0 %v8020_v12  ;;  %1958 = vmatmul.mubr.f32.gmra.mxu0 %v6058_v8  ;;  %v8029_v12 = vld [vmem:[#allocation53_spill] sm:$0xff] }
 0x8de   :  { %2090 = vmatpush1.msra.mxu0 %v8021_v2  ;;  %2141 = vmatprep.mubr.f32.mxu0 %v5971_v55  ;;  %v8031_v2 = vld [vmem:[#allocation55_spill] sm:$0xff] }
 0x8df   :  { %2091 = vmatprep.subr.mxu0 %v8022_v44  ;;  %v8033_v44 = vld [vmem:[#allocation88_spill] sm:$0xff] }
 0x8e0   :  { %2092 = vmatpush1.msra.mxu0 %v8023_v28  ;;  %v8034_v28 = vld [vmem:[#allocation89_spill] sm:$0xff] }
 0x8e1   :  { %2093 = vmatprep.subr.mxu0 %v8024_v32  ;;  %v8035_v32 = vld [vmem:[#allocation90_spill] sm:$0xff] }
 0x8e2   :  { %2094 = vmatpush1.msra.mxu0 %v8025_v35  ;;  %v8036_v35 = vld [vmem:[#allocation91_spill] sm:$0xff] }
 0x8e3   :  { %2095 = vmatprep.subr.mxu0 %v8026_v61  ;;  %v8037_v61 = vld [vmem:[#allocation92_spill] sm:$0xff] }
 0x8e4   :  { %2096 = vmatpush1.msra.mxu0 %v8027_v5  ;;  %v8038_v5 = vld [vmem:[#allocation93_spill] sm:$0xff] }
 0x8e5   :  { %2097 = vmatprep.subr.mxu0 %v8028_v33  ;;  %v8039_v33 = vld [vmem:[#allocation94_spill] sm:$0xff] }
 0x8e6   :  { %2098 = vmatpush1.msra.mxu0 %v8029_v12  ;;  %v8040_v12 = vld [vmem:[#allocation95_spill] sm:$0xff] }
 0x8e7   :  { %2099 = vmatprep.subr.mxu0 %v8030_v58  ;;  %v8041_v58 = vld [vmem:[#allocation96_spill] sm:$0xff] }
 0x8e8   :  { %2100 = vmatpush1.msra.mxu0 %v8031_v2  ;;  %v8042_v2 = vld [vmem:[#allocation97_spill] sm:$0xff] }
 0x8e9   :  { %2101 = vmatprep.subr.mxu0 %v8032_v49  ;;  %v8043_v49 = vld [vmem:[#allocation98_spill] sm:$0xff] }
 0x8ea   :  { %2102 = vmatpush1.msra.mxu0 %v8033_v44  ;;  %v8044_v44 = vld [vmem:[#allocation99_spill] sm:$0xff] }
 0x8eb   :  { %2103 = vmatprep.subr.mxu0 %v8034_v28  ;;  %v8045_v28 = vld [vmem:[#allocation100_spill] sm:$0xff] }
 0x8ec   :  { %2104 = vmatpush1.msra.mxu0 %v8035_v32  ;;  %v8046_v32 = vld [vmem:[#allocation101_spill] sm:$0xff] }
 0x8ed   :  { %2105 = vmatprep.subr.mxu0 %v8036_v35  ;;  %v8047_v35 = vld [vmem:[#allocation102_spill] sm:$0xff] }
 0x8ee   :  { %2106 = vmatpush1.msra.mxu0 %v8037_v61  ;;  %v8048_v61 = vld [vmem:[#allocation103_spill] sm:$0xff] }
 0x8ef   :  { %2107 = vmatprep.subr.mxu0 %v8038_v5  ;;  %v8049_v5 = vld [vmem:[#allocation104_spill] sm:$0xff] }
 0x8f0   :  { %2108 = vmatpush1.msra.mxu0 %v8039_v33  ;;  %v8050_v33 = vld [vmem:[#allocation105_spill] sm:$0xff] }
 0x8f1   :  { %2109 = vmatprep.subr.mxu0 %v8040_v12  ;;  %v8051_v12 = vld [vmem:[#allocation106_spill] sm:$0xff] }
 0x8f2   :  { %2110 = vmatpush2.msra.mxu0 %v8041_v58  ;;  %v8052_v58 = vld [vmem:[#allocation107_spill] sm:$0xff] }
 0x8f3   :  { %2111 = vmatprep.subr.mxu0 %v8042_v2  ;;  %v8053_v2 = vld [vmem:[#allocation108_spill] sm:$0xff] }
 0x8f4   :  { %2112 = vmatpush2.msra.mxu0 %v8043_v49  ;;  %v8054_v49 = vld [vmem:[#allocation109_spill] sm:$0xff] }
 0x8f5   :  { %2113 = vmatprep.subr.mxu0 %v8044_v44  ;;  %v8055_v44 = vld [vmem:[#allocation110_spill] sm:$0xff] }
 0x8f6   :  { %2114 = vmatpush2.msra.mxu0 %v8045_v28  ;;  %v8056_v28 = vld [vmem:[#allocation111_spill] sm:$0xff] }
 0x8f7   :  { %2115 = vmatprep.subr.mxu0 %v8046_v32  ;;  %v8057_v32 = vld [vmem:[#allocation112_spill] sm:$0xff] }
 0x8f8   :  { %2116 = vmatpush2.msra.mxu0 %v8047_v35  ;;  %v8058_v35 = vld [vmem:[#allocation113_spill] sm:$0xff] }
 0x8f9   :  { %2117 = vmatprep.subr.mxu0 %v8048_v61  ;;  %v8059_v61 = vld [vmem:[#allocation114_spill] sm:$0xff] }
 0x8fa   :  { %2118 = vmatpush2.msra.mxu0 %v8049_v5  ;;  %v8060_v5 = vld [vmem:[#allocation115_spill] sm:$0xff] }
 0x8fb   :  { %2119 = vmatprep.subr.mxu0 %v8050_v33  ;;  %v8061_v33 = vld [vmem:[#allocation116_spill] sm:$0xff] }
 0x8fc   :  { %2120 = vmatpush2.msra.mxu0 %v8051_v12  ;;  %v8062_v12 = vld [vmem:[#allocation117_spill] sm:$0xff] }
 0x8fd   :  { %2121 = vmatprep.subr.mxu0 %v8052_v58  ;;  %v8063_v58 = vld [vmem:[#allocation118_spill] sm:$0xff] }
 0x8fe   :  { %2122 = vmatpush2.msra.mxu0 %v8053_v2  ;;  %v8064_v2 = vld [vmem:[#allocation119_spill] sm:$0xff] }
 0x8ff   :  { %2123 = vmatprep.subr.mxu0 %v8054_v49  ;;  %v8065_v49 = vld [vmem:[#allocation120_spill] sm:$0xff] }
 0x900   :  { %2124 = vmatpush2.msra.mxu0 %v8055_v44  ;;  %v8066_v44 = vld [vmem:[#allocation121_spill] sm:$0xff] }
 0x901   :  { %2125 = vmatprep.subr.mxu0 %v8056_v28  ;;  %v8067_v28 = vld [vmem:[#allocation122_spill] sm:$0xff] }
 0x902   :  { %2126 = vmatpush2.msra.mxu0 %v8057_v32  ;;  %v8068_v32 = vld [vmem:[#allocation123_spill] sm:$0xff] }
 0x903   :  { %2127 = vmatprep.subr.mxu0 %v8058_v35  ;;  %v8069_v35 = vld [vmem:[#allocation124_spill] sm:$0xff] }
 0x904   :  { %2128 = vmatpush2.msra.mxu0 %v8059_v61  ;;  %v8070_v61 = vld [vmem:[#allocation125_spill] sm:$0xff] }
 0x905   :  { %2129 = vmatprep.subr.mxu0 %v8060_v5  ;;  %v8071_v5 = vld [vmem:[#allocation126_spill] sm:$0xff] }
 0x906   :  { %2130 = vmatpush2.msra.mxu0 %v8061_v33 }
 0x907   :  { %2131 = vmatprep.subr.mxu0 %v8062_v12 }
 0x908   :  { %2132 = vmatpush2.msra.mxu0 %v8063_v58 }
 0x909   :  { %2133 = vmatprep.subr.mxu0 %v8064_v2 }
 0x90a   :  { %2134 = vmatpush2.msra.mxu0 %v8065_v49 }
 0x90b   :  { %2135 = vmatprep.subr.mxu0 %v8066_v44 }
 0x90c   :  { %2136 = vmatpush2.msra.mxu0 %v8067_v28 }
 0x90d   :  { %2137 = vmatprep.subr.mxu0 %v8068_v32 }
 0x90e   :  { %2138 = vmatpush2.msra.mxu0 %v8069_v35 }
 0x90f   :  { %2139 = vmatprep.subr.mxu0 %v8070_v61 }
 0x910   :  { %2140 = vmatpush2.msra.mxu0 %v8071_v5 }
 0x911   :  { %2142 = vmatmul.mubr.f32.vlgmr.msra.gmra.mxu0 %v5975_v30 }
 0x912   :  { %2147 = vmatprep.mubr.f32.mxu0 %v5985_v40 }
 0x915   :  { %2148 = vmatmul.mubr.f32.gmra.mxu0 %v5989_v37 }
 0x916   :  { %2153 = vmatprep.mubr.f32.mxu0 %v5997_v41 }
 0x919   :  { %2154 = vmatmul.mubr.f32.gmra.mxu0 %v6000_v27 }
 0x91a   :  { %2159 = vmatprep.mubr.f32.mxu0 %v6005_v42 }
 0x91d   :  { %2160 = vmatmul.mubr.f32.gmra.mxu0 %v6008_v22 }
 0x91e   :  { %2367 = vmatprep.mubr.f32.mxu0 %v7649_v50 }
 0x991   :  { %v1941_v33 = vpop.f32.mrf.mxu0 }
 0x992   :  { %v1964_v48 = vsub.f32 %v1941_v33, %v6021_v3  ;;  %v6189_v33 = vld [vmem:[#allocation5 + $0x90] sm:$0xff] }
 0x993   :  { %v1943_v12 = vpop.f32.mrf.mxu0  ;;  %8088 = vst [vmem:[#allocation44_spill] sm:$0xff] %v6189_v33 }
 0x994   :  { %v1965_v10 = vsub.f32 %v1943_v12, %v6017_v23 }
 0x995   :  { %v1947_v58 = vpop.f32.mrf.mxu0 }
 0x996   :  { %v1966_v17 = vsub.f32 %v1947_v58, %v6032_v46  ;;  %v1973_v31 = vmul.f32 0.25, %v1965_v10  ;;  %v6156_v10 = vld [vmem:[#allocation5 + $0xd8] sm:$0xff] }
 0x997   :  { %v1949_v2 = vpop.f32.mrf.mxu0  ;;  %8077 = vst [vmem:[#allocation35_spill] sm:$0xff] %v6156_v10 }
 0x998   :  { %v1967_v60 = vsub.f32 %v1949_v2, %v6027_v9  ;;  %v1974_v34 = vmul.f32 0.25, %v1966_v17  ;;  %v6163_v17 = vld [vmem:[#allocation5 + $0xc8] sm:$0xff] }
 0x999   :  { %v1953_v49 = vpop.f32.mrf.mxu0  ;;  %8079 = vst [vmem:[#allocation37_spill] sm:$0xff] %v6163_v17 }
 0x99a   :  { %v1968_v61 = vsub.f32 %v1953_v49, %v6046_v45 }
 0x99b   :  { %v1955_v44 = vpop.f32.mrf.mxu0 }
 0x99c   :  { %v1969_v32 = vsub.f32 %v1955_v44, %v6041_v19  ;;  %v1976_v39 = vmul.f32 0.25, %v1968_v61  ;;  %v1975_v44 = vmul.f32 0.25, %v1967_v60  ;;  %v1981_v60 = vadd.f32 %v1973_v31, %v6017_v23  ;;  %v6151_v31 = vld [vmem:[#allocation5 + $0xe0] sm:$0xff]  ;;  %v6198_v61 = vld [vmem:[#allocation5 + $0x78] sm:$0xff] }
 0x99d   :  { %v1959_v28 = vpop.f32.mrf.mxu0  ;;  %8075 = vst [vmem:[#allocation34_spill] sm:$0xff] %v6151_v31  ;;  %v6166_v23 = vld [vmem:[#allocation5 + $0xc0] sm:$0xff]  ;;  %8091 = vst [vmem:[#allocation47_spill] sm:$0xff] %v6198_v61 }
 0x99e   :  { %v1970_v35 = vsub.f32 %v1959_v28, %v6058_v8  ;;  %v1977_v54 = vmul.f32 0.25, %v1969_v32  ;;  %v1984_v58 = vadd.f32 %v1976_v39, %v6046_v45  ;;  %v1983_v12 = vadd.f32 %v1975_v44, %v6027_v9  ;;  %v6144_v39 = vld [vmem:[#allocation5 + $0xf0] sm:$0xff]  ;;  %8080 = vst [vmem:[#allocation38_spill] sm:$0xff] %v6166_v23  ;;  %v6171_v9 = vld [vmem:[#allocation5 + $0xb8] sm:$0xff]  ;;  %v6181_v45 = vld [vmem:[#allocation5 + $0xa0] sm:$0xff] }
 0x99f   :  { %v1961_v5 = vpop.f32.mrf.mxu0  ;;  %8073 = vst [vmem:[#allocation32_spill] sm:$0xff] %v6144_v39  ;;  %8082 = vst [vmem:[#allocation39_spill] sm:$0xff] %v6171_v9  ;;  %v6192_v32 = vld [vmem:[#allocation5 + $0x88] sm:$0xff]  ;;  %v6201_v44 = vld [vmem:[#allocation5 + $0x70] sm:$0xff] }
 0x9a0   :  { %v1971_v57 = vsub.f32 %v1961_v5, %v6054_v21  ;;  %v1978_v53 = vmul.f32 0.25, %v1970_v35  ;;  %v1985_v2 = vadd.f32 %v1977_v54, %v6041_v19  ;;  %v1972_v5 = vmul.f32 0.25, %v1964_v48  ;;  %v8072_v54 = vld [vmem:[#allocation127_spill] sm:$0xff]  ;;  %v8076_v48 = vld [vmem:[#allocation128_spill] sm:$0xff]  ;;  %8085 = vst [vmem:[#allocation42_spill] sm:$0xff] %v6181_v45  ;;  %8089 = vst [vmem:[#allocation45_spill] sm:$0xff] %v6192_v32 }
 0x9a1   :  { %v6178_v19 = vld [vmem:[#allocation5 + $0xa8] sm:$0xff]  ;;  %v6195_v35 = vld [vmem:[#allocation5 + $0x80] sm:$0xff]  ;;  %8092 = vst [vmem:[#allocation49_spill] sm:$0xff] %v6201_v44 }
 0x9a2   :  { %v1979_v47 = vmul.f32 0.25, %v1971_v57  ;;  %v1986_v49 = vadd.f32 %v1978_v53, %v6058_v8  ;;  %v1982_v57 = vadd.f32 %v1974_v34, %v6032_v46  ;;  %v6148_v34 = vld [vmem:[#allocation5 + $0xe8] sm:$0xff]  ;;  %v6159_v53 = vld [vmem:[#allocation5 + $0xd0] sm:$0xff]  ;;  %8084 = vst [vmem:[#allocation41_spill] sm:$0xff] %v6178_v19  ;;  %v6186_v8 = vld [vmem:[#allocation5 + $0x98] sm:$0xff] }
 0x9a3   :  { %8074 = vst [vmem:[#allocation33_spill] sm:$0xff] %v6148_v34  ;;  %8078 = vst [vmem:[#allocation36_spill] sm:$0xff] %v6159_v53  ;;  %v6174_v46 = vld [vmem:[#allocation5 + $0xb0] sm:$0xff] }
 0x9a4   :  { %v1987_v28 = vadd.f32 %v1979_v47, %v6054_v21  ;;  %v1980_v47 = vadd.f32 %v1972_v5, %v6021_v3  ;;  %v8081_v3 = vld [vmem:[#allocation129_spill] sm:$0xff]  ;;  %8083 = vst [vmem:[#allocation40_spill] sm:$0xff] %v6174_v46  ;;  %v8086_v21 = vld [vmem:[#allocation130_spill] sm:$0xff]  ;;  %8087 = vst [vmem:[#allocation43_spill] sm:$0xff] %v6186_v8 }
 0x9a5   :  { %8090 = vst [vmem:[#allocation46_spill] sm:$0xff] %v6195_v35  ;;  %v6213_v5 = vld [vmem:[#allocation5 + $0x50] sm:$0xff] }
 0x9a6   :  { %2012 = vmatprep.subr.mxu1 %v1987_v28  ;;  %v6204_v28 = vld [vmem:[#allocation5 + $0x68] sm:$0xff]  ;;  %8096 = vst [vmem:[#allocation51_spill] sm:$0xff] %v6213_v5 }
 0x9a7   :  { %2013 = vmatpush1.msra.mxu1 %v1986_v49  ;;  %8093 = vst [vmem:[#allocation56_spill] sm:$0xff] %v6204_v28  ;;  %v6207_v49 = vld [vmem:[#allocation5 + $0x60] sm:$0xff] }
 0x9a8   :  { %2014 = vmatprep.subr.mxu1 %v1985_v2  ;;  %8094 = vst [vmem:[#allocation57_spill] sm:$0xff] %v6207_v49  ;;  %v6210_v2 = vld [vmem:[#allocation5 + $0x58] sm:$0xff] }
 0x9a9   :  { %2015 = vmatpush1.msra.mxu1 %v1984_v58  ;;  %8095 = vst [vmem:[#allocation50_spill] sm:$0xff] %v6210_v2  ;;  %v6216_v58 = vld [vmem:[#allocation5 + $0x48] sm:$0xff] }
 0x9aa   :  { %2016 = vmatprep.subr.mxu1 %v1983_v12  ;;  %8097 = vst [vmem:[#allocation58_spill] sm:$0xff] %v6216_v58  ;;  %v6219_v12 = vld [vmem:[#allocation5 + $0x40] sm:$0xff] }
 0x9ab   :  { %2017 = vmatpush1.msra.mxu1 %v1982_v57  ;;  %8098 = vst [vmem:[#allocation52_spill] sm:$0xff] %v6219_v12  ;;  %v6222_v57 = vld [vmem:[#allocation5 + $0x38] sm:$0xff] }
 0x9ac   :  { %2018 = vmatprep.subr.mxu1 %v1981_v60  ;;  %8099 = vst [vmem:[#allocation53_spill] sm:$0xff] %v6222_v57  ;;  %v6225_v60 = vld [vmem:[#allocation5 + $0x30] sm:$0xff] }
 0x9ad   :  { %2019 = vmatpush1.msra.mxu1 %v1980_v47  ;;  %8100 = vst [vmem:[#allocation54_spill] sm:$0xff] %v6225_v60  ;;  %v6228_v47 = vld [vmem:[#allocation5 + $0x28] sm:$0xff] }
 0x9ae   :  { %3729 = vmatmul.mubr.msk.f32.vlgmr.msra.gmra.mxu1 %vm635_vm2, %v8072_v54  ;;  %2190 = vmatprep.subr.mxu1 %v5953_v51  ;;  %8101 = vst [vmem:[#allocation55_spill] sm:$0xff] %v6228_v47  ;;  %v6231_v54 = vld [vmem:[#allocation5 + $0x20] sm:$0xff] }
 0x9af   :  { %2191 = vmatpush1.msra.mxu1 %v6144_v39  ;;  %2058 = vmatprep.mubr.f32.mxu1 %v7649_v50  ;;  %8102 = vst [vmem:[#allocation87_spill] sm:$0xff] %v6231_v54 }
 0x9b0   :  { %2192 = vmatprep.subr.mxu1 %v6148_v34 }
 0x9b1   :  { %2193 = vmatpush1.msra.mxu1 %v6151_v31 }
 0x9b2   :  { %3730 = vmatmul.mubr.msk.f32.gmra.mxu1 %vm635_vm2, %v8076_v48  ;;  %2194 = vmatprep.subr.mxu1 %v6156_v10  ;;  %v6234_v48 = vld [vmem:[#allocation5 + $0x18] sm:$0xff] }
 0x9b3   :  { %2195 = vmatpush1.msra.mxu1 %v6159_v53  ;;  %2064 = vmatprep.mubr.f32.mxu1 %v7649_v50  ;;  %8103 = vst [vmem:[#allocation88_spill] sm:$0xff] %v6234_v48 }
 0x9b4   :  { %2196 = vmatprep.subr.mxu1 %v6163_v17 }
 0x9b5   :  { %2197 = vmatpush1.msra.mxu1 %v6166_v23 }
 0x9b6   :  { %3731 = vmatmul.mubr.msk.f32.gmra.mxu1 %vm635_vm2, %v8081_v3  ;;  %2198 = vmatprep.subr.mxu1 %v6171_v9  ;;  %v6237_v3 = vld [vmem:[#allocation5 + $0x10] sm:$0xff] }
 0x9b7   :  { %2199 = vmatpush1.msra.mxu1 %v6174_v46  ;;  %2070 = vmatprep.mubr.f32.mxu1 %v7649_v50  ;;  %8104 = vst [vmem:[#allocation89_spill] sm:$0xff] %v6237_v3 }
 0x9b8   :  { %2200 = vmatprep.subr.mxu1 %v6178_v19  ;;  %v8178_v19 = vld [vmem:[#allocation139_spill] sm:$0xff] }
 0x9b9   :  { %2201 = vmatpush1.msra.mxu1 %v6181_v45  ;;  %v8177_v45 = vld [vmem:[#allocation138_spill] sm:$0xff] }
 0x9ba   :  { %3732 = vmatmul.mubr.msk.f32.gmra.mxu1 %vm635_vm2, %v8086_v21  ;;  %2202 = vmatprep.subr.mxu1 %v6186_v8  ;;  %v6240_v21 = vld [vmem:[#allocation5 + $0x8] sm:$0xff]  ;;  %v8176_v8 = vld [vmem:[#allocation137_spill] sm:$0xff] }
 0x9bb   :  { %2203 = vmatpush1.msra.mxu1 %v6189_v33  ;;  %8105 = vst [vmem:[#allocation90_spill] sm:$0xff] %v6240_v21  ;;  %v8175_v33 = vld [vmem:[#allocation136_spill] sm:$0xff] }
 0x9bc   :  { %2204 = vmatprep.subr.mxu1 %v6192_v32  ;;  %v6356_v32 = vld [vmem:[#allocation5 + $0x100] sm:$0xff] }
 0x9bd   :  { %2205 = vmatpush1.msra.mxu1 %v6195_v35  ;;  %8138 = vst [vmem:[#allocation123_spill] sm:$0xff] %v6356_v32 }
 0x9be   :  { %2206 = vmatprep.subr.mxu1 %v6198_v61  ;;  %v6332_v61 = vld [vmem:[#allocation5 + $0x128] sm:$0xff] }
 0x9bf   :  { %2207 = vmatpush1.msra.mxu1 %v6201_v44  ;;  %v6325_v44 = vld [vmem:[#allocation5 + $0x138] sm:$0xff]  ;;  %8133 = vst [vmem:[#allocation118_spill] sm:$0xff] %v6332_v61 }
 0x9c0   :  { %2208 = vmatprep.subr.mxu1 %v6204_v28  ;;  %v6322_v28 = vld [vmem:[#allocation5 + $0x140] sm:$0xff]  ;;  %8131 = vst [vmem:[#allocation116_spill] sm:$0xff] %v6325_v44 }
 0x9c1   :  { %2209 = vmatpush1.msra.mxu1 %v6207_v49  ;;  %v6311_v49 = vld [vmem:[#allocation5 + $0x158] sm:$0xff]  ;;  %8130 = vst [vmem:[#allocation115_spill] sm:$0xff] %v6322_v28 }
 0x9c2   :  { %2210 = vmatprep.subr.mxu1 %v6210_v2  ;;  %v6302_v2 = vld [vmem:[#allocation5 + $0x170] sm:$0xff]  ;;  %8127 = vst [vmem:[#allocation112_spill] sm:$0xff] %v6311_v49 }
 0x9c3   :  { %2211 = vmatpush1.msra.mxu1 %v6213_v5  ;;  %v6271_v5 = vld [vmem:[#allocation5 + $0x1b8] sm:$0xff]  ;;  %8124 = vst [vmem:[#allocation109_spill] sm:$0xff] %v6302_v2 }
 0x9c4   :  { %2212 = vmatprep.subr.mxu1 %v6216_v58  ;;  %8115 = vst [vmem:[#allocation100_spill] sm:$0xff] %v6271_v5 }
 0x9c5   :  { %2213 = vmatpush1.msra.mxu1 %v6219_v12  ;;  %v6261_v12 = vld [vmem:[#allocation5 + $0x1d0] sm:$0xff] }
 0x9c6   :  { %2214 = vmatprep.subr.mxu1 %v6222_v57  ;;  %v6255_v57 = vld [vmem:[#allocation5 + $0x1e0] sm:$0xff]  ;;  %8112 = vst [vmem:[#allocation97_spill] sm:$0xff] %v6261_v12 }
 0x9c7   :  { %2215 = vmatpush1.msra.mxu1 %v6225_v60  ;;  %v6243_v60 = vld [vmem:[#allocation5] sm:$0xff]  ;;  %8110 = vst [vmem:[#allocation95_spill] sm:$0xff] %v6255_v57 }
 0x9c8   :  { %2216 = vmatprep.subr.mxu1 %v6228_v47  ;;  %8106 = vst [vmem:[#allocation91_spill] sm:$0xff] %v6243_v60  ;;  %v6246_v47 = vld [vmem:[#allocation5 + $0x1f8] sm:$0xff] }
 0x9c9   :  { %2217 = vmatpush1.msra.mxu1 %v6231_v54  ;;  %8107 = vst [vmem:[#allocation92_spill] sm:$0xff] %v6246_v47  ;;  %v6249_v54 = vld [vmem:[#allocation5 + $0x1f0] sm:$0xff] }
 0x9ca   :  { %2218 = vmatprep.subr.mxu1 %v6234_v48  ;;  %8108 = vst [vmem:[#allocation93_spill] sm:$0xff] %v6249_v54  ;;  %v6252_v48 = vld [vmem:[#allocation5 + $0x1e8] sm:$0xff] }
 0x9cb   :  { %2219 = vmatpush1.msra.mxu1 %v6237_v3  ;;  %8109 = vst [vmem:[#allocation94_spill] sm:$0xff] %v6252_v48 }
 0x9cc   :  { %2220 = vmatprep.subr.mxu1 %v6240_v21  ;;  %v6258_v21 = vld [vmem:[#allocation5 + $0x1d8] sm:$0xff] }
 0x9cd   :  { %2221 = vmatpush1.msra.mxu1 %v6243_v60  ;;  %8111 = vst [vmem:[#allocation96_spill] sm:$0xff] %v6258_v21 }
 0x9ce   :  { %2222 = vmatprep.subr.mxu1 %v6246_v47  ;;  %v6265_v47 = vld [vmem:[#allocation5 + $0x1c8] sm:$0xff] }
 0x9cf   :  { %2223 = vmatpush2.msra.mxu1 %v6249_v54  ;;  %8113 = vst [vmem:[#allocation98_spill] sm:$0xff] %v6265_v47 }
 0x9d0   :  { %2224 = vmatprep.subr.mxu1 %v6252_v48  ;;  %v6268_v48 = vld [vmem:[#allocation5 + $0x1c0] sm:$0xff] }
 0x9d1   :  { %v2143_v3 = vpop.f32.mrf.mxu0  ;;  %2225 = vmatpush2.msra.mxu1 %v6255_v57  ;;  %8114 = vst [vmem:[#allocation99_spill] sm:$0xff] %v6268_v48 }
 0x9d2   :  { %2226 = vmatprep.subr.mxu1 %v6258_v21  ;;  %v6274_v21 = vld [vmem:[#allocation5 + $0x1b0] sm:$0xff] }
 0x9d3   :  { %v2145_v60 = vpop.f32.mrf.mxu0  ;;  %2227 = vmatpush2.msra.mxu1 %v6261_v12  ;;  %8116 = vst [vmem:[#allocation101_spill] sm:$0xff] %v6274_v21  ;;  %v6280_v12 = vld [vmem:[#allocation5 + $0x1a8] sm:$0xff] }
 0x9d4   :  { %v2167_v54 = vsub.f32 %v2145_v60, %v5971_v55  ;;  %2228 = vmatprep.subr.mxu1 %v6265_v47  ;;  %8117 = vst [vmem:[#allocation102_spill] sm:$0xff] %v6280_v12  ;;  %v6283_v47 = vld [vmem:[#allocation5 + $0x1a0] sm:$0xff] }
 0x9d5   :  { %2229 = vmatpush2.msra.mxu1 %v6268_v48  ;;  %v2149_v58 = vpop.f32.mrf.mxu0  ;;  %8118 = vst [vmem:[#allocation103_spill] sm:$0xff] %v6283_v47  ;;  %v6287_v48 = vld [vmem:[#allocation5 + $0x198] sm:$0xff] }
 0x9d6   :  { %v2175_v57 = vmul.f32 0.25, %v2167_v54  ;;  %2230 = vmatprep.subr.mxu1 %v6271_v5  ;;  %8119 = vst [vmem:[#allocation104_spill] sm:$0xff] %v6287_v48  ;;  %v6290_v5 = vld [vmem:[#allocation5 + $0x190] sm:$0xff] }
 0x9d7   :  { %2231 = vmatpush2.msra.mxu1 %v6274_v21  ;;  %v2151_v54 = vpop.f32.mrf.mxu0  ;;  %8120 = vst [vmem:[#allocation105_spill] sm:$0xff] %v6290_v5  ;;  %v6299_v21 = vld [vmem:[#allocation5 + $0x178] sm:$0xff] }
 0x9d8   :  { %v6278_v60 = vadd.f32 %v2175_v57, %v5971_v55  ;;  %2232 = vmatprep.subr.mxu1 %v6280_v12  ;;  %v6293_v57 = vld [vmem:[#allocation5 + $0x188] sm:$0xff]  ;;  %v6296_v12 = vld [vmem:[#allocation5 + $0x180] sm:$0xff]  ;;  %8123 = vst [vmem:[#allocation108_spill] sm:$0xff] %v6299_v21 }
 0x9d9   :  { %2233 = vmatpush2.msra.mxu1 %v6283_v47  ;;  %8121 = vst [vmem:[#allocation106_spill] sm:$0xff] %v6293_v57  ;;  %8122 = vst [vmem:[#allocation107_spill] sm:$0xff] %v6296_v12  ;;  %v2155_v47 = vpop.f32.mrf.mxu0 }
 0x9da   :  { %2254 = vmatprep.mubr.f32.mxu1 %v6278_v60  ;;  %2234 = vmatprep.subr.mxu1 %v6287_v48  ;;  %v6305_v48 = vld [vmem:[#allocation5 + $0x168] sm:$0xff] }
 0x9db   :  { %2235 = vmatpush2.msra.mxu1 %v6290_v5  ;;  %8125 = vst [vmem:[#allocation110_spill] sm:$0xff] %v6305_v48  ;;  %v6308_v5 = vld [vmem:[#allocation5 + $0x160] sm:$0xff] }
 0x9dc   :  { %2236 = vmatprep.subr.mxu1 %v6293_v57  ;;  %8126 = vst [vmem:[#allocation111_spill] sm:$0xff] %v6308_v5  ;;  %v2157_v57 = vpop.f32.mrf.mxu0 }
 0x9dd   :  { %2237 = vmatpush2.msra.mxu1 %v6296_v12  ;;  %v6314_v12 = vld [vmem:[#allocation5 + $0x150] sm:$0xff] }
 0x9de   :  { %2238 = vmatprep.subr.mxu1 %v6299_v21  ;;  %8128 = vst [vmem:[#allocation113_spill] sm:$0xff] %v6314_v12  ;;  %v2166_v21 = vsub.f32 %v2143_v3, %v5975_v30 }
 0x9df   :  { %2239 = vmatpush2.msra.mxu1 %v6302_v2  ;;  %v6318_v2 = vld [vmem:[#allocation5 + $0x148] sm:$0xff] }
 0x9e0   :  { %2240 = vmatprep.subr.mxu1 %v6305_v48  ;;  %8129 = vst [vmem:[#allocation114_spill] sm:$0xff] %v6318_v2  ;;  %v2169_v48 = vsub.f32 %v2151_v54, %v5985_v40  ;;  %v2174_v3 = vmul.f32 0.25, %v2166_v21 }
 0x9e1   :  { %2241 = vmatpush2.msra.mxu1 %v6308_v5  ;;  %v2161_v5 = vpop.f32.mrf.mxu0 }
 0x9e2   :  { %2242 = vmatprep.subr.mxu1 %v6311_v49  ;;  %v6328_v49 = vld [vmem:[#allocation5 + $0x130] sm:$0xff]  ;;  %v2177_v54 = vmul.f32 0.25, %v2169_v48  ;;  %v2170_v48 = vsub.f32 %v2155_v47, %v6000_v27 }
 0x9e3   :  { %2243 = vmatpush2.msra.mxu1 %v6314_v12  ;;  %8132 = vst [vmem:[#allocation117_spill] sm:$0xff] %v6328_v49  ;;  %v2168_v12 = vsub.f32 %v2149_v58, %v5989_v37  ;;  %v2163_v35 = vpop.f32.mrf.mxu0  ;;  %v6346_v58 = vadd.f32 %v2174_v3, %v5975_v30 }
 0x9e4   :  { %2244 = vmatprep.subr.mxu1 %v6318_v2  ;;  %v2171_v2 = vsub.f32 %v2157_v57, %v5997_v41  ;;  %v6349_v57 = vld [vmem:[#allocation5 + $0x108] sm:$0xff]  ;;  %v2178_v47 = vmul.f32 0.25, %v2170_v48  ;;  %v8164_v48 = vld [vmem:[#allocation11_spill] sm:$0xff] }
 0x9e5   :  { %2245 = vmatpush2.msra.mxu1 %v6322_v28  ;;  %v6336_v28 = vld [vmem:[#allocation5 + $0x120] sm:$0xff]  ;;  %v2176_v21 = vmul.f32 0.25, %v2168_v12  ;;  %8137 = vst [vmem:[#allocation122_spill] sm:$0xff] %v6349_v57 }
 0x9e6   :  { %2246 = vmatprep.subr.mxu1 %v6325_v44  ;;  %8134 = vst [vmem:[#allocation119_spill] sm:$0xff] %v6336_v28  ;;  %v6339_v44 = vld [vmem:[#allocation5 + $0x118] sm:$0xff] }
 0x9e7   :  { %2247 = vmatpush2.msra.mxu1 %v6328_v49  ;;  %8135 = vst [vmem:[#allocation120_spill] sm:$0xff] %v6339_v44  ;;  %v6342_v49 = vld [vmem:[#allocation5 + $0x110] sm:$0xff]  ;;  %v6364_v12 = vadd.f32 %v2176_v21, %v5989_v37  ;;  %v8163_v21 = vld [vmem:[#allocation86_spill] sm:$0xff] }
 0x9e8   :  { %2248 = vmatprep.subr.mxu1 %v6332_v61  ;;  %8136 = vst [vmem:[#allocation121_spill] sm:$0xff] %v6342_v49  ;;  %v2179_v61 = vmul.f32 0.25, %v2171_v2  ;;  %v2172_v2 = vsub.f32 %v2161_v5, %v6008_v22  ;;  %v8161_v5 = vld [vmem:[#allocation84_spill] sm:$0xff] }
 0x9e9   :  { %2249 = vmatpush2.msra.mxu1 %v6336_v28  ;;  %v6353_v28 = vadd.f32 %v2177_v54, %v5985_v40  ;;  %v8162_v54 = vld [vmem:[#allocation85_spill] sm:$0xff] }
 0x9ea   :  { %2250 = vmatprep.subr.mxu1 %v6339_v44  ;;  %v2173_v44 = vsub.f32 %v2163_v35, %v6005_v42  ;;  %v6369_v35 = vadd.f32 %v2179_v61, %v5997_v41  ;;  %v8159_v61 = vld [vmem:[#allocation82_spill] sm:$0xff] }
 0x9eb   :  { %2251 = vmatpush2.msra.mxu1 %v6342_v49  ;;  %v8174_v49 = vld [vmem:[#allocation135_spill] sm:$0xff] }
 0x9ec   :  { %2252 = vmatprep.subr.mxu1 %v6349_v57  ;;  %v2181_v3 = vmul.f32 0.25, %v2173_v44  ;;  %v8160_v44 = vld [vmem:[#allocation83_spill] sm:$0xff]  ;;  %v8173_v57 = vld [vmem:[#allocation134_spill] sm:$0xff] }
 0x9ed   :  { %2253 = vmatpush2.msra.mxu1 %v6356_v32  ;;  %v8172_v32 = vld [vmem:[#allocation133_spill] sm:$0xff] }
 0x9ee   :  { %2255 = vmatmul.mubr.f32.vlgmr.msra.gmra.mxu1 %v6346_v58  ;;  %2416 = vmatprep.subr.mxu1 %v5612_v29  ;;  %v6377_v29 = vadd.f32 %v2178_v47, %v6000_v27  ;;  %v8165_v47 = vld [vmem:[#allocation12_spill] sm:$0xff] }
 0x9ef   :  { %2260 = vmatprep.mubr.f32.mxu1 %v6353_v28  ;;  %2417 = vmatpush1.msra.mxu1 %v5616_v52  ;;  %v2180_v52 = vmul.f32 0.25, %v2172_v2  ;;  %v8166_v2 = vld [vmem:[#allocation13_spill] sm:$0xff] }
 0x9f0   :  { %2418 = vmatprep.subr.mxu1 %v5623_v7  ;;  %v6381_v7 = vadd.f32 %v2181_v3, %v6005_v42  ;;  %v8167_v3 = vld [vmem:[#allocation14_spill] sm:$0xff] }
 0x9f1   :  { %2419 = vmatpush1.msra.mxu1 %v5629_v56  ;;  %v8153_v56 = vld [vmem:[#allocation76_spill] sm:$0xff] }
 0x9f2   :  { %2261 = vmatmul.mubr.f32.gmra.mxu1 %v6364_v12  ;;  %2420 = vmatprep.subr.mxu1 %v5633_v38  ;;  %v6389_v38 = vadd.f32 %v2180_v52, %v6008_v22  ;;  %v8168_v52 = vld [vmem:[#allocation15_spill] sm:$0xff] }
 0x9f3   :  { %2266 = vmatprep.mubr.f32.mxu1 %v6369_v35  ;;  %2421 = vmatpush1.msra.mxu1 %v5637_v59  ;;  %v8154_v59 = vld [vmem:[#allocation77_spill] sm:$0xff] }
 0x9f4   :  { %2422 = vmatprep.subr.mxu1 %v5643_v4  ;;  %v8155_v4 = vld [vmem:[#allocation78_spill] sm:$0xff] }
 0x9f5   :  { %2423 = vmatpush1.msra.mxu1 %v5649_v26  ;;  %v8152_v26 = vld [vmem:[#allocation75_spill] sm:$0xff] }
 0x9f6   :  { %2267 = vmatmul.mubr.f32.gmra.mxu1 %v6377_v29  ;;  %2424 = vmatprep.subr.mxu1 %v5653_v62  ;;  %v8151_v62 = vld [vmem:[#allocation74_spill] sm:$0xff] }
 0x9f7   :  { %2272 = vmatprep.mubr.f32.mxu1 %v6381_v7  ;;  %2425 = vmatpush1.msra.mxu1 %v5657_v0  ;;  %v8156_v0 = vld [vmem:[#allocation79_spill] sm:$0xff] }
 0x9f8   :  { %2426 = vmatprep.subr.mxu1 %v5663_v36  ;;  %v8157_v36 = vld [vmem:[#allocation80_spill] sm:$0xff] }
 0x9f9   :  { %2427 = vmatpush1.msra.mxu1 %v5666_v43  ;;  %v8150_v43 = vld [vmem:[#allocation73_spill] sm:$0xff] }
 0x9fa   :  { %2273 = vmatmul.mubr.f32.gmra.mxu1 %v6389_v38  ;;  %2428 = vmatprep.subr.mxu1 %v5670_v63  ;;  %v8140_v63 = vld [vmem:[#allocation131_spill] sm:$0xff] }
 0x9fb   :  { %2429 = vmatpush1.msra.mxu1 %v5673_v1  ;;  %v8139_v1 = vld [vmem:[#allocation25_spill] sm:$0xff] }
 0x9fc   :  { %2430 = vmatprep.subr.mxu1 %v5676_v6  ;;  %v8158_v6 = vld [vmem:[#allocation81_spill] sm:$0xff] }
 0x9fd   :  { %2431 = vmatpush1.msra.mxu1 %v5679_v11  ;;  %v8141_v11 = vld [vmem:[#allocation132_spill] sm:$0xff] }
 0x9fe   :  { %2432 = vmatprep.subr.mxu1 %v5682_v13  ;;  %v8142_v13 = vld [vmem:[#allocation65_spill] sm:$0xff] }
 0x9ff   :  { %2433 = vmatpush1.msra.mxu1 %v5685_v14  ;;  %v8143_v14 = vld [vmem:[#allocation66_spill] sm:$0xff] }
 0xa00   :  { %2434 = vmatprep.subr.mxu1 %v5688_v15  ;;  %v8144_v15 = vld [vmem:[#allocation67_spill] sm:$0xff] }
 0xa01   :  { %2435 = vmatpush1.msra.mxu1 %v5691_v16  ;;  %v8145_v16 = vld [vmem:[#allocation68_spill] sm:$0xff] }
 0xa02   :  { %2436 = vmatprep.subr.mxu1 %v5694_v18  ;;  %v8146_v18 = vld [vmem:[#allocation69_spill] sm:$0xff] }
 0xa03   :  { %2437 = vmatpush1.msra.mxu1 %v5697_v20  ;;  %v8147_v20 = vld [vmem:[#allocation70_spill] sm:$0xff] }
 0xa04   :  { %2438 = vmatprep.subr.mxu1 %v5700_v24  ;;  %v8148_v24 = vld [vmem:[#allocation71_spill] sm:$0xff] }
 0xa05   :  { %2439 = vmatpush1.msra.mxu1 %v5703_v25  ;;  %v8149_v25 = vld [vmem:[#allocation72_spill] sm:$0xff] }
 0xa06   :  { %2440 = vmatprep.subr.mxu1 %v8139_v1  ;;  %v8169_v1 = vld [vmem:[#allocation16_spill] sm:$0xff] }
 0xa07   :  { %2441 = vmatpush1.msra.mxu1 %v8140_v63  ;;  %v8170_v63 = vld [vmem:[#allocation17_spill] sm:$0xff] }
 0xa08   :  { %2442 = vmatprep.subr.mxu1 %v8141_v11  ;;  %v8171_v11 = vld [vmem:[#allocation18_spill] sm:$0xff] }
 0xa09   :  { %2443 = vmatpush1.msra.mxu1 %v8142_v13 }
 0xa0a   :  { %2444 = vmatprep.subr.mxu1 %v8143_v14 }
 0xa0b   :  { %2445 = vmatpush1.msra.mxu1 %v8144_v15 }
 0xa0c   :  { %2446 = vmatprep.subr.mxu1 %v8145_v16 }
 0xa0d   :  { %2447 = vmatpush1.msra.mxu1 %v8146_v18 }
 0xa0e   :  { %2448 = vmatprep.subr.mxu1 %v8147_v20 }
 0xa0f   :  { %2449 = vmatpush2.msra.mxu1 %v8148_v24 }
 0xa10   :  { %2450 = vmatprep.subr.mxu1 %v8149_v25 }
 0xa11   :  { %2451 = vmatpush2.msra.mxu1 %v8150_v43 }
 0xa12   :  { %2452 = vmatprep.subr.mxu1 %v8151_v62 }
 0xa13   :  { %2453 = vmatpush2.msra.mxu1 %v8152_v26 }
 0xa14   :  { %2454 = vmatprep.subr.mxu1 %v8153_v56 }
 0xa15   :  { %2455 = vmatpush2.msra.mxu1 %v8154_v59 }
 0xa16   :  { %2456 = vmatprep.subr.mxu1 %v8155_v4 }
 0xa17   :  { %2457 = vmatpush2.msra.mxu1 %v8156_v0 }
 0xa18   :  { %2458 = vmatprep.subr.mxu1 %v8157_v36 }
 0xa19   :  { %2459 = vmatpush2.msra.mxu1 %v8158_v6 }
 0xa1a   :  { %2460 = vmatprep.subr.mxu1 %v8159_v61 }
 0xa1b   :  { %2461 = vmatpush2.msra.mxu1 %v8160_v44 }
 0xa1c   :  { %2462 = vmatprep.subr.mxu1 %v8161_v5 }
 0xa1d   :  { %2463 = vmatpush2.msra.mxu1 %v8162_v54 }
 0xa1e   :  { %2464 = vmatprep.subr.mxu1 %v8163_v21 }
 0xa1f   :  { %2465 = vmatpush2.msra.mxu1 %v8164_v48 }
 0xa20   :  { %2466 = vmatprep.subr.mxu1 %v8165_v47 }
 0xa21   :  { %2467 = vmatpush2.msra.mxu1 %v8166_v2 }
 0xa22   :  { %2468 = vmatprep.subr.mxu1 %v8167_v3 }
 0xa23   :  { %2469 = vmatpush2.msra.mxu1 %v8168_v52 }
 0xa24   :  { %2470 = vmatprep.subr.mxu1 %v8169_v1 }
 0xa25   :  { %2471 = vmatpush2.msra.mxu1 %v8170_v63 }
 0xa26   :  { %2472 = vmatprep.subr.mxu1 %v8171_v11 }
 0xa27   :  { %2473 = vmatpush2.msra.mxu1 %v8172_v32 }
 0xa28   :  { %2474 = vmatprep.subr.mxu1 %v8173_v57 }
 0xa29   :  { %2475 = vmatpush2.msra.mxu1 %v8174_v49 }
 0xa2a   :  { %2476 = vmatprep.subr.mxu1 %v8175_v33 }
 0xa2b   :  { %2477 = vmatpush2.msra.mxu1 %v8176_v8 }
 0xa2c   :  { %2478 = vmatprep.subr.mxu1 %v8177_v45 }
 0xa2d   :  { %2479 = vmatpush2.msra.mxu1 %v8178_v19 }
 0xa6e   :  { %v6446_v46 = vpop.f32.mrf.mxu1 }
 0xa6f   :  { %8179 = vst [vmem:[#allocation124_spill] sm:$0xff] %v6446_v46 }
 0xa70   :  { %v6448_v9 = vpop.f32.mrf.mxu1 }
 0xa71   :  { %8180 = vst [vmem:[#allocation125_spill] sm:$0xff] %v6448_v9 }
 0xa72   :  { %v6450_v23 = vpop.f32.mrf.mxu1 }
 0xa73   :  { %8181 = vst [vmem:[#allocation126_spill] sm:$0xff] %v6450_v23 }
 0xa74   :  { %v6452_v17 = vpop.f32.mrf.mxu1 }
 0xa75   :  { %8182 = vst [vmem:[#allocation127_spill] sm:$0xff] %v6452_v17 }
 0xa76   :  { %v6454_v53 = vpop.f32.mrf.mxu1 }
 0xa77   :  { %8183 = vst [vmem:[#allocation128_spill] sm:$0xff] %v6454_v53 }
 0xa78   :  { %v6456_v10 = vpop.f32.mrf.mxu1 }
 0xa79   :  { %8184 = vst [vmem:[#allocation129_spill] sm:$0xff] %v6456_v10 }
 0xa7a   :  { %v6458_v31 = vpop.f32.mrf.mxu1 }
 0xa7b   :  { %8185 = vst [vmem:[#allocation130_spill] sm:$0xff] %v6458_v31 }
 0xa7c   :  { %v6460_v34 = vpop.f32.mrf.mxu1 }
 0xa7d   :  { %8186 = vst [vmem:[#allocation25_spill] sm:$0xff] %v6460_v34 }
 0xaae   :  { %v2256_v39 = vpop.f32.mrf.mxu1 }
 0xaaf   :  { %v2279_v19 = vsub.f32 %v2256_v39, %v6346_v58  ;;  %v8187_v39 = vld [vmem:[#allocation61_spill] sm:$0xff] }
 0xab0   :  { %v2258_v22 = vpop.f32.mrf.mxu1 }
 0xab1   :  { %v2280_v9 = vsub.f32 %v2258_v22, %v6278_v60 }
 0xab2   :  { %v2262_v42 = vpop.f32.mrf.mxu1 }
 0xab3   :  { %v2281_v34 = vsub.f32 %v2262_v42, %v6364_v12  ;;  %v2288_v33 = vmul.f32 0.25, %v2280_v9  ;;  %v4053_v9 = vld [vmem:[#allocation2 + $0xd8] sm:$0xff] }
 0xab4   :  { %v2264_v27 = vpop.f32.mrf.mxu1 }
 0xab5   :  { %v2282_v10 = vsub.f32 %v2264_v27, %v6353_v28  ;;  %v2289_v8 = vmul.f32 0.25, %v2281_v34  ;;  %v2296_v22 = vadd.f32 %v2288_v33, %v6278_v60  ;;  %v4049_v34 = vld [vmem:[#allocation2 + $0xf8] sm:$0xff]  ;;  %v4059_v60 = vld [vmem:[#allocation2 + $0xa8] sm:$0xff] }
 0xab6   :  { %v2268_v41 = vpop.f32.mrf.mxu1  ;;  %v4057_v33 = vld [vmem:[#allocation2 + $0xb8] sm:$0xff] }
 0xab7   :  { %v2283_v17 = vsub.f32 %v2268_v41, %v6377_v29  ;;  %v2297_v42 = vadd.f32 %v2289_v8, %v6364_v12  ;;  %v8189_v8 = vld [vmem:[#allocation63_spill] sm:$0xff]  ;;  %v8190_v12 = vld [vmem:[#allocation64_spill] sm:$0xff] }
 0xab8   :  { %v2270_v37 = vpop.f32.mrf.mxu1 }
 0xab9   :  { %v2284_v30 = vsub.f32 %v2270_v37, %v6369_v35  ;;  %v2291_v45 = vmul.f32 0.25, %v2283_v17  ;;  %v2290_v37 = vmul.f32 0.25, %v2282_v10  ;;  %v4051_v10 = vld [vmem:[#allocation2 + $0xe8] sm:$0xff]  ;;  %v4052_v17 = vld [vmem:[#allocation2 + $0xe0] sm:$0xff] }
 0xaba   :  { %v2274_v40 = vpop.f32.mrf.mxu1 }
 0xabb   :  { %v2285_v55 = vsub.f32 %v2274_v40, %v6389_v38  ;;  %v2292_v46 = vmul.f32 0.25, %v2284_v30  ;;  %v2298_v30 = vadd.f32 %v2290_v37, %v6353_v28  ;;  %v4058_v28 = vld [vmem:[#allocation2 + $0xb0] sm:$0xff]  ;;  %v4065_v37 = vld [vmem:[#allocation2 + $0x78] sm:$0xff] }
 0xabc   :  { %v2276_v53 = vpop.f32.mrf.mxu1 }
 0xabd   :  { %v2286_v31 = vsub.f32 %v2276_v53, %v6381_v7  ;;  %v2293_v23 = vmul.f32 0.25, %v2285_v55  ;;  %v2300_v27 = vadd.f32 %v2292_v46, %v6369_v35  ;;  %v2287_v53 = vmul.f32 0.25, %v2279_v19  ;;  %v4054_v46 = vld [vmem:[#allocation2 + $0xd0] sm:$0xff]  ;;  %v4055_v19 = vld [vmem:[#allocation2 + $0xc8] sm:$0xff]  ;;  %v4061_v35 = vld [vmem:[#allocation2 + $0x98] sm:$0xff] }
 0xabe   :  { %v2299_v55 = vadd.f32 %v2291_v45, %v6377_v29  ;;  %v4056_v45 = vld [vmem:[#allocation2 + $0xc0] sm:$0xff]  ;;  %v4062_v29 = vld [vmem:[#allocation2 + $0x90] sm:$0xff] }
 0xabf   :  { %v2294_v51 = vmul.f32 0.25, %v2286_v31  ;;  %v2301_v41 = vadd.f32 %v2293_v23, %v6389_v38  ;;  %v4050_v31 = vld [vmem:[#allocation2 + $0xf0] sm:$0xff]  ;;  %v8188_v23 = vld [vmem:[#allocation62_spill] sm:$0xff]  ;;  %v4064_v38 = vld [vmem:[#allocation2 + $0x80] sm:$0xff] }
 0xac1   :  { %v2302_v40 = vadd.f32 %v2294_v51, %v6381_v7  ;;  %v2295_v51 = vadd.f32 %v2287_v53, %v6346_v58  ;;  %v4060_v58 = vld [vmem:[#allocation2 + $0xa0] sm:$0xff]  ;;  %v4063_v7 = vld [vmem:[#allocation2 + $0x88] sm:$0xff]  ;;  %v4069_v53 = vld [vmem:[#allocation2 + $0x58] sm:$0xff] }
 0xac3   :  { %2327 = vmatprep.subr.mxu0 %v2302_v40  ;;  %v4066_v40 = vld [vmem:[#allocation2 + $0x70] sm:$0xff] }
 0xac4   :  { %2328 = vmatpush1.msra.mxu0 %v2301_v41  ;;  %v4067_v41 = vld [vmem:[#allocation2 + $0x68] sm:$0xff] }
 0xac5   :  { %2329 = vmatprep.subr.mxu0 %v2300_v27  ;;  %v4068_v27 = vld [vmem:[#allocation2 + $0x60] sm:$0xff] }
 0xac6   :  { %2330 = vmatpush1.msra.mxu0 %v2299_v55  ;;  %v4070_v55 = vld [vmem:[#allocation2 + $0x50] sm:$0xff] }
 0xac7   :  { %2331 = vmatprep.subr.mxu0 %v2298_v30  ;;  %v4071_v30 = vld [vmem:[#allocation2 + $0x48] sm:$0xff] }
 0xac8   :  { %2332 = vmatpush1.msra.mxu0 %v2297_v42  ;;  %v4072_v42 = vld [vmem:[#allocation2 + $0x40] sm:$0xff] }
 0xac9   :  { %2333 = vmatprep.subr.mxu0 %v2296_v22  ;;  %v4073_v22 = vld [vmem:[#allocation2 + $0x38] sm:$0xff] }
 0xaca   :  { %2334 = vmatpush1.msra.mxu0 %v2295_v51  ;;  %v4074_v51 = vld [vmem:[#allocation2 + $0x30] sm:$0xff] }
 0xacb   :  { %3733 = vmatmul.mubr.msk.f32.vlgmr.msra.gmra.mxu0 %vm635_vm2, %v8187_v39  ;;  %2529 = vmatprep.subr.mxu0 %v4049_v34  ;;  %v4075_v39 = vld [vmem:[#allocation2 + $0x28] sm:$0xff] }
 0xacc   :  { %2373 = vmatprep.mubr.f32.mxu0 %v7649_v50  ;;  %2530 = vmatpush1.msra.mxu0 %v4050_v31  ;;  %v8206_v31 = vld [vmem:[#allocation141_spill] sm:$0xff] }
 0xacd   :  { %2531 = vmatprep.subr.mxu0 %v4051_v10 }
 0xace   :  { %2532 = vmatpush1.msra.mxu0 %v4052_v17 }
 0xacf   :  { %3734 = vmatmul.mubr.msk.f32.gmra.mxu0 %vm635_vm2, %v8188_v23  ;;  %2533 = vmatprep.subr.mxu0 %v4053_v9  ;;  %v8208_v23 = vld [vmem:[#allocation24_spill] sm:$0xff] }
 0xad0   :  { %2379 = vmatprep.mubr.f32.mxu0 %v7649_v50  ;;  %2534 = vmatpush1.msra.mxu0 %v4054_v46  ;;  %v8209_v46 = vld [vmem:[#allocation26_spill] sm:$0xff] }
 0xad1   :  { %2535 = vmatprep.subr.mxu0 %v4055_v19 }
 0xad2   :  { %2536 = vmatpush1.msra.mxu0 %v4056_v45 }
 0xad3   :  { %3735 = vmatmul.mubr.msk.f32.gmra.mxu0 %vm635_vm2, %v8189_v8  ;;  %2537 = vmatprep.subr.mxu0 %v4057_v33  ;;  %v8211_v33 = vld [vmem:[#allocation129_spill] sm:$0xff] }
 0xad4   :  { %2385 = vmatprep.mubr.f32.mxu0 %v7649_v50  ;;  %2538 = vmatpush1.msra.mxu0 %v4058_v28 }
 0xad5   :  { %2539 = vmatprep.subr.mxu0 %v4059_v60 }
 0xad6   :  { %2540 = vmatpush1.msra.mxu0 %v4060_v58 }
 0xad7   :  { %3736 = vmatmul.mubr.msk.f32.gmra.mxu0 %vm635_vm2, %v8190_v12  ;;  %2541 = vmatprep.subr.mxu0 %v4061_v35 }
 0xad8   :  { %2542 = vmatpush1.msra.mxu0 %v4062_v29  ;;  %v8212_v29 = vld [vmem:[#allocation27_spill] sm:$0xff] }
 0xad9   :  { %2543 = vmatprep.subr.mxu0 %v4063_v7  ;;  %v8213_v7 = vld [vmem:[#allocation130_spill] sm:$0xff] }
 0xada   :  { %2544 = vmatpush1.msra.mxu0 %v4064_v38  ;;  %v2073_v38 = vadd.f32 %v8213_v7, %v8212_v29  ;;  %v8231_v7 = vld [vmem:[#allocation35_spill] sm:$0xff] }
 0xadb   :  { %2545 = vmatprep.subr.mxu0 %v4065_v37  ;;  %v8214_v37 = vld [vmem:[#allocation59_spill] sm:$0xff] }
 0xadc   :  { %2546 = vmatpush1.msra.mxu0 %v4066_v40 }
 0xadd   :  { %2547 = vmatprep.subr.mxu0 %v4067_v41 }
 0xade   :  { %2548 = vmatpush1.msra.mxu0 %v4068_v27  ;;  %v8216_v27 = vld [vmem:[#allocation28_spill] sm:$0xff] }
 0xadf   :  { %2549 = vmatprep.subr.mxu0 %v4069_v53 }
 0xae0   :  { %2550 = vmatpush1.msra.mxu0 %v4070_v55  ;;  %v8217_v55 = vld [vmem:[#allocation60_spill] sm:$0xff] }
 0xae1   :  { %2551 = vmatprep.subr.mxu0 %v4071_v30 }
 0xae2   :  { %2552 = vmatpush1.msra.mxu0 %v4072_v42 }
 0xae3   :  { %2553 = vmatprep.subr.mxu0 %v4073_v22 }
 0xae4   :  { %2554 = vmatpush1.msra.mxu0 %v4074_v51  ;;  %v8219_v51 = vld [vmem:[#allocation25_spill] sm:$0xff] }
 0xae5   :  { %2555 = vmatprep.subr.mxu0 %v4075_v39  ;;  %v2075_v39 = vadd.f32 %v8219_v51, %v8212_v29  ;;  %v8268_v29 = vld [vmem:[#allocation101_spill] sm:$0xff] }
 0xae6   :  { %2556 = vmatpush1.msra.mxu0 %v8142_v13  ;;  %v8191_v13 = vld [vmem:[#allocation136_spill] sm:$0xff] }
 0xae7   :  { %2557 = vmatprep.subr.mxu0 %v8143_v14  ;;  %v8192_v14 = vld [vmem:[#allocation137_spill] sm:$0xff] }
 0xae8   :  { %2558 = vmatpush1.msra.mxu0 %v8144_v15  ;;  %v8193_v15 = vld [vmem:[#allocation138_spill] sm:$0xff] }
 0xae9   :  { %2559 = vmatprep.subr.mxu0 %v8145_v16  ;;  %v8194_v16 = vld [vmem:[#allocation139_spill] sm:$0xff] }
 0xaea   :  { %2560 = vmatpush1.msra.mxu0 %v8146_v18  ;;  %v8195_v18 = vld [vmem:[#allocation140_spill] sm:$0xff] }
 0xaeb   :  { %2561 = vmatprep.subr.mxu0 %v8147_v20 }
 0xaec   :  { %2562 = vmatpush2.msra.mxu0 %v8148_v24  ;;  %v8196_v24 = vld [vmem:[#allocation19_spill] sm:$0xff] }
 0xaed   :  { %2563 = vmatprep.subr.mxu0 %v8149_v25  ;;  %v8197_v25 = vld [vmem:[#allocation124_spill] sm:$0xff] }
 0xaee   :  { %2564 = vmatpush2.msra.mxu0 %v8150_v43  ;;  %v2055_v43 = vadd.f32 %v8197_v25, %v8196_v24  ;;  %v8222_v25 = vld [vmem:[#allocation30_spill] sm:$0xff] }
 0xaef   :  { %2565 = vmatprep.subr.mxu0 %v8151_v62  ;;  %v8198_v62 = vld [vmem:[#allocation20_spill] sm:$0xff] }
 0xaf0   :  { %2566 = vmatpush2.msra.mxu0 %v8152_v26 }
 0xaf1   :  { %2567 = vmatprep.subr.mxu0 %v8153_v56 }
 0xaf2   :  { %2568 = vmatpush2.msra.mxu0 %v8154_v59 }
 0xaf3   :  { %2569 = vmatprep.subr.mxu0 %v8155_v4 }
 0xaf4   :  { %2570 = vmatpush2.msra.mxu0 %v8156_v0  ;;  %v8200_v0 = vld [vmem:[#allocation21_spill] sm:$0xff] }
 0xaf5   :  { %2571 = vmatprep.subr.mxu0 %v8157_v36  ;;  %v8201_v36 = vld [vmem:[#allocation126_spill] sm:$0xff] }
 0xaf6   :  { %2572 = vmatpush2.msra.mxu0 %v8158_v6  ;;  %v2061_v6 = vadd.f32 %v8201_v36, %v8200_v0 }
 0xaf7   :  { %2573 = vmatprep.subr.mxu0 %v8159_v61 }
 0xaf8   :  { %2574 = vmatpush2.msra.mxu0 %v8160_v44  ;;  %v8202_v44 = vld [vmem:[#allocation22_spill] sm:$0xff] }
 0xaf9   :  { %2575 = vmatprep.subr.mxu0 %v8161_v5 }
 0xafa   :  { %2576 = vmatpush2.msra.mxu0 %v8162_v54 }
 0xafb   :  { %2577 = vmatprep.subr.mxu0 %v8163_v21 }
 0xafc   :  { %2578 = vmatpush2.msra.mxu0 %v8164_v48  ;;  %v8203_v48 = vld [vmem:[#allocation127_spill] sm:$0xff] }
 0xafd   :  { %2579 = vmatprep.subr.mxu0 %v8165_v47  ;;  %v2063_v47 = vadd.f32 %v8203_v48, %v8200_v0  ;;  %v8272_v0 = vld [vmem:[#allocation105_spill] sm:$0xff] }
 0xafe   :  { %2580 = vmatpush2.msra.mxu0 %v8166_v2 }
 0xaff   :  { %2581 = vmatprep.subr.mxu0 %v8167_v3 }
 0xb00   :  { %2582 = vmatpush2.msra.mxu0 %v8168_v52 }
 0xb01   :  { %2583 = vmatprep.subr.mxu0 %v8169_v1 }
 0xb02   :  { %2584 = vmatpush2.msra.mxu0 %v8170_v63  ;;  %v8204_v63 = vld [vmem:[#allocation23_spill] sm:$0xff] }
 0xb03   :  { %2585 = vmatprep.subr.mxu0 %v8171_v11  ;;  %v8205_v11 = vld [vmem:[#allocation128_spill] sm:$0xff]  ;;  %v2069_v28 = vadd.f32 %v8211_v33, %v8204_v63 }
 0xb04   :  { %2586 = vmatpush2.msra.mxu0 %v8172_v32  ;;  %v2067_v34 = vadd.f32 %v8205_v11, %v8204_v63  ;;  %v8270_v63 = vld [vmem:[#allocation103_spill] sm:$0xff] }
 0xb05   :  { %2587 = vmatprep.subr.mxu0 %v8173_v57  ;;  %v8199_v57 = vld [vmem:[#allocation125_spill] sm:$0xff] }
 0xb06   :  { %2588 = vmatpush2.msra.mxu0 %v8174_v49  ;;  %v2057_v49 = vadd.f32 %v8199_v57, %v8196_v24  ;;  %v8224_v57 = vld [vmem:[#allocation48_spill] sm:$0xff]  ;;  %v8273_v24 = vld [vmem:[#allocation106_spill] sm:$0xff] }
 0xb07   :  { %2589 = vmatprep.subr.mxu0 %v8191_v13 }
 0xb08   :  { %2590 = vmatpush2.msra.mxu0 %v8192_v14 }
 0xb09   :  { %2591 = vmatprep.subr.mxu0 %v8193_v15 }
 0xb0a   :  { %2592 = vmatpush2.msra.mxu0 %v8194_v16  ;;  %v8220_v16 = vld [vmem:[#allocation29_spill] sm:$0xff] }
 0xb0b   :  { %2731 = vmatprep.subr.mxu0 %v8195_v18 }
 0xb8b   :  { %v2369_v20 = vpop.f32.mrf.mxu0 }
 0xb8c   :  { %v2370_v32 = vadd.f32 %v2369_v20, %v8198_v62 }
 0xb8d   :  { %v2371_v26 = vpop.f32.mrf.mxu0 }
 0xb8e   :  { %v2392_v56 = vadd.f32 %v2370_v32, %v2055_v43  ;;  %v2372_v59 = vadd.f32 %v2371_v26, %v8198_v62  ;;  %v8274_v62 = vld [vmem:[#allocation107_spill] sm:$0xff] }
 0xb8f   :  { %v2375_v4 = vpop.f32.mrf.mxu0 }
 0xb90   :  { %v2393_v61 = vadd.f32 %v2372_v59, %v2057_v49  ;;  %v2376_v5 = vadd.f32 %v2375_v4, %v8202_v44  ;;  %v2400_v54 = vmul.f32 0.25, %v2392_v56  ;;  %v8226_v56 = vld [vmem:[#allocation31_spill] sm:$0xff] }
 0xb91   :  { %v2377_v21 = vpop.f32.mrf.mxu0 }
 0xb92   :  { %v2401_v2 = vmul.f32 0.25, %v2393_v61  ;;  %v2394_v3 = vadd.f32 %v2376_v5, %v2061_v6  ;;  %v2378_v52 = vadd.f32 %v2377_v21, %v8202_v44  ;;  %v6546_v19 = vadd.f32 %v2400_v54, %v8209_v46  ;;  %v8271_v44 = vld [vmem:[#allocation104_spill] sm:$0xff] }
 0xb93   :  { %v2381_v1 = vpop.f32.mrf.mxu0 }
 0xb94   :  { %v6542_v10 = vadd.f32 %v2401_v2, %v8206_v31  ;;  %v2395_v17 = vadd.f32 %v2378_v52, %v2063_v47  ;;  %v2382_v9 = vadd.f32 %v2381_v1, %v8208_v23  ;;  %8210 = vst [vmem:[#allocation132_spill] sm:$0xff] %v6546_v19  ;;  %v2402_v45 = vmul.f32 0.25, %v2394_v3 }
 0xb95   :  { %v2383_v8 = vpop.f32.mrf.mxu0 }
 0xb96   :  { %8207 = vst [vmem:[#allocation131_spill] sm:$0xff] %v6542_v10  ;;  %v2403_v60 = vmul.f32 0.25, %v2395_v17  ;;  %v2396_v58 = vadd.f32 %v2382_v9, %v2067_v34  ;;  %v2384_v12 = vadd.f32 %v2383_v8, %v8208_v23  ;;  %2480 = vmatprep.mubr.f32.mxu1 %v6542_v10  ;;  %v6560_v30 = vadd.f32 %v2402_v45, %v8217_v55  ;;  %v8228_v45 = vld [vmem:[#allocation32_spill] sm:$0xff]  ;;  %v8269_v23 = vld [vmem:[#allocation102_spill] sm:$0xff] }
 0xb97   :  { %v2387_v35 = vpop.f32.mrf.mxu0  ;;  %2481 = vmatmul.mubr.f32.vlgmr.msra.gmra.mxu1 %v6546_v19 }
 0xb98   :  { %v6556_v40 = vadd.f32 %v2403_v60, %v8214_v37  ;;  %v2397_v41 = vadd.f32 %v2384_v12, %v2069_v28  ;;  %v2388_v53 = vadd.f32 %v2387_v35, %v8216_v27  ;;  %8218 = vst [vmem:[#allocation66_spill] sm:$0xff] %v6560_v30  ;;  %v2404_v42 = vmul.f32 0.25, %v2396_v58  ;;  %v8229_v28 = vld [vmem:[#allocation33_spill] sm:$0xff]  ;;  %v8230_v35 = vld [vmem:[#allocation34_spill] sm:$0xff] }
 0xb99   :  { %v2389_v22 = vpop.f32.mrf.mxu0 }
 0xb9a   :  { %8215 = vst [vmem:[#allocation65_spill] sm:$0xff] %v6556_v40  ;;  %v2405_v13 = vmul.f32 0.25, %v2397_v41  ;;  %v2398_v14 = vadd.f32 %v2388_v53, %v2073_v38  ;;  %v2390_v15 = vadd.f32 %v2389_v22, %v8216_v27  ;;  %2486 = vmatprep.mubr.f32.mxu1 %v6556_v40  ;;  %v6571_v43 = vadd.f32 %v2404_v42, %v8222_v25  ;;  %v8232_v53 = vld [vmem:[#allocation36_spill] sm:$0xff]  ;;  %v8233_v22 = vld [vmem:[#allocation37_spill] sm:$0xff]  ;;  %v8238_v25 = vld [vmem:[#allocation42_spill] sm:$0xff] }
 0xb9b   :  { %2487 = vmatmul.mubr.f32.gmra.mxu1 %v6560_v30  ;;  %v8267_v27 = vld [vmem:[#allocation100_spill] sm:$0xff] }
 0xb9c   :  { %v6568_v18 = vadd.f32 %v2405_v13, %v8220_v16  ;;  %v2399_v20 = vadd.f32 %v2390_v15, %v2075_v39  ;;  %8223 = vst [vmem:[#allocation68_spill] sm:$0xff] %v6571_v43  ;;  %v2406_v32 = vmul.f32 0.25, %v2398_v14  ;;  %v8234_v39 = vld [vmem:[#allocation38_spill] sm:$0xff]  ;;  %v8235_v13 = vld [vmem:[#allocation39_spill] sm:$0xff]  ;;  %v8236_v15 = vld [vmem:[#allocation40_spill] sm:$0xff] }
 0xb9e   :  { %8221 = vst [vmem:[#allocation67_spill] sm:$0xff] %v6568_v18  ;;  %v2407_v26 = vmul.f32 0.25, %v2399_v20  ;;  %2492 = vmatprep.mubr.f32.mxu1 %v6568_v18  ;;  %v6579_v59 = vadd.f32 %v2406_v32, %v8226_v56  ;;  %v8237_v20 = vld [vmem:[#allocation41_spill] sm:$0xff]  ;;  %v8239_v32 = vld [vmem:[#allocation43_spill] sm:$0xff]  ;;  %v8242_v56 = vld [vmem:[#allocation46_spill] sm:$0xff] }
 0xb9f   :  { %2493 = vmatmul.mubr.f32.gmra.mxu1 %v6571_v43 }
 0xba0   :  { %v6576_v49 = vadd.f32 %v2407_v26, %v8224_v57  ;;  %8227 = vst [vmem:[#allocation70_spill] sm:$0xff] %v6579_v59  ;;  %v8240_v26 = vld [vmem:[#allocation44_spill] sm:$0xff]  ;;  %v8241_v57 = vld [vmem:[#allocation45_spill] sm:$0xff] }
 0xba2   :  { %8225 = vst [vmem:[#allocation69_spill] sm:$0xff] %v6576_v49  ;;  %2498 = vmatprep.mubr.f32.mxu1 %v6576_v49 }
 0xba3   :  { %2499 = vmatmul.mubr.f32.gmra.mxu1 %v6579_v59 }
 0xba4   :  { %2706 = vmatprep.mubr.f32.mxu1 %v7649_v50 }
 0xc57   :  { %v2482_v4 = vpop.f32.mrf.mxu1 }
 0xc58   :  { %v2505_v36 = vsub.f32 %v2482_v4, %v6546_v19  ;;  %v8243_v4 = vld [vmem:[#allocation47_spill] sm:$0xff] }
 0xc59   :  { %v2484_v6 = vpop.f32.mrf.mxu1 }
 0xc5a   :  { %v2506_v61 = vsub.f32 %v2484_v6, %v6542_v10  ;;  %v2513_v5 = vmul.f32 0.25, %v2505_v36  ;;  %v8244_v36 = vld [vmem:[#allocation49_spill] sm:$0xff]  ;;  %v8245_v6 = vld [vmem:[#allocation56_spill] sm:$0xff] }
 0xc5b   :  { %v2488_v54 = vpop.f32.mrf.mxu1 }
 0xc5c   :  { %v2514_v21 = vmul.f32 0.25, %v2506_v61  ;;  %v2507_v48 = vsub.f32 %v2488_v54, %v6560_v30  ;;  %v6592_v52 = vadd.f32 %v2513_v5, %v6546_v19  ;;  %v8246_v61 = vld [vmem:[#allocation57_spill] sm:$0xff]  ;;  %v8247_v5 = vld [vmem:[#allocation50_spill] sm:$0xff]  ;;  %v8248_v54 = vld [vmem:[#allocation51_spill] sm:$0xff] }
 0xc5d   :  { %v2490_v47 = vpop.f32.mrf.mxu1 }
 0xc5e   :  { %v6588_v2 = vadd.f32 %v2514_v21, %v6542_v10  ;;  %v2508_v3 = vsub.f32 %v2490_v47, %v6556_v40  ;;  %v2515_v1 = vmul.f32 0.25, %v2507_v48  ;;  %v8249_v21 = vld [vmem:[#allocation58_spill] sm:$0xff]  ;;  %v8250_v48 = vld [vmem:[#allocation52_spill] sm:$0xff]  ;;  %v8251_v47 = vld [vmem:[#allocation53_spill] sm:$0xff] }
 0xc5f   :  { %v2494_v11 = vpop.f32.mrf.mxu1 }
 0xc60   :  { %v2516_v34 = vmul.f32 0.25, %v2508_v3  ;;  %v2509_v31 = vsub.f32 %v2494_v11, %v6571_v43  ;;  %2593 = vmatprep.mubr.f32.mxu0 %v6588_v2  ;;  %v6603_v8 = vadd.f32 %v2515_v1, %v6560_v30  ;;  %v8252_v3 = vld [vmem:[#allocation54_spill] sm:$0xff]  ;;  %v8253_v1 = vld [vmem:[#allocation55_spill] sm:$0xff] }
 0xc61   :  { %v2496_v17 = vpop.f32.mrf.mxu1  ;;  %2594 = vmatmul.mubr.f32.vlgmr.msra.gmra.mxu0 %v6592_v52  ;;  %v8254_v11 = vld [vmem:[#allocation87_spill] sm:$0xff] }
 0xc62   :  { %v6598_v9 = vadd.f32 %v2516_v34, %v6556_v40  ;;  %v2510_v46 = vsub.f32 %v2496_v17, %v6568_v18  ;;  %2732 = vmatpush1.msra.mxu0 %v8228_v45  ;;  %v2517_v33 = vmul.f32 0.25, %v2509_v31  ;;  %v8255_v34 = vld [vmem:[#allocation88_spill] sm:$0xff]  ;;  %v8256_v31 = vld [vmem:[#allocation89_spill] sm:$0xff]  ;;  %v8257_v17 = vld [vmem:[#allocation90_spill] sm:$0xff] }
 0xc63   :  { %2733 = vmatprep.subr.mxu0 %v8229_v28  ;;  %v2500_v60 = vpop.f32.mrf.mxu1 }
 0xc64   :  { %v2518_v58 = vmul.f32 0.25, %v2510_v46  ;;  %v2511_v12 = vsub.f32 %v2500_v60, %v6579_v59  ;;  %2734 = vmatpush1.msra.mxu0 %v8230_v35  ;;  %2599 = vmatprep.mubr.f32.mxu0 %v6598_v9  ;;  %v6617_v55 = vadd.f32 %v2517_v33, %v6571_v43  ;;  %v8258_v46 = vld [vmem:[#allocation91_spill] sm:$0xff]  ;;  %v8259_v33 = vld [vmem:[#allocation92_spill] sm:$0xff]  ;;  %v8260_v60 = vld [vmem:[#allocation93_spill] sm:$0xff] }
 0xc65   :  { %2735 = vmatprep.subr.mxu0 %v8231_v7  ;;  %v2502_v38 = vpop.f32.mrf.mxu1  ;;  %2600 = vmatmul.mubr.f32.gmra.mxu0 %v6603_v8 }
 0xc66   :  { %v6612_v37 = vadd.f32 %v2518_v58, %v6568_v18  ;;  %v2512_v41 = vsub.f32 %v2502_v38, %v6576_v49  ;;  %2736 = vmatpush1.msra.mxu0 %v8232_v53  ;;  %v2519_v42 = vmul.f32 0.25, %v2511_v12  ;;  %v8261_v58 = vld [vmem:[#allocation94_spill] sm:$0xff]  ;;  %v8262_v12 = vld [vmem:[#allocation95_spill] sm:$0xff]  ;;  %v8263_v38 = vld [vmem:[#allocation96_spill] sm:$0xff] }
 0xc67   :  { %2737 = vmatprep.subr.mxu0 %v8233_v22 }
 0xc68   :  { %v2520_v51 = vmul.f32 0.25, %v2512_v41  ;;  %2738 = vmatpush1.msra.mxu0 %v8234_v39  ;;  %2605 = vmatprep.mubr.f32.mxu0 %v6612_v37  ;;  %v6629_v16 = vadd.f32 %v2519_v42, %v6579_v59  ;;  %v8264_v41 = vld [vmem:[#allocation97_spill] sm:$0xff]  ;;  %v8265_v42 = vld [vmem:[#allocation98_spill] sm:$0xff] }
 0xc69   :  { %2739 = vmatprep.subr.mxu0 %v8235_v13  ;;  %2606 = vmatmul.mubr.f32.gmra.mxu0 %v6617_v55 }
 0xc6a   :  { %v6625_v14 = vadd.f32 %v2520_v51, %v6576_v49  ;;  %2740 = vmatpush1.msra.mxu0 %v8236_v15  ;;  %v8266_v51 = vld [vmem:[#allocation99_spill] sm:$0xff] }
 0xc6b   :  { %2741 = vmatprep.subr.mxu0 %v8237_v20 }
 0xc6c   :  { %2742 = vmatpush1.msra.mxu0 %v8238_v25  ;;  %2611 = vmatprep.mubr.f32.mxu0 %v6625_v14 }
 0xc6d   :  { %2743 = vmatprep.subr.mxu0 %v8239_v32  ;;  %2612 = vmatmul.mubr.f32.gmra.mxu0 %v6629_v16 }
 0xc6e   :  { %2744 = vmatpush1.msra.mxu0 %v8240_v26  ;;  %2795 = vmatprep.mubr.f32.mxu0 %v6542_v10  ;;  %v8275_v10 = vld [vmem:[#allocation108_spill] sm:$0xff] }
 0xc6f   :  { %2745 = vmatprep.subr.mxu0 %v8241_v57 }
 0xc70   :  { %2746 = vmatpush1.msra.mxu0 %v8242_v56 }
 0xc71   :  { %2747 = vmatprep.subr.mxu0 %v8243_v4 }
 0xc72   :  { %2748 = vmatpush1.msra.mxu0 %v8244_v36 }
 0xc73   :  { %2749 = vmatprep.subr.mxu0 %v8245_v6 }
 0xc74   :  { %2750 = vmatpush1.msra.mxu0 %v8246_v61 }
 0xc75   :  { %2751 = vmatprep.subr.mxu0 %v8247_v5 }
 0xc76   :  { %2752 = vmatpush1.msra.mxu0 %v8248_v54 }
 0xc77   :  { %2753 = vmatprep.subr.mxu0 %v8249_v21 }
 0xc78   :  { %2754 = vmatpush1.msra.mxu0 %v8250_v48 }
 0xc79   :  { %2755 = vmatprep.subr.mxu0 %v8251_v47 }
 0xc7a   :  { %2756 = vmatpush1.msra.mxu0 %v8252_v3 }
 0xc7b   :  { %2757 = vmatprep.subr.mxu0 %v8253_v1 }
 0xc7c   :  { %2758 = vmatpush1.msra.mxu0 %v8254_v11 }
 0xc7d   :  { %2759 = vmatprep.subr.mxu0 %v8255_v34 }
 0xc7e   :  { %2760 = vmatpush1.msra.mxu0 %v8256_v31 }
 0xc7f   :  { %2761 = vmatprep.subr.mxu0 %v8257_v17 }
 0xc80   :  { %2762 = vmatpush1.msra.mxu0 %v8258_v46 }
 0xc81   :  { %2763 = vmatprep.subr.mxu0 %v8259_v33 }
 0xc82   :  { %2764 = vmatpush2.msra.mxu0 %v8260_v60 }
 0xc83   :  { %2765 = vmatprep.subr.mxu0 %v8261_v58 }
 0xc84   :  { %2766 = vmatpush2.msra.mxu0 %v8262_v12 }
 0xc85   :  { %2767 = vmatprep.subr.mxu0 %v8263_v38 }
 0xc86   :  { %2768 = vmatpush2.msra.mxu0 %v8264_v41 }
 0xc87   :  { %2769 = vmatprep.subr.mxu0 %v8265_v42  ;;  %v8276_v42 = vld [vmem:[#allocation109_spill] sm:$0xff] }
 0xc88   :  { %2770 = vmatpush2.msra.mxu0 %v8266_v51  ;;  %v8277_v51 = vld [vmem:[#allocation110_spill] sm:$0xff] }
 0xc89   :  { %2771 = vmatprep.subr.mxu0 %v8267_v27  ;;  %v8278_v27 = vld [vmem:[#allocation111_spill] sm:$0xff] }
 0xc8a   :  { %2772 = vmatpush2.msra.mxu0 %v8268_v29  ;;  %v8279_v29 = vld [vmem:[#allocation112_spill] sm:$0xff] }
 0xc8b   :  { %2773 = vmatprep.subr.mxu0 %v8269_v23  ;;  %v8280_v23 = vld [vmem:[#allocation113_spill] sm:$0xff] }
 0xc8c   :  { %2774 = vmatpush2.msra.mxu0 %v8270_v63  ;;  %v8281_v63 = vld [vmem:[#allocation114_spill] sm:$0xff] }
 0xc8d   :  { %2775 = vmatprep.subr.mxu0 %v8271_v44  ;;  %v8282_v44 = vld [vmem:[#allocation115_spill] sm:$0xff] }
 0xc8e   :  { %2776 = vmatpush2.msra.mxu0 %v8272_v0  ;;  %v8283_v0 = vld [vmem:[#allocation116_spill] sm:$0xff] }
 0xc8f   :  { %2777 = vmatprep.subr.mxu0 %v8273_v24  ;;  %v8284_v24 = vld [vmem:[#allocation117_spill] sm:$0xff] }
 0xc90   :  { %2778 = vmatpush2.msra.mxu0 %v8274_v62  ;;  %v8285_v62 = vld [vmem:[#allocation118_spill] sm:$0xff] }
 0xc91   :  { %2779 = vmatprep.subr.mxu0 %v8275_v10  ;;  %v8286_v10 = vld [vmem:[#allocation119_spill] sm:$0xff] }
 0xc92   :  { %2780 = vmatpush2.msra.mxu0 %v8276_v42  ;;  %v8287_v42 = vld [vmem:[#allocation120_spill] sm:$0xff] }
 0xc93   :  { %2781 = vmatprep.subr.mxu0 %v8277_v51  ;;  %v8288_v51 = vld [vmem:[#allocation121_spill] sm:$0xff] }
 0xc94   :  { %2782 = vmatpush2.msra.mxu0 %v8278_v27  ;;  %v8289_v27 = vld [vmem:[#allocation122_spill] sm:$0xff] }
 0xc95   :  { %2783 = vmatprep.subr.mxu0 %v8279_v29  ;;  %v8290_v29 = vld [vmem:[#allocation123_spill] sm:$0xff] }
 0xc96   :  { %2784 = vmatpush2.msra.mxu0 %v8280_v23 }
 0xc97   :  { %2785 = vmatprep.subr.mxu0 %v8281_v63 }
 0xc98   :  { %2786 = vmatpush2.msra.mxu0 %v8282_v44 }
 0xc99   :  { %2787 = vmatprep.subr.mxu0 %v8283_v0 }
 0xc9a   :  { %2788 = vmatpush2.msra.mxu0 %v8284_v24 }
 0xc9b   :  { %2789 = vmatprep.subr.mxu0 %v8285_v62 }
 0xc9c   :  { %2790 = vmatpush2.msra.mxu0 %v8286_v10 }
 0xc9d   :  { %2791 = vmatprep.subr.mxu0 %v8287_v42 }
 0xc9e   :  { %2792 = vmatpush2.msra.mxu0 %v8288_v51 }
 0xc9f   :  { %2793 = vmatprep.subr.mxu0 %v8289_v27 }
 0xca0   :  { %2794 = vmatpush2.msra.mxu0 %v8290_v29 }
 0xca1   :  { %2796 = vmatmul.mubr.f32.vlgmr.msra.gmra.mxu0 %v6546_v19 }
 0xca2   :  { %2801 = vmatprep.mubr.f32.mxu0 %v6556_v40 }
 0xca5   :  { %2802 = vmatmul.mubr.f32.gmra.mxu0 %v6560_v30 }
 0xca6   :  { %2807 = vmatprep.mubr.f32.mxu0 %v6568_v18 }
 0xca9   :  { %2808 = vmatmul.mubr.f32.gmra.mxu0 %v6571_v43 }
 0xcaa   :  { %2813 = vmatprep.mubr.f32.mxu0 %v6576_v49 }
 0xcad   :  { %2814 = vmatmul.mubr.f32.gmra.mxu0 %v6579_v59 }
 0xcae   :  { %3021 = vmatprep.mubr.f32.mxu0 %v7649_v50 }
 0xd21   :  { %v2595_v51 = vpop.f32.mrf.mxu0 }
 0xd22   :  { %v2618_v41 = vsub.f32 %v2595_v51, %v6592_v52 }
 0xd23   :  { %v2597_v27 = vpop.f32.mrf.mxu0 }
 0xd24   :  { %v2619_v63 = vsub.f32 %v2597_v27, %v6588_v2 }
 0xd25   :  { %v2601_v42 = vpop.f32.mrf.mxu0 }
 0xd26   :  { %v2620_v44 = vsub.f32 %v2601_v42, %v6603_v8  ;;  %v2627_v58 = vmul.f32 0.25, %v2619_v63  ;;  %v4076_v63 = vld [vmem:[%s7047_s5] sm:$0xff] }
 0xd27   :  { %v2603_v29 = vpop.f32.mrf.mxu0  ;;  %v8321_v42 = vld [vmem:[#allocation119_spill] sm:$0xff] }
 0xd28   :  { %v2621_v49 = vsub.f32 %v2603_v29, %v6598_v9  ;;  %v2628_v12 = vmul.f32 0.25, %v2620_v44 }
 0xd29   :  { %v2607_v10 = vpop.f32.mrf.mxu0 }
 0xd2a   :  { %v2622_v18 = vsub.f32 %v2607_v10, %v6617_v55  ;;  %v2636_v27 = vadd.f32 %v2628_v12, %v6603_v8  ;;  %v8294_v8 = vld [vmem:[#allocation97_spill] sm:$0xff] }
 0xd2b   :  { %v2609_v62 = vpop.f32.mrf.mxu0 }
 0xd2c   :  { %v2623_v0 = vsub.f32 %v2609_v62, %v6612_v37  ;;  %v2630_v38 = vmul.f32 0.25, %v2622_v18  ;;  %v2629_v62 = vmul.f32 0.25, %v2621_v49  ;;  %v2635_v18 = vadd.f32 %v2627_v58, %v6588_v2  ;;  %v4080_v49 = vld [vmem:[%s7047_s5 + $0x18] sm:$0xff] }
 0xd2d   :  { %v2613_v24 = vpop.f32.mrf.mxu0  ;;  %v8319_v58 = vld [vmem:[#allocation118_spill] sm:$0xff] }
 0xd2e   :  { %v2624_v30 = vsub.f32 %v2613_v24, %v6629_v16  ;;  %v2631_v19 = vmul.f32 0.25, %v2623_v0  ;;  %v2637_v0 = vadd.f32 %v2629_v62, %v6598_v9  ;;  %v8293_v9 = vld [vmem:[#allocation96_spill] sm:$0xff] }
 0xd2f   :  { %v2615_v43 = vpop.f32.mrf.mxu0  ;;  %v8322_v62 = vld [vmem:[#allocation120_spill] sm:$0xff] }
 0xd30   :  { %v2625_v59 = vsub.f32 %v2615_v43, %v6625_v14  ;;  %v2632_v40 = vmul.f32 0.25, %v2624_v30  ;;  %v2639_v29 = vadd.f32 %v2631_v19, %v6612_v37  ;;  %v2626_v43 = vmul.f32 0.25, %v2618_v41  ;;  %v4078_v19 = vld [vmem:[%s7047_s5 + $0x8] sm:$0xff]  ;;  %v8297_v37 = vld [vmem:[#allocation99_spill] sm:$0xff] }
 0xd31   :  { %v2638_v30 = vadd.f32 %v2630_v38, %v6617_v55  ;;  %v8320_v38 = vld [vmem:[#allocation67_spill] sm:$0xff] }
 0xd32   :  { %v2633_v23 = vmul.f32 0.25, %v2625_v59  ;;  %v2640_v10 = vadd.f32 %v2632_v40, %v6629_v16  ;;  %v2634_v44 = vadd.f32 %v2626_v43, %v6592_v52  ;;  %v4079_v40 = vld [vmem:[%s7047_s5 + $0x10] sm:$0xff]  ;;  %v8291_v59 = vld [vmem:[#allocation94_spill] sm:$0xff]  ;;  %v8292_v52 = vld [vmem:[#allocation95_spill] sm:$0xff] }
 0xd33   :  { %v8324_v43 = vld [vmem:[#allocation68_spill] sm:$0xff] }
 0xd34   :  { %v2641_v24 = vadd.f32 %v2633_v23, %v6625_v14  ;;  %v4077_v23 = vld [vmem:[#allocation5 + $0xf8] sm:$0xff] }
 0xd35   :  { %v8300_v14 = vld [vmem:[#allocation102_spill] sm:$0xff] }
 0xd36   :  { %2666 = vmatprep.subr.mxu1 %v2641_v24  ;;  %v8323_v24 = vld [vmem:[#allocation121_spill] sm:$0xff] }
 0xd37   :  { %2667 = vmatpush1.msra.mxu1 %v2640_v10 }
 0xd38   :  { %2668 = vmatprep.subr.mxu1 %v2639_v29 }
 0xd39   :  { %2669 = vmatpush1.msra.mxu1 %v2638_v30 }
 0xd3a   :  { %2670 = vmatprep.subr.mxu1 %v2637_v0  ;;  %v8325_v0 = vld [vmem:[#allocation122_spill] sm:$0xff] }
 0xd3b   :  { %2671 = vmatpush1.msra.mxu1 %v2636_v27 }
 0xd3c   :  { %2672 = vmatprep.subr.mxu1 %v2635_v18 }
 0xd3d   :  { %2673 = vmatpush1.msra.mxu1 %v2634_v44  ;;  %v8326_v44 = vld [vmem:[#allocation69_spill] sm:$0xff] }
 0xd3e   :  { %3737 = vmatmul.mubr.msk.f32.vlgmr.msra.gmra.mxu1 %vm635_vm2, %v4076_v63  ;;  %2844 = vmatprep.subr.mxu1 %v4077_v23  ;;  %v8327_v23 = vld [vmem:[#allocation123_spill] sm:$0xff] }
 0xd3f   :  { %2845 = vmatpush1.msra.mxu1 %v8228_v45  ;;  %2712 = vmatprep.mubr.f32.mxu1 %v7649_v50 }
 0xd40   :  { %2846 = vmatprep.subr.mxu1 %v8229_v28  ;;  %v8295_v28 = vld [vmem:[#allocation131_spill] sm:$0xff] }
 0xd41   :  { %2847 = vmatpush1.msra.mxu1 %v8230_v35 }
 0xd42   :  { %3738 = vmatmul.mubr.msk.f32.gmra.mxu1 %vm635_vm2, %v4078_v19  ;;  %2848 = vmatprep.subr.mxu1 %v8231_v7  ;;  %v8296_v7 = vld [vmem:[#allocation98_spill] sm:$0xff] }
 0xd43   :  { %2849 = vmatpush1.msra.mxu1 %v8232_v53  ;;  %2718 = vmatprep.mubr.f32.mxu1 %v7649_v50 }
 0xd44   :  { %2850 = vmatprep.subr.mxu1 %v8233_v22  ;;  %v8298_v22 = vld [vmem:[#allocation100_spill] sm:$0xff] }
 0xd45   :  { %2851 = vmatpush1.msra.mxu1 %v8234_v39  ;;  %v8299_v39 = vld [vmem:[#allocation101_spill] sm:$0xff] }
 0xd46   :  { %3739 = vmatmul.mubr.msk.f32.gmra.mxu1 %vm635_vm2, %v4079_v40  ;;  %2852 = vmatprep.subr.mxu1 %v8235_v13 }
 0xd47   :  { %2853 = vmatpush1.msra.mxu1 %v8236_v15  ;;  %2724 = vmatprep.mubr.f32.mxu1 %v7649_v50  ;;  %v8301_v15 = vld [vmem:[#allocation103_spill] sm:$0xff] }
 0xd48   :  { %2854 = vmatprep.subr.mxu1 %v8237_v20  ;;  %v8302_v20 = vld [vmem:[#allocation104_spill] sm:$0xff] }
 0xd49   :  { %2855 = vmatpush1.msra.mxu1 %v8238_v25  ;;  %v8303_v25 = vld [vmem:[#allocation105_spill] sm:$0xff] }
 0xd4a   :  { %3740 = vmatmul.mubr.msk.f32.gmra.mxu1 %vm635_vm2, %v4080_v49  ;;  %2856 = vmatprep.subr.mxu1 %v8239_v32  ;;  %v8304_v32 = vld [vmem:[#allocation106_spill] sm:$0xff] }
 0xd4b   :  { %2857 = vmatpush1.msra.mxu1 %v8240_v26  ;;  %v8305_v26 = vld [vmem:[#allocation107_spill] sm:$0xff]  ;;  %v8328_v49 = vld [vmem:[#allocation70_spill] sm:$0xff] }
 0xd4c   :  { %2858 = vmatprep.subr.mxu1 %v8241_v57 }
 0xd4d   :  { %2859 = vmatpush1.msra.mxu1 %v8242_v56  ;;  %v8306_v56 = vld [vmem:[#allocation108_spill] sm:$0xff] }
 0xd4e   :  { %2860 = vmatprep.subr.mxu1 %v8243_v4  ;;  %v8307_v4 = vld [vmem:[#allocation109_spill] sm:$0xff] }
 0xd4f   :  { %2861 = vmatpush1.msra.mxu1 %v8244_v36  ;;  %v8308_v36 = vld [vmem:[#allocation110_spill] sm:$0xff] }
 0xd50   :  { %2862 = vmatprep.subr.mxu1 %v8245_v6  ;;  %v8309_v6 = vld [vmem:[#allocation111_spill] sm:$0xff] }
 0xd51   :  { %2863 = vmatpush1.msra.mxu1 %v8246_v61 }
 0xd52   :  { %2864 = vmatprep.subr.mxu1 %v8247_v5  ;;  %v8310_v5 = vld [vmem:[#allocation112_spill] sm:$0xff] }
 0xd53   :  { %2865 = vmatpush1.msra.mxu1 %v8248_v54  ;;  %v8311_v54 = vld [vmem:[#allocation113_spill] sm:$0xff] }
 0xd54   :  { %2866 = vmatprep.subr.mxu1 %v8249_v21  ;;  %v8312_v21 = vld [vmem:[#allocation132_spill] sm:$0xff] }
 0xd55   :  { %2867 = vmatpush1.msra.mxu1 %v8250_v48 }
 0xd56   :  { %2868 = vmatprep.subr.mxu1 %v8251_v47  ;;  %v8313_v47 = vld [vmem:[#allocation114_spill] sm:$0xff] }
 0xd57   :  { %2869 = vmatpush1.msra.mxu1 %v8252_v3  ;;  %v8314_v3 = vld [vmem:[#allocation65_spill] sm:$0xff] }
 0xd58   :  { %2870 = vmatprep.subr.mxu1 %v8253_v1 }
 0xd59   :  { %2871 = vmatpush1.msra.mxu1 %v8254_v11  ;;  %v8315_v11 = vld [vmem:[#allocation115_spill] sm:$0xff] }
 0xd5a   :  { %2872 = vmatprep.subr.mxu1 %v8255_v34 }
 0xd5b   :  { %2873 = vmatpush1.msra.mxu1 %v8256_v31  ;;  %v8316_v31 = vld [vmem:[#allocation116_spill] sm:$0xff] }
 0xd5c   :  { %2874 = vmatprep.subr.mxu1 %v8257_v17  ;;  %v8317_v17 = vld [vmem:[#allocation117_spill] sm:$0xff] }
 0xd5d   :  { %2875 = vmatpush1.msra.mxu1 %v8258_v46 }
 0xd5e   :  { %2876 = vmatprep.subr.mxu1 %v8259_v33  ;;  %v8318_v33 = vld [vmem:[#allocation66_spill] sm:$0xff] }
 0xd5f   :  { %2877 = vmatpush2.msra.mxu1 %v8260_v60 }
 0xd60   :  { %2878 = vmatprep.subr.mxu1 %v8291_v59 }
 0xd61   :  { %v2797_v2 = vpop.f32.mrf.mxu0  ;;  %2879 = vmatpush2.msra.mxu1 %v8292_v52 }
 0xd62   :  { %2880 = vmatprep.subr.mxu1 %v8293_v9  ;;  %v2820_v48 = vsub.f32 %v2797_v2, %v8312_v21 }
 0xd63   :  { %v2799_v45 = vpop.f32.mrf.mxu0  ;;  %2881 = vmatpush2.msra.mxu1 %v8294_v8 }
 0xd64   :  { %v2821_v35 = vsub.f32 %v2799_v45, %v8295_v28  ;;  %2882 = vmatprep.subr.mxu1 %v8296_v7  ;;  %v2828_v46 = vmul.f32 0.25, %v2820_v48 }
 0xd65   :  { %2883 = vmatpush2.msra.mxu1 %v8297_v37  ;;  %v2803_v55 = vpop.f32.mrf.mxu0 }
 0xd66   :  { %v2829_v53 = vmul.f32 0.25, %v2821_v35  ;;  %2884 = vmatprep.subr.mxu1 %v8298_v22  ;;  %v2822_v60 = vsub.f32 %v2803_v55, %v8318_v33  ;;  %v6802_v10 = vadd.f32 %v2828_v46, %v8312_v21 }
 0xd67   :  { %2885 = vmatpush2.msra.mxu1 %v8299_v39  ;;  %v2805_v16 = vpop.f32.mrf.mxu0 }
 0xd68   :  { %v6774_v13 = vadd.f32 %v2829_v53, %v8295_v28  ;;  %2886 = vmatprep.subr.mxu1 %v8300_v14  ;;  %v2823_v1 = vsub.f32 %v2805_v16, %v8314_v3  ;;  %v2830_v29 = vmul.f32 0.25, %v2822_v60 }
 0xd69   :  { %2887 = vmatpush2.msra.mxu1 %v8301_v15  ;;  %v2809_v57 = vpop.f32.mrf.mxu0 }
 0xd6a   :  { %2908 = vmatprep.mubr.f32.mxu1 %v6774_v13  ;;  %2888 = vmatprep.subr.mxu1 %v8302_v20  ;;  %v2831_v12 = vmul.f32 0.25, %v2823_v1  ;;  %v2824_v30 = vsub.f32 %v2809_v57, %v8324_v43  ;;  %v2838_v19 = vadd.f32 %v2830_v29, %v8318_v33 }
 0xd6b   :  { %2889 = vmatpush2.msra.mxu1 %v8303_v25  ;;  %v2811_v61 = vpop.f32.mrf.mxu0 }
 0xd6c   :  { %2890 = vmatprep.subr.mxu1 %v8304_v32  ;;  %v2825_v41 = vsub.f32 %v2811_v61, %v8320_v38  ;;  %v2839_v27 = vadd.f32 %v2831_v12, %v8314_v3  ;;  %v2832_v40 = vmul.f32 0.25, %v2824_v30 }
 0xd6d   :  { %2891 = vmatpush2.msra.mxu1 %v8305_v26  ;;  %v2815_v34 = vpop.f32.mrf.mxu0 }
 0xd6e   :  { %2892 = vmatprep.subr.mxu1 %v8306_v56  ;;  %v2833_v18 = vmul.f32 0.25, %v2825_v41  ;;  %v2826_v59 = vsub.f32 %v2815_v34, %v8328_v49  ;;  %v2840_v9 = vadd.f32 %v2832_v40, %v8324_v43 }
 0xd6f   :  { %2893 = vmatpush2.msra.mxu1 %v8307_v4  ;;  %v2817_v51 = vpop.f32.mrf.mxu0 }
 0xd70   :  { %2894 = vmatprep.subr.mxu1 %v8308_v36  ;;  %v2827_v63 = vsub.f32 %v2817_v51, %v8326_v44  ;;  %v2841_v2 = vadd.f32 %v2833_v18, %v8320_v38  ;;  %v2834_v45 = vmul.f32 0.25, %v2826_v59  ;;  %v4081_v18 = vld [vmem:[%s7049_s7] sm:$0xff] }
 0xd71   :  { %2895 = vmatpush2.msra.mxu1 %v8309_v6  ;;  %v8330_v59 = vld [vmem:[#allocation19_spill] sm:$0xff] }
 0xd72   :  { %2896 = vmatprep.subr.mxu1 %v8310_v5  ;;  %v2835_v52 = vmul.f32 0.25, %v2827_v63  ;;  %v2842_v35 = vadd.f32 %v2834_v45, %v8328_v49 }
 0xd73   :  { %2897 = vmatpush2.msra.mxu1 %v8311_v54 }
 0xd74   :  { %2898 = vmatprep.subr.mxu1 %v8313_v47  ;;  %v2843_v8 = vadd.f32 %v2835_v52, %v8326_v44 }
 0xd75   :  { %2899 = vmatpush2.msra.mxu1 %v8315_v11 }
 0xd76   :  { %2900 = vmatprep.subr.mxu1 %v8316_v31 }
 0xd77   :  { %2901 = vmatpush2.msra.mxu1 %v8317_v17 }
 0xd78   :  { %2902 = vmatprep.subr.mxu1 %v8319_v58 }
 0xd79   :  { %2903 = vmatpush2.msra.mxu1 %v8321_v42 }
 0xd7a   :  { %2904 = vmatprep.subr.mxu1 %v8322_v62 }
 0xd7b   :  { %2905 = vmatpush2.msra.mxu1 %v8323_v24 }
 0xd7c   :  { %2906 = vmatprep.subr.mxu1 %v8325_v0 }
 0xd7d   :  { %2907 = vmatpush2.msra.mxu1 %v8327_v23  ;;  %v8329_v23 = vld [vmem:[#allocation20_spill] sm:$0xff] }
 0xd7e   :  { %2909 = vmatmul.mubr.f32.vlgmr.msra.gmra.mxu1 %v6802_v10 }
 0xd7f   :  { %2914 = vmatprep.mubr.f32.mxu1 %v2839_v27 }
 0xd82   :  { %2915 = vmatmul.mubr.f32.gmra.mxu1 %v2838_v19 }
 0xd83   :  { %2920 = vmatprep.mubr.f32.mxu1 %v2841_v2 }
 0xd86   :  { %2921 = vmatmul.mubr.f32.gmra.mxu1 %v2840_v9 }
 0xd87   :  { %2926 = vmatprep.mubr.f32.mxu1 %v2843_v8 }
 0xd8a   :  { %2927 = vmatmul.mubr.f32.gmra.mxu1 %v2842_v35 }
 0xd8b   :  { %3365 = vmatprep.mubr.f32.mxu1 %v7649_v50 }
 0xdfe   :  { %v6817_v7 = vpop.f32.mrf.mxu1 }
 0xe00   :  { %v6819_v37 = vpop.f32.mrf.mxu1 }
 0xe02   :  { %v6821_v53 = vpop.f32.mrf.mxu1 }
 0xe04   :  { %v6823_v55 = vpop.f32.mrf.mxu1 }
 0xe06   :  { %v6825_v22 = vpop.f32.mrf.mxu1 }
 0xe08   :  { %v6827_v39 = vpop.f32.mrf.mxu1 }
 0xe0a   :  { %v6829_v14 = vpop.f32.mrf.mxu1 }
 0xe0c   :  { %v6831_v15 = vpop.f32.mrf.mxu1 }
 0xe3e   :  { %v2910_v16 = vpop.f32.mrf.mxu1 }
 0xe3f   :  { %v2933_v31 = vsub.f32 %v2910_v16, %v6802_v10 }
 0xe40   :  { %v2912_v20 = vpop.f32.mrf.mxu1 }
 0xe41   :  { %v2934_v1 = vsub.f32 %v2912_v20, %v6774_v13  ;;  %v2941_v51 = vmul.f32 0.25, %v2933_v31 }
 0xe42   :  { %v2916_v25 = vpop.f32.mrf.mxu1 }
 0xe43   :  { %v2935_v48 = vsub.f32 %v2916_v25, %v2838_v19  ;;  %v2942_v41 = vmul.f32 0.25, %v2934_v1  ;;  %v2949_v0 = vadd.f32 %v2941_v51, %v6802_v10  ;;  %v4084_v10 = vld [vmem:[%s7049_s7 + $0x18] sm:$0xff] }
 0xe44   :  { %v2918_v32 = vpop.f32.mrf.mxu1 }
 0xe45   :  { %v2936_v5 = vsub.f32 %v2918_v32, %v2839_v27  ;;  %v2943_v58 = vmul.f32 0.25, %v2935_v48  ;;  %v2950_v30 = vadd.f32 %v2942_v41, %v6774_v13  ;;  %v4083_v13 = vld [vmem:[%s7049_s7 + $0x10] sm:$0xff] }
 0xe46   :  { %v2922_v26 = vpop.f32.mrf.mxu1 }
 0xe47   :  { %v2937_v6 = vsub.f32 %v2922_v26, %v2840_v9  ;;  %v2944_v46 = vmul.f32 0.25, %v2936_v5  ;;  %v2951_v29 = vadd.f32 %v2943_v58, %v2838_v19  ;;  %v8336_v58 = vld [vmem:[#allocation28_spill] sm:$0xff] }
 0xe48   :  { %v2924_v57 = vpop.f32.mrf.mxu1 }
 0xe49   :  { %v2938_v4 = vsub.f32 %v2924_v57, %v2841_v2  ;;  %v2945_v17 = vmul.f32 0.25, %v2937_v6  ;;  %v2952_v24 = vadd.f32 %v2944_v46, %v2839_v27  ;;  %v4082_v27 = vld [vmem:[%s7049_s7 + $0x8] sm:$0xff] }
 0xe4a   :  { %v2928_v56 = vpop.f32.mrf.mxu1 }
 0xe4b   :  { %v2939_v36 = vsub.f32 %v2928_v56, %v2842_v35  ;;  %v2946_v11 = vmul.f32 0.25, %v2938_v4  ;;  %v2953_v62 = vadd.f32 %v2945_v17, %v2840_v9  ;;  %v8331_v9 = vld [vmem:[#allocation21_spill] sm:$0xff]  ;;  %v2711_v56 = vadd.f32 %v6819_v37, %v8330_v59  ;;  %v8333_v4 = vld [vmem:[#allocation23_spill] sm:$0xff] }
 0xe4c   :  { %v2930_v61 = vpop.f32.mrf.mxu1  ;;  %v2715_v45 = vadd.f32 %v6821_v53, %v8331_v9  ;;  %v2717_v32 = vadd.f32 %v6823_v55, %v8331_v9  ;;  %v2723_v55 = vadd.f32 %v6827_v39, %v8333_v4 }
 0xe4d   :  { %v2940_v54 = vsub.f32 %v2930_v61, %v2843_v8  ;;  %v2947_v47 = vmul.f32 0.25, %v2939_v36  ;;  %v2954_v42 = vadd.f32 %v2946_v11, %v2841_v2  ;;  %v2709_v2 = vadd.f32 %v6817_v7, %v8330_v59  ;;  %v8334_v61 = vld [vmem:[#allocation24_spill] sm:$0xff] }
 0xe4e   :  { %v2721_v36 = vadd.f32 %v6825_v22, %v8333_v4  ;;  %v237_v4 = vld [vmem:[%s7052_s10 + $0x8] sm:$0xff] }
 0xe4f   :  { %v2948_v34 = vmul.f32 0.25, %v2940_v54  ;;  %v2955_v12 = vadd.f32 %v2947_v47, %v2842_v35 }
 0xe51   :  { %v2956_v60 = vadd.f32 %v2948_v34, %v2843_v8  ;;  %v8332_v8 = vld [vmem:[#allocation22_spill] sm:$0xff]  ;;  %v8335_v34 = vld [vmem:[#allocation27_spill] sm:$0xff] }
 0xe52   :  { %v2727_v37 = vadd.f32 %v6829_v14, %v8335_v34  ;;  %v2729_v41 = vadd.f32 %v6831_v15, %v8335_v34 }
 0xe53   :  { %2981 = vmatprep.subr.mxu0 %v2956_v60 }
 0xe54   :  { %2982 = vmatpush1.msra.mxu0 %v2955_v12 }
 0xe55   :  { %2983 = vmatprep.subr.mxu0 %v2954_v42 }
 0xe56   :  { %2984 = vmatpush1.msra.mxu0 %v2953_v62 }
 0xe57   :  { %2985 = vmatprep.subr.mxu0 %v2952_v24 }
 0xe58   :  { %2986 = vmatpush1.msra.mxu0 %v2951_v29 }
 0xe59   :  { %2987 = vmatprep.subr.mxu0 %v2950_v30 }
 0xe5a   :  { %2988 = vmatpush1.msra.mxu0 %v2949_v0 }
 0xe5b   :  { %3741 = vmatmul.mubr.msk.f32.vlgmr.msra.gmra.mxu0 %vm635_vm2, %v4081_v18 }
 0xe5c   :  { %3027 = vmatprep.mubr.f32.mxu0 %v7649_v50 }
 0xe5f   :  { %3742 = vmatmul.mubr.msk.f32.gmra.mxu0 %vm635_vm2, %v4082_v27 }
 0xe60   :  { %3033 = vmatprep.mubr.f32.mxu0 %v7649_v50 }
 0xe63   :  { %3743 = vmatmul.mubr.msk.f32.gmra.mxu0 %vm635_vm2, %v4083_v13 }
 0xe64   :  { %3039 = vmatprep.mubr.f32.mxu0 %v7649_v50 }
 0xe67   :  { %3744 = vmatmul.mubr.msk.f32.gmra.mxu0 %vm635_vm2, %v4084_v10 }
 0xe68   :  { %3526 = vmatprep.mubr.f32.mxu0 %v7649_v50 }
 0xf1b   :  { %v3023_v63 = vpop.f32.mrf.mxu0 }
 0xf1c   :  { %v3024_v19 = vadd.f32 %v3023_v63, %v8329_v23 }
 0xf1d   :  { %v3025_v40 = vpop.f32.mrf.mxu0 }
 0xf1e   :  { %v3046_v16 = vadd.f32 %v3024_v19, %v2709_v2  ;;  %v3026_v20 = vadd.f32 %v3025_v40, %v8329_v23 }
 0xf1f   :  { %v3029_v52 = vpop.f32.mrf.mxu0 }
 0xf20   :  { %v3030_v35 = vadd.f32 %v3029_v52, %v8332_v8  ;;  %v3054_v54 = vmul.f32 0.25, %v3046_v16  ;;  %v3047_v48 = vadd.f32 %v3026_v20, %v2711_v56 }
 0xf21   :  { %v3031_v25 = vpop.f32.mrf.mxu0 }
 0xf22   :  { %v3048_v26 = vadd.f32 %v3030_v35, %v2715_v45  ;;  %v3032_v57 = vadd.f32 %v3031_v25, %v8332_v8  ;;  %v3062_v42 = vadd.f32 %v3054_v54, %v8312_v21  ;;  %v3055_v39 = vmul.f32 0.25, %v3047_v48  ;;  %v259_v54 = vld [vmem:[%s7056_s14 + $0x8] sm:$0xf] }
 0xf23   :  { %v3035_v7 = vpop.f32.mrf.mxu0 }
 0xf24   :  { %v3056_v53 = vmul.f32 0.25, %v3048_v26  ;;  %v3049_v6 = vadd.f32 %v3032_v57, %v2717_v32  ;;  %v3036_v5 = vadd.f32 %v3035_v7, %v8334_v61  ;;  %v6888_v27 = vadd.f32 %v3055_v39, %v8295_v28  ;;  %v239_v7 = vld [vmem:[%s7052_s10 + $0x18] sm:$0xff] }
 0xf25   :  { %v3037_v47 = vpop.f32.mrf.mxu0 }
 0xf26   :  { %v3050_v1 = vadd.f32 %v3036_v5, %v2721_v36  ;;  %v3038_v11 = vadd.f32 %v3037_v47, %v8334_v61  ;;  %v3064_v31 = vadd.f32 %v3056_v53, %v8318_v33  ;;  %v3057_v22 = vmul.f32 0.25, %v3049_v6  ;;  %v236_v36 = vld [vmem:[%s7052_s10] sm:$0xff]  ;;  %v254_v53 = vld [vmem:[%s7054_s12 + $0x30] sm:$0xff] }
 0xf27   :  { %v3041_v17 = vpop.f32.mrf.mxu0  ;;  %v252_v6 = vld [vmem:[%s7054_s12 + $0x20] sm:$0xff]  ;;  %v250_v61 = vld [vmem:[%s7054_s12 + $0x10] sm:$0xff] }
 0xf28   :  { %v3058_v46 = vmul.f32 0.25, %v3050_v1  ;;  %v3051_v60 = vadd.f32 %v3038_v11, %v2723_v55  ;;  %v3042_v12 = vadd.f32 %v3041_v17, %v8336_v58  ;;  %v6885_v33 = vadd.f32 %v3057_v22, %v8314_v3  ;;  %v248_v5 = vld [vmem:[%s7054_s12] sm:$0xff] }
 0xf29   :  { %v3043_v51 = vpop.f32.mrf.mxu0  ;;  %v3092_v18 = vadd.f32 %v3064_v31, %v3062_v42 }
 0xf2a   :  { %v3066_v62 = vadd.f32 %v3058_v46, %v8324_v43  ;;  %v3059_v24 = vmul.f32 0.25, %v3051_v60  ;;  %v3052_v29 = vadd.f32 %v3042_v12, %v2727_v37  ;;  %v3044_v14 = vadd.f32 %v3043_v51, %v8336_v58 }
 0xf2b   :  { %v3183_v3 = vadd.f32 %v6885_v33, %v6888_v27 }
 0xf2c   :  { %v3060_v30 = vmul.f32 0.25, %v3052_v29  ;;  %v3053_v0 = vadd.f32 %v3044_v14, %v2729_v41  ;;  %v6891_v15 = vadd.f32 %v3059_v24, %v8320_v38  ;;  %v3094_v43 = vadd.f32 %v3092_v18, %v3066_v62 }
 0xf2e   :  { %v3061_v21 = vmul.f32 0.25, %v3053_v0  ;;  %v3068_v13 = vadd.f32 %v3060_v30, %v8328_v49  ;;  %v3185_v23 = vadd.f32 %v3183_v3, %v6891_v15  ;;  %v258_v3 = vld [vmem:[%s7056_s14] sm:$0xff] }
 0xf30   :  { %v3096_v10 = vadd.f32 %v3094_v43, %v3068_v13  ;;  %v6895_v63 = vadd.f32 %v3061_v21, %v8326_v44 }
 0xf32   :  { %3098 = vadd.xlane.f32.xlu0 %v3096_v10  ;;  %v3187_v28 = vadd.f32 %v3185_v23, %v6895_v63  ;;  %v238_v10 = vld [vmem:[%s7052_s10 + $0x10] sm:$0xff] }
 0xf36   :  { %3188 = vadd.xlane.f32.xlu0 %v3187_v28 }
 0xfbb   :  { %v3099_v19 = vpop.xlane.xlu0 %3098 }
 0xfbc   :  { %v3100_v38 = vrot.slane %v3099_v19, 4 }
 0xfbe   :  { %v3101_v40 = vadd.f32 %v3100_v38, %v3099_v19 }
 0xfc0   :  { %v3102_v59 = vrot.slane %v3101_v40, 2 }
 0xfc2   :  { %v3103_v2 = vadd.f32 %v3102_v59, %v3101_v40 }
 0xfc4   :  { %v3104_v49 = vrot.slane %v3103_v2, 1 }
 0xfc6   :  { %v3105_v52 = vadd.f32 %v3104_v49, %v3103_v2 }
 0xfc8   :  { %3759 = vpush %v3105_v52 }
 0xff9   :  { %s3760_s7 = spop %3759 }
 0xffa   :  { %s3109_s2 = smul.f32 0.00024414063, %s3760_s7 }
 0xffc   :  { %v3110_v44 = vstv %s3109_s2 }
 0xffd   :  { %v6901_v9 = vsub.f32 %v3062_v42, %v3110_v44  ;;  %v6903_v45 = vsub.f32 %v3064_v31, %v3110_v44  ;;  %v6905_v8 = vsub.f32 %v3066_v62, %v3110_v44  ;;  %v6907_v35 = vsub.f32 %v3068_v13, %v3110_v44  ;;  %v3189_v31 = vpop.xlane.xlu0 %3188 }
 0xffe   :  { %v3190_v17 = vrot.slane %v3189_v31, 4 }
 0xfff   :  { %v3119_v16 = vmul.f32 %v6901_v9, %v6901_v9  ;;  %v3121_v20 = vmul.f32 %v6903_v45, %v6903_v45  ;;  %v3123_v25 = vmul.f32 %v6905_v8, %v6905_v8  ;;  %v3125_v26 = vmul.f32 %v6907_v35, %v6907_v35 }
0x1000   :  { %v3191_v22 = vadd.f32 %v3190_v17, %v3189_v31 }
0x1001   :  { %v3136_v32 = vadd.f32 %v3121_v20, %v3119_v16 }
0x1002   :  { %v3192_v60 = vrot.slane %v3191_v22, 2 }
0x1003   :  { %v3138_v57 = vadd.f32 %v3136_v32, %v3123_v25 }
0x1004   :  { %v3193_v58 = vadd.f32 %v3192_v60, %v3191_v22 }
0x1005   :  { %v3140_v56 = vadd.f32 %v3138_v57, %v3125_v26 }
0x1006   :  { %v3194_v12 = vrot.slane %v3193_v58, 1 }
0x1007   :  { %3142 = vadd.xlane.f32.xlu1 %v3140_v56 }
0x1008   :  { %v3195_v42 = vadd.f32 %v3194_v12, %v3193_v58 }
0x1018   :  { %3286 = vperm.xlu1 %3779, %v239_v7  }
0x101c   :  { %3276 = vperm.xlu1 %3779, %v237_v4  }
0x1020   :  { %3271 = vperm.xlu1 %3779, %v236_v36   ;;  %v232_v36 = vld [vmem:[%s7051_s9] sm:$0xff] }
0x1024   :  { %3430 = vperm.xlu1 %3779, %v254_v53  }
0x1028   :  { %3420 = vperm.xlu1 %3779, %v252_v6  }
0x102c   :  { %3410 = vperm.xlu1 %3779, %v250_v61  }
0x1030   :  { %3400 = vperm.xlu1 %3779, %v248_v5  }
0x1034   :  { %3598 = vperm.xlu1 %3779, %v259_v54  }
0x1090   :  { %v3143_v48 = vpop.xlane.xlu1 %3142 }
0x1091   :  { %v3144_v47 = vrot.slane %v3143_v48, 4 }
0x1093   :  { %v3145_v55 = vadd.f32 %v3144_v47, %v3143_v48 }
0x1094   :  { %v3287_v61 = vpop.permute.xlu1 %3286 }
0x1095   :  { %v3146_v1 = vrot.slane %v3145_v55, 2 }
0x1097   :  { %v3147_v11 = vadd.f32 %v3146_v1, %v3145_v55 }
0x1098   :  { %v3277_v47 = vpop.permute.xlu1 %3276 }
0x1099   :  { %v3148_v34 = vrot.slane %v3147_v11, 1 }
0x109b   :  { %v3149_v37 = vadd.f32 %v3148_v34, %v3147_v11 }
0x109c   :  { %v3272_v60 = vpop.permute.xlu1 %3271 }
0x109d   :  { %3761 = vpush %v3149_v37 }
0x10ce   :  { %s3762_s4 = spop %3761 }
0x10cf   :  { %s3153_s30 = smul.f32 0.00024414063, %s3762_s4  ;;  %s4125_s4 = scalar_lea.vmem %s3695_s1, 512 }
0x10d0   :  { %p4126_p10 = scmp.ne.s32.totalorder %s3695_s1, %s4125_s4  ;;  %p4131_p12 = scmp.lt.s32.totalorder %s4125_s4, %s4125_s4 }
0x10d1   :  { %s3156_s16 = sadd.f32 1e-05, %s3153_s30 }
0x10d2   :  { %p4132_p13 = por %p4131_p12, %p4130_p11 }
0x10d3   :  { %v3157_v46 = vstv %s3156_s16 }
0x10d4   :  { %3781 = vrsqrt.f32 %v3157_v46  ;;  %p4133_p0 = pnand %p4132_p13, %p4126_p10 }
0x10e1   :  { %v3782_v41 = vpop.eup %3781 }
0x10e2   :  { %3763 = vpush %v3782_v41 }
0x10e3   :  { %3765 = vpush %v3195_v42 }
0x1113   :  { %s6941_s17 = spop %3763 }
0x1114   :  { %s3766_s7 = spop %3765  ;;  %v3160_v44 = vstv %s6941_s17 }
0x1115   :  { %s3199_s2 = smul.f32 0.00024414063, %s3766_s7  ;;  %v3267_v25 = vmul.f32 %v3160_v44, %v6907_v35  ;;  %v3265_v26 = vmul.f32 %v3160_v44, %v6905_v8  ;;  %v3263_v56 = vmul.f32 %v3160_v44, %v6903_v45  ;;  %v3261_v4 = vmul.f32 %v3160_v44, %v6901_v9  ;;  %v233_v45 = vld [vmem:[%s7051_s9 + $0x8] sm:$0xff]  ;;  %v234_v9 = vld [vmem:[%s7051_s9 + $0x10] sm:$0xff]  ;;  %v235_v8 = vld [vmem:[%s7051_s9 + $0x18] sm:$0xff]  ;;  %v3431_v44 = vpop.permute.xlu1 %3430 }
0x1117   :  { %v3200_v39 = vstv %s3199_s2 }
0x1118   :  { %v3202_v51 = vsub.f32 %v6888_v27, %v3200_v39  ;;  %v3204_v62 = vsub.f32 %v6885_v33, %v3200_v39  ;;  %v3206_v24 = vsub.f32 %v6891_v15, %v3200_v39  ;;  %v3208_v29 = vsub.f32 %v6895_v63, %v3200_v39  ;;  %v255_v33 = vld [vmem:[%s7054_s12 + $0x38] sm:$0xff]  ;;  %v253_v27 = vld [vmem:[%s7054_s12 + $0x28] sm:$0xff] }
0x1119   :  { %v251_v15 = vld [vmem:[%s7054_s12 + $0x18] sm:$0xff]  ;;  %v249_v63 = vld [vmem:[%s7054_s12 + $0x8] sm:$0xff] }
0x111a   :  { %v3210_v14 = vmul.f32 %v3202_v51, %v3202_v51  ;;  %v3212_v30 = vmul.f32 %v3204_v62, %v3204_v62  ;;  %v3214_v0 = vmul.f32 %v3206_v24, %v3206_v24  ;;  %v3216_v21 = vmul.f32 %v3208_v29, %v3208_v29 }
0x111c   :  { %v3227_v18 = vadd.f32 %v3212_v30, %v3210_v14  ;;  %v240_v30 = vld [vmem:[%s7053_s11] sm:$0xff] }
0x111e   :  { %v3229_v13 = vadd.f32 %v3227_v18, %v3214_v0  ;;  %v241_v0 = vld [vmem:[%s7053_s11 + $0x8] sm:$0xff]  ;;  %v242_v18 = vld [vmem:[%s7053_s11 + $0x10] sm:$0xff] }
0x1120   :  { %v3231_v43 = vadd.f32 %v3229_v13, %v3216_v21  ;;  %v243_v21 = vld [vmem:[%s7053_s11 + $0x18] sm:$0xff]  ;;  %v244_v13 = vld [vmem:[%s7053_s11 + $0x20] sm:$0xff] }
0x1122   :  { %3232 = vadd.xlane.f32.xlu0 %v3231_v43  ;;  %v245_v43 = vld [vmem:[%s7053_s11 + $0x28] sm:$0xff] }
0x1138   :  { %3281 = vperm.xlu0 %3778, %v238_v10   ;;  %v246_v10 = vld [vmem:[%s7053_s11 + $0x30] sm:$0xff] }
0x113c   :  { %3435 = vperm.xlu0 %3778, %v255_v33   ;;  %v247_v33 = vld [vmem:[%s7053_s11 + $0x38] sm:$0xff] }
0x1140   :  { %3425 = vperm.xlu0 %3778, %v253_v27  }
0x1144   :  { %3415 = vperm.xlu0 %3778, %v251_v15  }
0x1148   :  { %3405 = vperm.xlu0 %3778, %v249_v63  }
0x114c   :  { %3593 = vperm.xlu0 %3778, %v258_v3  }
0x11ab   :  { %v3233_v23 = vpop.xlane.xlu0 %3232 }
0x11ac   :  { %v3234_v28 = vrot.slane %v3233_v23, 4 }
0x11ae   :  { %v3235_v19 = vadd.f32 %v3234_v28, %v3233_v23 }
0x11b0   :  { %v3236_v38 = vrot.slane %v3235_v19, 2 }
0x11b2   :  { %v3237_v40 = vadd.f32 %v3236_v38, %v3235_v19 }
0x11b3   :  { %v3282_v1 = vpop.permute.xlu0 %3281 }
0x11b4   :  { %v3238_v59 = vrot.slane %v3237_v40, 1 }
0x11b6   :  { %v3239_v2 = vadd.f32 %v3238_v59, %v3237_v40 }
0x11b8   :  { %3767 = vpush %v3239_v2 }
0x11e9   :  { %s3768_s29 = spop %3767 }
0x11ea   :  { %s3243_s5 = smul.f32 0.00024414063, %s3768_s29 }
0x11ec   :  { %s3246_s6 = sadd.f32 1e-05, %s3243_s5 }
0x11ee   :  { %v3247_v49 = vstv %s3246_s6 }
0x11ef   :  { %3783 = vrsqrt.f32 %v3247_v49  ;;  %v3436_v49 = vpop.permute.xlu0 %3435 }
0x11fc   :  { %v3784_v52 = vpop.eup %3783 }
0x11fd   :  { %3769 = vpush %v3784_v52 }
0x122e   :  { %s3770_s12 = spop %3769 }
0x122f   :  { %v3250_v16 = vstv %s3770_s12 }
0x1230   :  { %v3268_v20 = vmul.f32 %v3250_v16, %v3208_v29  ;;  %v3266_v32 = vmul.f32 %v3250_v16, %v3206_v24  ;;  %v3264_v57 = vmul.f32 %v3250_v16, %v3204_v62  ;;  %v3262_v7 = vmul.f32 %v3250_v16, %v3202_v51 }
0x1232   :  { %3325 = vmatprep.subr.mxu1 %v3268_v20 }
0x1233   :  { %3326 = vmatpush1.msra.mxu1 %v3267_v25  ;;  %v3426_v25 = vpop.permute.xlu0 %3425 }
0x1234   :  { %3327 = vmatprep.subr.mxu1 %v3266_v32 }
0x1235   :  { %3328 = vmatpush1.msra.mxu1 %v3265_v26  ;;  %v3421_v26 = vpop.permute.xlu1 %3420 }
0x1236   :  { %3329 = vmatprep.subr.mxu1 %v3264_v57 }
0x1237   :  { %3330 = vmatpush1.msra.mxu1 %v3263_v56 }
0x1238   :  { %3331 = vmatprep.subr.mxu1 %v3262_v7 }
0x1239   :  { %3332 = vmatpush1.msra.mxu1 %v3261_v4 }
0x123a   :  { %3745 = vmatmul.mubr.msk.f32.vlgmr.msra.gmra.mxu1 %vm635_vm2, %v232_v36 }
0x123b   :  { %3371 = vmatprep.mubr.f32.mxu1 %v7649_v50 }
0x123e   :  { %3746 = vmatmul.mubr.msk.f32.gmra.mxu1 %vm635_vm2, %v233_v45 }
0x123f   :  { %3377 = vmatprep.mubr.f32.mxu1 %v7649_v50 }
0x1242   :  { %3747 = vmatmul.mubr.msk.f32.gmra.mxu1 %vm635_vm2, %v234_v9 }
0x1243   :  { %3383 = vmatprep.mubr.f32.mxu1 %v7649_v50 }
0x1246   :  { %3748 = vmatmul.mubr.msk.f32.gmra.mxu1 %vm635_vm2, %v235_v8  ;;  %v3416_v8 = vpop.permute.xlu0 %3415 }
0x1247   :  { %3672 = vmatprep.mubr.f32.mxu1 %v7649_v50 }
0x12fa   :  { %v3367_v35 = vpop.f32.mrf.mxu1 }
0x12fb   :  { %v3368_v39 = vadd.f32 %v3367_v35, %v3272_v60 }
0x12fc   :  { %v3369_v53 = vpop.f32.mrf.mxu1 }
0x12fd   :  { %v3370_v41 = vadd.f32 %v3369_v53, %v3272_v60  ;;  %v3390_v14 = vmax.f32 %v3368_v39, 0.0 }
0x12fe   :  { %v3373_v6 = vpop.f32.mrf.mxu1 }
0x12ff   :  { %v3374_v58 = vadd.f32 %v3373_v6, %v3277_v47  ;;  %v3391_v29 = vmax.f32 %v3370_v41, 0.0 }
0x1300   :  { %v3375_v5 = vpop.f32.mrf.mxu1 }
0x1301   :  { %v3376_v22 = vadd.f32 %v3375_v5, %v3277_v47  ;;  %v3392_v24 = vmax.f32 %v3374_v58, 0.0  ;;  %v3411_v5 = vpop.permute.xlu1 %3410 }
0x1302   :  { %v3379_v54 = vpop.f32.mrf.mxu1 }
0x1303   :  { %v3380_v17 = vadd.f32 %v3379_v54, %v3282_v1  ;;  %v3393_v62 = vmax.f32 %v3376_v22, 0.0 }
0x1304   :  { %v3381_v48 = vpop.f32.mrf.mxu1 }
0x1305   :  { %v3382_v37 = vadd.f32 %v3381_v48, %v3282_v1  ;;  %v3394_v51 = vmax.f32 %v3380_v17, 0.0  ;;  %v3401_v58 = vpop.permute.xlu1 %3400 }
0x1306   :  { %v3385_v55 = vpop.f32.mrf.mxu1 }
0x1307   :  { %v3386_v11 = vadd.f32 %v3385_v55, %v3287_v61  ;;  %v3395_v42 = vmax.f32 %v3382_v37, 0.0 }
0x1308   :  { %v3387_v34 = vpop.f32.mrf.mxu1 }
0x1309   :  { %v3388_v31 = vadd.f32 %v3387_v34, %v3287_v61  ;;  %v3396_v12 = vmax.f32 %v3386_v11, 0.0 }
0x130b   :  { %v3397_v46 = vmax.f32 %v3388_v31, 0.0  ;;  %v3406_v31 = vpop.permute.xlu0 %3405 }
0x130d   :  { %3486 = vmatprep.subr.mxu0 %v3397_v46 }
0x130e   :  { %3487 = vmatpush1.msra.mxu0 %v3396_v12 }
0x130f   :  { %3488 = vmatprep.subr.mxu0 %v3395_v42 }
0x1310   :  { %3489 = vmatpush1.msra.mxu0 %v3394_v51 }
0x1311   :  { %3490 = vmatprep.subr.mxu0 %v3393_v62 }
0x1312   :  { %3491 = vmatpush1.msra.mxu0 %v3392_v24 }
0x1313   :  { %3492 = vmatprep.subr.mxu0 %v3391_v29 }
0x1314   :  { %3493 = vmatpush1.msra.mxu0 %v3390_v14 }
0x1315   :  { %3749 = vmatmul.mubr.msk.f32.vlgmr.msra.gmra.mxu0 %vm635_vm2, %v240_v30 }
0x1316   :  { %3532 = vmatprep.mubr.f32.mxu0 %v7649_v50 }
0x1319   :  { %3750 = vmatmul.mubr.msk.f32.gmra.mxu0 %vm635_vm2, %v241_v0  ;;  %v256_v0 = vld [vmem:[%s7055_s13] sm:$0xff] }
0x131a   :  { %3538 = vmatprep.mubr.f32.mxu0 %v7649_v50 }
0x131d   :  { %3751 = vmatmul.mubr.msk.f32.gmra.mxu0 %vm635_vm2, %v242_v18  ;;  %v257_v18 = vld [vmem:[%s7055_s13 + $0x8] sm:$0xf] }
0x131e   :  { %3544 = vmatprep.mubr.f32.mxu0 %v7649_v50 }
0x1321   :  { %3752 = vmatmul.mubr.msk.f32.gmra.mxu0 %vm635_vm2, %v243_v21  ;;  %v3594_v21 = vpop.permute.xlu0 %3593 }
0x1322   :  { %3550 = vmatprep.mubr.f32.mxu0 %v7649_v50 }
0x1325   :  { %3753 = vmatmul.mubr.msk.f32.gmra.mxu0 %vm635_vm2, %v244_v13 }
0x1326   :  { %3556 = vmatprep.mubr.f32.mxu0 %v7649_v50 }
0x1329   :  { %3754 = vmatmul.mubr.msk.f32.gmra.mxu0 %vm635_vm2, %v245_v43 }
0x132a   :  { %3562 = vmatprep.mubr.f32.mxu0 %v7649_v50 }
0x132d   :  { %3755 = vmatmul.mubr.msk.f32.gmra.mxu0 %vm635_vm2, %v246_v10 }
0x132e   :  { %3568 = vmatprep.mubr.f32.mxu0 %v7649_v50 }
0x1331   :  { %3756 = vmatmul.mubr.msk.f32.gmra.mxu0 %vm635_vm2, %v247_v33 }
0x13d5   :  { %v3528_v27 = vpop.f32.mrf.mxu0 }
0x13d6   :  { %v3529_v51 = vadd.f32 %v3528_v27, %v3401_v58  ;;  %v3599_v27 = vpop.permute.xlu1 %3598 }
0x13d7   :  { %v3530_v15 = vpop.f32.mrf.mxu0 }
0x13d8   :  { %v3531_v42 = vadd.f32 %v3530_v15, %v3401_v58  ;;  %v3575_v30 = vmax.f32 %v3529_v51, 0.0 }
0x13d9   :  { %v3534_v63 = vpop.f32.mrf.mxu0 }
0x13da   :  { %v3535_v12 = vadd.f32 %v3534_v63, %v3406_v31  ;;  %v3576_v14 = vmax.f32 %v3531_v42, 0.0 }
0x13db   :  { %v3536_v3 = vpop.f32.mrf.mxu0 }
0x13dc   :  { %v3537_v46 = vadd.f32 %v3536_v3, %v3406_v31  ;;  %v3577_v29 = vmax.f32 %v3535_v12, 0.0 }
0x13dd   :  { %v3540_v23 = vpop.f32.mrf.mxu0 }
0x13de   :  { %v3541_v17 = vadd.f32 %v3540_v23, %v3411_v5  ;;  %v3578_v24 = vmax.f32 %v3537_v46, 0.0 }
0x13df   :  { %v3542_v28 = vpop.f32.mrf.mxu0 }
0x13e0   :  { %v3543_v34 = vadd.f32 %v3542_v28, %v3411_v5  ;;  %v3579_v62 = vmax.f32 %v3541_v17, 0.0 }
0x13e1   :  { %v3546_v19 = vpop.f32.mrf.mxu0 }
0x13e2   :  { %v3547_v1 = vadd.f32 %v3546_v19, %v3416_v8  ;;  %v3580_v39 = vmax.f32 %v3543_v34, 0.0 }
0x13e3   :  { %v3548_v38 = vpop.f32.mrf.mxu0 }
0x13e4   :  { %v3549_v47 = vadd.f32 %v3548_v38, %v3416_v8  ;;  %v3581_v41 = vmax.f32 %v3547_v1, 0.0 }
0x13e5   :  { %v3552_v40 = vpop.f32.mrf.mxu0 }
0x13e6   :  { %v3553_v54 = vadd.f32 %v3552_v40, %v3421_v26  ;;  %v3582_v60 = vmax.f32 %v3549_v47, 0.0 }
0x13e7   :  { %v3554_v59 = vpop.f32.mrf.mxu0 }
0x13e8   :  { %v3555_v6 = vadd.f32 %v3554_v59, %v3421_v26  ;;  %v3583_v22 = vmax.f32 %v3553_v54, 0.0 }
0x13e9   :  { %v3558_v2 = vpop.f32.mrf.mxu0 }
0x13ea   :  { %v3559_v35 = vadd.f32 %v3558_v2, %v3426_v25  ;;  %v3584_v37 = vmax.f32 %v3555_v6, 0.0 }
0x13eb   :  { %v3560_v52 = vpop.f32.mrf.mxu0 }
0x13ec   :  { %v3561_v45 = vadd.f32 %v3560_v52, %v3426_v25  ;;  %v3585_v11 = vmax.f32 %v3559_v35, 0.0 }
0x13ed   :  { %v3564_v16 = vpop.f32.mrf.mxu0 }
0x13ee   :  { %v3565_v36 = vadd.f32 %v3564_v16, %v3431_v44  ;;  %v3586_v55 = vmax.f32 %v3561_v45, 0.0 }
0x13ef   :  { %v3566_v20 = vpop.f32.mrf.mxu0 }
0x13f0   :  { %v3567_v7 = vadd.f32 %v3566_v20, %v3431_v44  ;;  %v3587_v48 = vmax.f32 %v3565_v36, 0.0 }
0x13f1   :  { %v3570_v32 = vpop.f32.mrf.mxu0 }
0x13f2   :  { %v3571_v57 = vadd.f32 %v3570_v32, %v3436_v49  ;;  %v3588_v61 = vmax.f32 %v3567_v7, 0.0 }
0x13f3   :  { %v3572_v56 = vpop.f32.mrf.mxu0 }
0x13f4   :  { %v3573_v4 = vadd.f32 %v3572_v56, %v3436_v49  ;;  %v3589_v53 = vmax.f32 %v3571_v57, 0.0 }
0x13f6   :  { %v3590_v9 = vmax.f32 %v3573_v4, 0.0 }
0x13f8   :  { %3624 = vmatprep.subr.mxu1 %v3590_v9 }
0x13f9   :  { %3625 = vmatpush1.msra.mxu1 %v3589_v53 }
0x13fa   :  { %3626 = vmatprep.subr.mxu1 %v3588_v61 }
0x13fb   :  { %3627 = vmatpush1.msra.mxu1 %v3587_v48 }
0x13fc   :  { %3628 = vmatprep.subr.mxu1 %v3586_v55 }
0x13fd   :  { %3629 = vmatpush1.msra.mxu1 %v3585_v11 }
0x13fe   :  { %3630 = vmatprep.subr.mxu1 %v3584_v37 }
0x13ff   :  { %3631 = vmatpush1.msra.mxu1 %v3583_v22 }
0x1400   :  { %3632 = vmatprep.subr.mxu1 %v3582_v60 }
0x1401   :  { %3633 = vmatpush1.msra.mxu1 %v3581_v41 }
0x1402   :  { %3634 = vmatprep.subr.mxu1 %v3580_v39 }
0x1403   :  { %3635 = vmatpush1.msra.mxu1 %v3579_v62 }
0x1404   :  { %3636 = vmatprep.subr.mxu1 %v3578_v24 }
0x1405   :  { %3637 = vmatpush1.msra.mxu1 %v3577_v29 }
0x1406   :  { %3638 = vmatprep.subr.mxu1 %v3576_v14 }
0x1407   :  { %3639 = vmatpush1.msra.mxu1 %v3575_v30 }
0x1408   :  { %3757 = vmatmul.mubr.msk.f32.vlgmr.msra.gmra.mxu1 %vm3601_vm3, %v256_v0 }
0x1409   :  { %3678 = vmatprep.mubr.f32.mxu1 %v7649_v50 }
0x140c   :  { %3758 = vmatmul.mubr.msk.f32.gmra.mxu1 %vm3601_vm3, %v257_v18 }
0x14c8   :  { %v3674_v13 = vpop.f32.mrf.mxu1 }
0x14c9   :  { %v3675_v43 = vadd.f32 %v3674_v13, %v3594_v21 }
0x14ca   :  { %v3676_v10 = vpop.f32.mrf.mxu1 }
0x14cb   :  { %3685 = vst [vmem:[#allocation7] sm:$0xff] %v3675_v43  ;;  %v3677_v33 = vadd.f32 %v3676_v10, %v3594_v21 }
0x14cc   :  { %v3680_v15 = vpop.f32.mrf.mxu1 }
0x14cd   :  { %3686 = vst [vmem:[#allocation7 + $0x8] sm:$0xff] %v3677_v33  ;;  %v3681_v63 = vadd.f32 %v3680_v15, %v3599_v27 }
0x14ce   :  { %v3682_v3 = vpop.f32.mrf.mxu1 }
0x14cf   :  { %3687 = vst [vmem:[#allocation7 + $0x10] sm:$0xf] %v3681_v63  ;;  %v3683_v50 = vadd.f32 %v3682_v3, %v3599_v27 }
0x14d1   :  { %3688 = vst [vmem:[#allocation7 + $0x18] sm:$0xf] %v3683_v50 }
0x14d2   :  { %4136 = shalt.err (!%p4133_p0)
}
0x14d3   :  { %3700 = dma.vmem_to_hbm [thread:$0]  %s3695_s1, 512, %s7057_s15, [#allocation4], %s4152_s21, %s4152_s21, %s4153_s22  }
0x14d4   :  { %4149 = dma.done.wait [#allocation4], 512  }
0x14d5   :  { %4150 = vsyncadd [#allocation4], 4294966784 }
0x14d6   :  { %3704 = vsyncpa [#allocation3], 1 }
0x14d7   :  { %3705 = vsyncpa [#allocation6], 1 }
0x14d8   :  { %3706 = vsyncpa [#allocation4], 1 }

</bundles_post_ra>
